<compile_context>
chip_gen: v7x
topology: tpu7x:2x2x1
jax: 0.10.0
libtpu: 0.0.40
codegen_flags: <defaults>
</compile_context>

<pallas_src>
import jax
import jax.numpy as jnp
from jax import lax
from jax.experimental import pallas as pl
from jax.experimental.pallas import tpu as pltpu

FEATURE_SIZE = 20
NUM_HEADS = 4
HEAD_DIM = FEATURE_SIZE // NUM_HEADS
FF_HIDDEN = 12
NUM_LAYERS = 3
LSTM_HIDDEN = 8
LN_EPS = 1e-5


# ----------------------------------------------------------------------------
# Pallas kernel: merged home+away forward pass in a single invocation.
# ----------------------------------------------------------------------------
def game_rating_kernel(
    x_ref, selt_ref, amask_ref, hmask_ref,
    wqkv_ref, bqkv_ref, wo_ref, wff1_ref, bff1_ref, wff2_ref, lvec_ref,
    wih_ref, whh_ref, bgate_ref, wfc_ref, bfc_ref,
    out_ref,
    gstep_ref,
):
    T2, F = x_ref.shape                      # merged token slab (G*2N, F)
    L = wqkv_ref.shape[0]
    R, B = selt_ref.shape                    # R = 2N players, B games
    G = T2 // R
    LH = whh_ref.shape[0]
    H = NUM_HEADS

    def mm(a, b):
        # bf16 operands, f32 accumulation: a single MXU pass per matmul.
        return lax.dot_general(a.astype(jnp.bfloat16), b.astype(jnp.bfloat16),
                               (((1,), (0,)), ((), ())),
                               preferred_element_type=jnp.float32)

    def layer_norm(x, gamma, beta):
        mu = jnp.mean(x, axis=-1, keepdims=True)
        d = x - mu
        var = jnp.mean(d * d, axis=-1, keepdims=True)
        return d * lax.rsqrt(var + LN_EPS) * gamma + beta

    amask = amask_ref[...]                   # (H*T2, T2) additive mask, hoisted
    hmask = hmask_ref[...]                   # (H*T2, F) per-head 0/1 mask, hoisted

    def encoder_layer(l, src):
        # post-norm nn.TransformerEncoderLayer; dropout == identity (eval mode)
        lv = lvec_ref[l]                                        # (6, F) packed vectors
        qkv = mm(src, wqkv_ref[l]) + bqkv_ref[l]                # (T2, 3F); Q pre-scaled
        q = qkv[:, 0:F]
        k = qkv[:, F:2 * F]
        v = qkv[:, 2 * F:3 * F]
        # stack heads along the sublane axis: rows [h*T2 : (h+1)*T2] = head h
        q_stack = jnp.concatenate([q] * H, axis=0) * hmask      # (H*T2, F)
        s = lax.dot_general(q_stack.astype(jnp.bfloat16), k.astype(jnp.bfloat16),
                            (((1,), (1,)), ((), ())),
                            preferred_element_type=jnp.float32) + amask  # (H*T2, T2)
        s = s - jnp.max(s, axis=-1, keepdims=True)
        p = jnp.exp(s)
        p = p * pl.reciprocal(jnp.sum(p, axis=-1, keepdims=True), approx=True)
        c = mm(p, v) * hmask                                    # (H*T2, F)
        # recombine heads: 4 aligned sublane slices + adds (T2 % 8 == 0)
        ctx = (c[0:T2] + c[T2:2 * T2] + c[2 * T2:3 * T2] + c[3 * T2:4 * T2])
        attn = mm(ctx, wo_ref[l]) + lv[0:1]                     # fused out-proj
        x1 = layer_norm(src + attn, lv[2:3], lv[3:4])
        ff = jnp.maximum(mm(x1, wff1_ref[l]) + bff1_ref[l], 0.0)
        ff = mm(ff, wff2_ref[l]) + lv[1:2]
        return layer_norm(x1 + ff, lv[4:5], lv[5:6])

    src = lax.fori_loop(0, L, encoder_layer, x_ref[...], unroll=True)

    # LSTM over games; input-path gates hoisted into one matmul over all tokens,
    # staged per game step into scratch so the fori_loop indexes the (untiled)
    # leading dim dynamically.
    gates_x = mm(src, wih_ref[...]) + bgate_ref[...]            # (T2, 4*LH)
    for g in range(G):                                          # static stores
        gstep_ref[g] = gates_x[g * R:(g + 1) * R, :]

    def lstm_step(g, carry):
        hs, cs = carry
        gates = gstep_ref[g] + mm(hs, whh_ref[...])             # (R, 4*LH)
        i_g = jax.nn.sigmoid(gates[:, 0:LH])
        f_g = jax.nn.sigmoid(gates[:, LH:2 * LH])
        g_g = jnp.tanh(gates[:, 2 * LH:3 * LH])
        o_g = jax.nn.sigmoid(gates[:, 3 * LH:4 * LH])
        cs = f_g * cs + i_g * g_g
        hs = o_g * jnp.tanh(cs)
        return hs, cs

    hs0 = jnp.zeros((R, LH), jnp.float32)
    cs0 = jnp.zeros((R, LH), jnp.float32)
    hs, _ = lax.fori_loop(0, G, lstm_step, (hs0, cs0), unroll=True)

    # fc head + signed play-time aggregation on the VPU (no 1-wide MXU pass)
    strength = jnp.sum(hs * wfc_ref[...], axis=-1, keepdims=True) + bfc_ref[...]  # (R, 1)
    out_ref[...] = jnp.sum(selt_ref[...] * strength, axis=0, keepdims=True)       # (1, B)


# ----------------------------------------------------------------------------
# Wrapper: parameter / input re-layout (glue) + pallas_call
# ----------------------------------------------------------------------------
def game_rating_forward(params, home_stats, away_stats, home_pt, away_pt):
    B, P, G, F = home_stats.shape
    N = B * P
    R = 2 * N
    T2 = G * R
    L, HID, LH, H, Dh = NUM_LAYERS, FF_HIDDEN, LSTM_HIDDEN, NUM_HEADS, HEAD_DIM

    # token slab: t = g*(2N) + team*N + n, n = b*P + p
    home_tok = jnp.transpose(home_stats.reshape(N, G, F), (1, 0, 2))   # (G, N, F)
    away_tok = jnp.transpose(away_stats.reshape(N, G, F), (1, 0, 2))
    x = jnp.stack([home_tok, away_tok], axis=1).reshape(T2, F).astype(jnp.float32)

    # signed play-time selection (home +, away -), transposed so the kernel
    # reduces over sublanes:  out[b] = sum_r sel_t[r, b] * strength[r]
    eye = jnp.eye(B, dtype=jnp.float32)
    sel_home = (eye[:, :, None] * home_pt[:, None, :]).reshape(B, N)
    sel_away = (eye[:, :, None] * away_pt[:, None, :]).reshape(B, N)
    sel_t = jnp.concatenate([sel_home, -sel_away], axis=1).T.astype(jnp.float32)  # (R, B)

    # attention mask: attend only within the same (team, game) block
    blk = jnp.arange(T2, dtype=jnp.int32) // N
    amask = jnp.where(blk[:, None] == blk[None, :], 0.0, -1e9).astype(jnp.float32)
    amask_stack = jnp.tile(amask, (H, 1))                                  # (H*T2, T2)

    # per-head column-selection mask for the stacked-head attention
    row_head = jnp.arange(H * T2, dtype=jnp.int32) // T2
    col_head = jnp.arange(F, dtype=jnp.int32) // Dh
    hmask = (row_head[:, None] == col_head[None, :]).astype(jnp.float32)   # (H*T2, F)

    # Weights pre-transposed so every kernel matmul contracts ((1,),(0,));
    # Dh**-0.5 folded into the Q projection; matmul weights pre-cast to bf16.
    qkv_scale = jnp.concatenate([jnp.full((F,), Dh ** -0.5, jnp.float32),
                                 jnp.ones((2 * F,), jnp.float32)])
    w_qkv = (jnp.transpose(params["in_proj_w"], (0, 2, 1)) * qkv_scale).astype(jnp.bfloat16)
    b_qkv = (params["in_proj_b"] * qkv_scale).reshape(L, 1, 3 * F).astype(jnp.float32)
    w_out = jnp.transpose(params["out_w"], (0, 2, 1)).astype(jnp.bfloat16)
    w_ff1 = jnp.transpose(params["ff1_w"], (0, 2, 1)).astype(jnp.bfloat16)
    b_ff1 = params["ff1_b"].reshape(L, 1, HID).astype(jnp.float32)
    w_ff2 = jnp.transpose(params["ff2_w"], (0, 2, 1)).astype(jnp.bfloat16)
    # packed per-layer (F,)-vectors: [out_b, ff2_b, ln1_w, ln1_b, ln2_w, ln2_b]
    lvec = jnp.stack([params["out_b"], params["ff2_b"],
                      params["ln1_w"], params["ln1_b"],
                      params["ln2_w"], params["ln2_b"]], axis=1).astype(jnp.float32)
    w_ih = params["w_ih"].T.astype(jnp.bfloat16)                           # (F, 4*LH)
    w_hh = params["w_hh"].T.astype(jnp.bfloat16)                           # (LH, 4*LH)
    b_gate = (params["b_ih"] + params["b_hh"]).reshape(1, 4 * LH).astype(jnp.float32)
    w_fc = params["fc_w"].reshape(1, LH).astype(jnp.float32)               # VPU use: keep f32
    b_fc = params["fc_b"].reshape(1, 1).astype(jnp.float32)

    args = (x, sel_t, amask_stack, hmask,
            w_qkv, b_qkv, w_out, w_ff1, b_ff1, w_ff2, lvec,
            w_ih, w_hh, b_gate, w_fc, b_fc)

    def full_spec(a):
        zeros = (0,) * a.ndim
        return pl.BlockSpec(a.shape, lambda i, _z=zeros: _z)

    out = pl.pallas_call(
        game_rating_kernel,
        grid=(1,),
        out_shape=jax.ShapeDtypeStruct((1, B), jnp.float32),
        in_specs=[full_spec(a) for a in args],
        out_specs=pl.BlockSpec((1, B), lambda i: (0, 0)),
        scratch_shapes=[pltpu.VMEM((G, R, 4 * LH), jnp.float32)],
        compiler_params=pltpu.CompilerParams(
            dimension_semantics=("arbitrary",)),
    )(*args)

    return out[0] + params["hfa"].astype(jnp.float32)


# ----------------------------------------------------------------------------
# Deterministic parameter init (PyTorch-native shapes)
# ----------------------------------------------------------------------------
def init_params(key):
    L, F, HID, LH = NUM_LAYERS, FEATURE_SIZE, FF_HIDDEN, LSTM_HIDDEN
    ks = jax.random.split(key, 14)
    rnd = lambda k, shape: 0.1 * jax.random.normal(k, shape, dtype=jnp.float32)
    return {
        "in_proj_w": rnd(ks[0], (L, 3 * F, F)),
        "in_proj_b": rnd(ks[1], (L, 3 * F)),
        "out_w": rnd(ks[2], (L, F, F)),
        "out_b": rnd(ks[3], (L, F)),
        "ff1_w": rnd(ks[4], (L, HID, F)),
        "ff1_b": rnd(ks[5], (L, HID)),
        "ff2_w": rnd(ks[6], (L, F, HID)),
        "ff2_b": rnd(ks[7], (L, F)),
        "ln1_w": jnp.ones((L, F), jnp.float32),
        "ln1_b": jnp.zeros((L, F), jnp.float32),
        "ln2_w": jnp.ones((L, F), jnp.float32),
        "ln2_b": jnp.zeros((L, F), jnp.float32),
        "w_ih": rnd(ks[8], (4 * LH, F)),
        "w_hh": rnd(ks[9], (4 * LH, LH)),
        "b_ih": rnd(ks[10], (4 * LH,)),
        "b_hh": rnd(ks[11], (4 * LH,)),
        "fc_w": rnd(ks[12], (1, LH)),
        "fc_b": rnd(ks[13], (1,)),
        "hfa": jnp.array(4.5, dtype=jnp.float32),
    }


# ----------------------------------------------------------------------------
# Pure-JAX reference (mirrors the PyTorch forward, eval mode)
# ----------------------------------------------------------------------------
def reference_forward(params, home_stats, away_stats, home_pt, away_pt):
    F, H, Dh, L, LH = FEATURE_SIZE, NUM_HEADS, HEAD_DIM, NUM_LAYERS, LSTM_HIDDEN

    def layer_norm(x, g, b):
        mu = jnp.mean(x, axis=-1, keepdims=True)
        var = jnp.mean((x - mu) ** 2, axis=-1, keepdims=True)
        return (x - mu) / jnp.sqrt(var + LN_EPS) * g + b

    def player_model(x):
        B, P, G, _ = x.shape
        N = B * P
        h = x.reshape(N, G, F)                       # (seq=N, batch=G, feat)
        for l in range(L):
            Wq, Wk, Wv = (params["in_proj_w"][l, 0:F],
                          params["in_proj_w"][l, F:2 * F],
                          params["in_proj_w"][l, 2 * F:])
            bq, bk, bv = (params["in_proj_b"][l, 0:F],
                          params["in_proj_b"][l, F:2 * F],
                          params["in_proj_b"][l, 2 * F:])
            q = jnp.einsum("ngf,ef->nge", h, Wq) + bq
            k = jnp.einsum("ngf,ef->nge", h, Wk) + bk
            v = jnp.einsum("ngf,ef->nge", h, Wv) + bv
            split = lambda t: t.reshape(N, G, H, Dh)
            qh, kh, vh = split(q) * (Dh ** -0.5), split(k), split(v)
            s = jnp.einsum("nghd,mghd->ghnm", qh, kh)
            p = jax.nn.softmax(s, axis=-1)
            ctx = jnp.einsum("ghnm,mghd->nghd", p, vh).reshape(N, G, F)
            attn = jnp.einsum("nge,fe->ngf", ctx, params["out_w"][l]) + params["out_b"][l]
            h = layer_norm(h + attn, params["ln1_w"][l], params["ln1_b"][l])
            ff = jax.nn.relu(jnp.einsum("ngf,kf->ngk", h, params["ff1_w"][l])
                             + params["ff1_b"][l])
            ff = jnp.einsum("ngk,fk->ngf", ff, params["ff2_w"][l]) + params["ff2_b"][l]
            h = layer_norm(h + ff, params["ln2_w"][l], params["ln2_b"][l])
        hs = jnp.zeros((N, LH), jnp.float32)
        cs = jnp.zeros((N, LH), jnp.float32)
        for t in range(G):
            xt = h[:, t, :]
            gates = (xt @ params["w_ih"].T + params["b_ih"]
                     + hs @ params["w_hh"].T + params["b_hh"])
            i = jax.nn.sigmoid(gates[:, 0:LH])
            f = jax.nn.sigmoid(gates[:, LH:2 * LH])
            gc = jnp.tanh(gates[:, 2 * LH:3 * LH])
            o = jax.nn.sigmoid(gates[:, 3 * LH:])
            cs = f * cs + i * gc
            hs = o * jnp.tanh(cs)
        strength = (hs @ params["fc_w"].T + params["fc_b"])[:, 0]
        return strength.reshape(B, P)

    ho = player_model(home_stats)
    ao = player_model(away_stats)
    return (jnp.sum(ho * home_pt, axis=1) - jnp.sum(ao * away_pt, axis=1)
            + params["hfa"])


if __name__ == "__main__":
    key = jax.random.PRNGKey(0)
    kp, k1, k2, k3, k4 = jax.random.split(key, 5)

    B, P, G, F = 2, 3, 4, FEATURE_SIZE
    params = init_params(kp)
    home_stats = jax.random.normal(k1, (B, P, G, F), dtype=jnp.float32)
    away_stats = jax.random.normal(k2, (B, P, G, F), dtype=jnp.float32)
    home_pt = jax.random.uniform(k3, (B, P), dtype=jnp.float32)
    away_pt = jax.random.uniform(k4, (B, P), dtype=jnp.float32)

    fwd = jax.jit(game_rating_forward)
    out = jax.block_until_ready(fwd(params, home_stats, away_stats, home_pt, away_pt))

    ref = reference_forward(params, home_stats, away_stats, home_pt, away_pt)
    assert out.shape == (B,)
    assert bool(jnp.all(jnp.isfinite(out)))
    # Tolerance covers single-pass bf16 MXU matmuls (kernel) vs default-precision
    # XLA matmuls (reference) plus the ~2^-12 approx-reciprocal softmax error.
    assert bool(jnp.allclose(out, ref, atol=2e-2, rtol=2e-3)), (out, ref)
    print("KERNEL_OK")
</pallas_src>

<mosaic_0001>
module attributes {stable_mosaic.version = 11 : i64} {
  func.func @game_rating_kernel(%arg0: i32, %arg1: memref<48x20xf32, #tpu.memory_space<vmem>>, %arg2: memref<12x2xf32, #tpu.memory_space<vmem>>, %arg3: memref<192x48xf32, #tpu.memory_space<vmem>>, %arg4: memref<192x20xf32, #tpu.memory_space<vmem>>, %arg5: memref<3x20x60xbf16, #tpu.memory_space<vmem>>, %arg6: memref<3x1x60xf32, #tpu.memory_space<vmem>>, %arg7: memref<3x20x20xbf16, #tpu.memory_space<vmem>>, %arg8: memref<3x20x12xbf16, #tpu.memory_space<vmem>>, %arg9: memref<3x1x12xf32, #tpu.memory_space<vmem>>, %arg10: memref<3x12x20xbf16, #tpu.memory_space<vmem>>, %arg11: memref<3x6x20xf32, #tpu.memory_space<vmem>>, %arg12: memref<20x32xbf16, #tpu.memory_space<vmem>>, %arg13: memref<8x32xbf16, #tpu.memory_space<vmem>>, %arg14: memref<1x32xf32, #tpu.memory_space<vmem>>, %arg15: memref<1x8xf32, #tpu.memory_space<vmem>>, %arg16: memref<1x1xf32, #tpu.memory_space<vmem>>, %arg17: memref<1x2xf32, #tpu.memory_space<vmem>>, %arg18: memref<4x12x32xf32, #tpu.memory_space<vmem>>) attributes {dimension_semantics = [#tpu.dimension_semantics<arbitrary>], iteration_bounds = array<i64: 1>, scalar_prefetch = 0 : i64, scratch_operands = 1 : i64, tpu.core_type = #tpu.core_type<tc>, window_params = [{pipeline_mode = #tpu.pipeline_mode<synchronous>, transform_indices = @transform_0, window_bounds = array<i64: 48, 20>}, {pipeline_mode = #tpu.pipeline_mode<synchronous>, transform_indices = @transform_1, window_bounds = array<i64: 12, 2>}, {pipeline_mode = #tpu.pipeline_mode<synchronous>, transform_indices = @transform_2, window_bounds = array<i64: 192, 48>}, {pipeline_mode = #tpu.pipeline_mode<synchronous>, transform_indices = @transform_3, window_bounds = array<i64: 192, 20>}, {pipeline_mode = #tpu.pipeline_mode<synchronous>, transform_indices = @transform_4, window_bounds = array<i64: 3, 20, 60>}, {pipeline_mode = #tpu.pipeline_mode<synchronous>, transform_indices = @transform_5, window_bounds = array<i64: 3, 1, 60>}, {pipeline_mode = #tpu.pipeline_mode<synchronous>, transform_indices = @transform_6, window_bounds = array<i64: 3, 20, 20>}, {pipeline_mode = #tpu.pipeline_mode<synchronous>, transform_indices = @transform_7, window_bounds = array<i64: 3, 20, 12>}, {pipeline_mode = #tpu.pipeline_mode<synchronous>, transform_indices = @transform_8, window_bounds = array<i64: 3, 1, 12>}, {pipeline_mode = #tpu.pipeline_mode<synchronous>, transform_indices = @transform_9, window_bounds = array<i64: 3, 12, 20>}, {pipeline_mode = #tpu.pipeline_mode<synchronous>, transform_indices = @transform_10, window_bounds = array<i64: 3, 6, 20>}, {pipeline_mode = #tpu.pipeline_mode<synchronous>, transform_indices = @transform_11, window_bounds = array<i64: 20, 32>}, {pipeline_mode = #tpu.pipeline_mode<synchronous>, transform_indices = @transform_12, window_bounds = array<i64: 8, 32>}, {pipeline_mode = #tpu.pipeline_mode<synchronous>, transform_indices = @transform_13, window_bounds = array<i64: 1, 32>}, {pipeline_mode = #tpu.pipeline_mode<synchronous>, transform_indices = @transform_14, window_bounds = array<i64: 1, 8>}, {pipeline_mode = #tpu.pipeline_mode<synchronous>, transform_indices = @transform_15, window_bounds = array<i64: 1, 1>}, {pipeline_mode = #tpu.pipeline_mode<synchronous>, transform_indices = @transform_16, window_bounds = array<i64: 1, 2>}]} {
    %c0 = arith.constant 0 : index
    %c0_0 = arith.constant 0 : index
    %0 = vector.load %arg3[%c0, %c0_0] : memref<192x48xf32, #tpu.memory_space<vmem>>, vector<192x48xf32>
    %c0_1 = arith.constant 0 : index
    %c0_2 = arith.constant 0 : index
    %1 = vector.load %arg4[%c0_1, %c0_2] : memref<192x20xf32, #tpu.memory_space<vmem>>, vector<192x20xf32>
    %c0_3 = arith.constant 0 : index
    %c0_4 = arith.constant 0 : index
    %2 = vector.load %arg1[%c0_3, %c0_4] : memref<48x20xf32, #tpu.memory_space<vmem>>, vector<48x20xf32>
    %c0_i32 = arith.constant 0 : i32
    %3 = arith.index_cast %c0_i32 : i32 to index
    %c0_5 = arith.constant 0 : index
    %c0_6 = arith.constant 0 : index
    %4 = vector.load %arg11[%3, %c0_5, %c0_6] : memref<3x6x20xf32, #tpu.memory_space<vmem>>, vector<1x6x20xf32>
    %5 = vector.shape_cast %4 : vector<1x6x20xf32> to vector<6x20xf32>
    %6 = arith.index_cast %c0_i32 : i32 to index
    %c0_7 = arith.constant 0 : index
    %c0_8 = arith.constant 0 : index
    %7 = vector.load %arg5[%6, %c0_7, %c0_8] : memref<3x20x60xbf16, #tpu.memory_space<vmem>>, vector<1x20x60xbf16>
    %8 = vector.shape_cast %7 : vector<1x20x60xbf16> to vector<20x60xbf16>
    %9 = arith.truncf %2 : vector<48x20xf32> to vector<48x20xbf16>
    %cst = arith.constant dense<0.000000e+00> : vector<48x60xf32>
    %10 = tpu.matmul %9, %8, %cst {dimension_numbers = #tpu.dot_dimension_numbers<[1], [0], [0], [1], [0, 0, 1, 1], [], []>} : vector<48x20xbf16>, vector<20x60xbf16>, vector<48x60xf32> -> vector<48x60xf32>
    %11 = arith.index_cast %c0_i32 : i32 to index
    %c0_9 = arith.constant 0 : index
    %c0_10 = arith.constant 0 : index
    %12 = vector.load %arg6[%11, %c0_9, %c0_10] : memref<3x1x60xf32, #tpu.memory_space<vmem>>, vector<1x1x60xf32>
    %13 = vector.shape_cast %12 : vector<1x1x60xf32> to vector<1x60xf32>
    %14 = vector.broadcast %13 : vector<1x60xf32> to vector<48x60xf32>
    %15 = arith.addf %10, %14 : vector<48x60xf32>
    %16 = vector.extract_strided_slice %15 {offsets = [0, 0], sizes = [48, 20], strides = [1, 1]} : vector<48x60xf32> to vector<48x20xf32>
    %17 = vector.extract_strided_slice %15 {offsets = [0, 20], sizes = [48, 20], strides = [1, 1]} : vector<48x60xf32> to vector<48x20xf32>
    %18 = vector.extract_strided_slice %15 {offsets = [0, 40], sizes = [48, 20], strides = [1, 1]} : vector<48x60xf32> to vector<48x20xf32>
    %19 = tpu.concatenate %16, %16, %16, %16 in 0 : vector<48x20xf32>, vector<48x20xf32>, vector<48x20xf32>, vector<48x20xf32> -> vector<192x20xf32>
    %20 = arith.mulf %19, %1 : vector<192x20xf32>
    %21 = arith.truncf %20 : vector<192x20xf32> to vector<192x20xbf16>
    %22 = arith.truncf %17 : vector<48x20xf32> to vector<48x20xbf16>
    %cst_11 = arith.constant dense<0.000000e+00> : vector<192x48xf32>
    %23 = tpu.matmul %21, %22, %cst_11 {dimension_numbers = #tpu.dot_dimension_numbers<[1], [1], [0], [0], [0, 0, 1, 0], [], []>} : vector<192x20xbf16>, vector<48x20xbf16>, vector<192x48xf32> -> vector<192x48xf32>
    %24 = arith.addf %23, %0 : vector<192x48xf32>
    %cst_12 = arith.constant dense<0xFF800000> : vector<192xf32>
    %25 = vector.multi_reduction <maximumf>, %24, %cst_12 [1] : vector<192x48xf32> to vector<192xf32>
    %26 = vector.shape_cast %25 : vector<192xf32> to vector<192x1xf32>
    %27 = vector.broadcast %26 : vector<192x1xf32> to vector<192x48xf32>
    %28 = arith.subf %24, %27 : vector<192x48xf32>
    %29 = math.exp %28 : vector<192x48xf32>
    %cst_13 = arith.constant dense<0.000000e+00> : vector<192xf32>
    %30 = vector.multi_reduction <add>, %29, %cst_13 [1] : vector<192x48xf32> to vector<192xf32>
    %31 = vector.shape_cast %30 : vector<192xf32> to vector<192x1xf32>
    %32 = tpu.reciprocal %31 {approx = true} : vector<192x1xf32> -> vector<192x1xf32>
    %33 = vector.broadcast %32 : vector<192x1xf32> to vector<192x48xf32>
    %34 = arith.mulf %29, %33 : vector<192x48xf32>
    %35 = arith.truncf %34 : vector<192x48xf32> to vector<192x48xbf16>
    %36 = arith.truncf %18 : vector<48x20xf32> to vector<48x20xbf16>
    %cst_14 = arith.constant dense<0.000000e+00> : vector<192x20xf32>
    %37 = tpu.matmul %35, %36, %cst_14 {dimension_numbers = #tpu.dot_dimension_numbers<[1], [0], [0], [1], [0, 0, 1, 1], [], []>} : vector<192x48xbf16>, vector<48x20xbf16>, vector<192x20xf32> -> vector<192x20xf32>
    %38 = arith.mulf %37, %1 : vector<192x20xf32>
    %39 = vector.extract_strided_slice %38 {offsets = [0, 0], sizes = [48, 20], strides = [1, 1]} : vector<192x20xf32> to vector<48x20xf32>
    %40 = vector.extract_strided_slice %38 {offsets = [48, 0], sizes = [48, 20], strides = [1, 1]} : vector<192x20xf32> to vector<48x20xf32>
    %41 = arith.addf %39, %40 : vector<48x20xf32>
    %42 = vector.extract_strided_slice %38 {offsets = [96, 0], sizes = [48, 20], strides = [1, 1]} : vector<192x20xf32> to vector<48x20xf32>
    %43 = arith.addf %41, %42 : vector<48x20xf32>
    %44 = vector.extract_strided_slice %38 {offsets = [144, 0], sizes = [48, 20], strides = [1, 1]} : vector<192x20xf32> to vector<48x20xf32>
    %45 = arith.addf %43, %44 : vector<48x20xf32>
    %46 = arith.index_cast %c0_i32 : i32 to index
    %c0_15 = arith.constant 0 : index
    %c0_16 = arith.constant 0 : index
    %47 = vector.load %arg7[%46, %c0_15, %c0_16] : memref<3x20x20xbf16, #tpu.memory_space<vmem>>, vector<1x20x20xbf16>
    %48 = vector.shape_cast %47 : vector<1x20x20xbf16> to vector<20x20xbf16>
    %49 = arith.truncf %45 : vector<48x20xf32> to vector<48x20xbf16>
    %cst_17 = arith.constant dense<0.000000e+00> : vector<48x20xf32>
    %50 = tpu.matmul %49, %48, %cst_17 {dimension_numbers = #tpu.dot_dimension_numbers<[1], [0], [0], [1], [0, 0, 1, 1], [], []>} : vector<48x20xbf16>, vector<20x20xbf16>, vector<48x20xf32> -> vector<48x20xf32>
    %51 = vector.extract_strided_slice %5 {offsets = [0, 0], sizes = [1, 20], strides = [1, 1]} : vector<6x20xf32> to vector<1x20xf32>
    %52 = vector.broadcast %51 : vector<1x20xf32> to vector<48x20xf32>
    %53 = arith.addf %50, %52 : vector<48x20xf32>
    %54 = arith.addf %2, %53 : vector<48x20xf32>
    %55 = vector.extract_strided_slice %5 {offsets = [2, 0], sizes = [1, 20], strides = [1, 1]} : vector<6x20xf32> to vector<1x20xf32>
    %56 = vector.extract_strided_slice %5 {offsets = [3, 0], sizes = [1, 20], strides = [1, 1]} : vector<6x20xf32> to vector<1x20xf32>
    %cst_18 = arith.constant dense<0.000000e+00> : vector<48xf32>
    %57 = vector.multi_reduction <add>, %54, %cst_18 [1] : vector<48x20xf32> to vector<48xf32>
    %58 = vector.shape_cast %57 : vector<48xf32> to vector<48x1xf32>
    %cst_19 = arith.constant 2.000000e+01 : f32
    %59 = vector.broadcast %cst_19 : f32 to vector<48x1xf32>
    %60 = arith.divf %58, %59 : vector<48x1xf32>
    %61 = vector.broadcast %60 : vector<48x1xf32> to vector<48x20xf32>
    %62 = arith.subf %54, %61 : vector<48x20xf32>
    %63 = arith.mulf %62, %62 : vector<48x20xf32>
    %cst_20 = arith.constant dense<0.000000e+00> : vector<48xf32>
    %64 = vector.multi_reduction <add>, %63, %cst_20 [1] : vector<48x20xf32> to vector<48xf32>
    %65 = vector.shape_cast %64 : vector<48xf32> to vector<48x1xf32>
    %cst_21 = arith.constant 2.000000e+01 : f32
    %66 = vector.broadcast %cst_21 : f32 to vector<48x1xf32>
    %67 = arith.divf %65, %66 : vector<48x1xf32>
    %cst_22 = arith.constant 9.99999974E-6 : f32
    %68 = vector.broadcast %cst_22 : f32 to vector<48x1xf32>
    %69 = arith.addf %67, %68 : vector<48x1xf32>
    %70 = math.rsqrt %69 : vector<48x1xf32>
    %71 = vector.broadcast %70 : vector<48x1xf32> to vector<48x20xf32>
    %72 = arith.mulf %62, %71 : vector<48x20xf32>
    %73 = vector.broadcast %55 : vector<1x20xf32> to vector<48x20xf32>
    %74 = arith.mulf %72, %73 : vector<48x20xf32>
    %75 = vector.broadcast %56 : vector<1x20xf32> to vector<48x20xf32>
    %76 = arith.addf %74, %75 : vector<48x20xf32>
    %77 = arith.index_cast %c0_i32 : i32 to index
    %c0_23 = arith.constant 0 : index
    %c0_24 = arith.constant 0 : index
    %78 = vector.load %arg8[%77, %c0_23, %c0_24] : memref<3x20x12xbf16, #tpu.memory_space<vmem>>, vector<1x20x12xbf16>
    %79 = vector.shape_cast %78 : vector<1x20x12xbf16> to vector<20x12xbf16>
    %80 = arith.truncf %76 : vector<48x20xf32> to vector<48x20xbf16>
    %cst_25 = arith.constant dense<0.000000e+00> : vector<48x12xf32>
    %81 = tpu.matmul %80, %79, %cst_25 {dimension_numbers = #tpu.dot_dimension_numbers<[1], [0], [0], [1], [0, 0, 1, 1], [], []>} : vector<48x20xbf16>, vector<20x12xbf16>, vector<48x12xf32> -> vector<48x12xf32>
    %82 = arith.index_cast %c0_i32 : i32 to index
    %c0_26 = arith.constant 0 : index
    %c0_27 = arith.constant 0 : index
    %83 = vector.load %arg9[%82, %c0_26, %c0_27] : memref<3x1x12xf32, #tpu.memory_space<vmem>>, vector<1x1x12xf32>
    %84 = vector.shape_cast %83 : vector<1x1x12xf32> to vector<1x12xf32>
    %85 = vector.broadcast %84 : vector<1x12xf32> to vector<48x12xf32>
    %86 = arith.addf %81, %85 : vector<48x12xf32>
    %cst_28 = arith.constant 0.000000e+00 : f32
    %87 = vector.broadcast %cst_28 : f32 to vector<48x12xf32>
    %88 = arith.maximumf %86, %87 : vector<48x12xf32>
    %89 = arith.index_cast %c0_i32 : i32 to index
    %c0_29 = arith.constant 0 : index
    %c0_30 = arith.constant 0 : index
    %90 = vector.load %arg10[%89, %c0_29, %c0_30] : memref<3x12x20xbf16, #tpu.memory_space<vmem>>, vector<1x12x20xbf16>
    %91 = vector.shape_cast %90 : vector<1x12x20xbf16> to vector<12x20xbf16>
    %92 = arith.truncf %88 : vector<48x12xf32> to vector<48x12xbf16>
    %cst_31 = arith.constant dense<0.000000e+00> : vector<48x20xf32>
    %93 = tpu.matmul %92, %91, %cst_31 {dimension_numbers = #tpu.dot_dimension_numbers<[1], [0], [0], [1], [0, 0, 1, 1], [], []>} : vector<48x12xbf16>, vector<12x20xbf16>, vector<48x20xf32> -> vector<48x20xf32>
    %94 = vector.extract_strided_slice %5 {offsets = [1, 0], sizes = [1, 20], strides = [1, 1]} : vector<6x20xf32> to vector<1x20xf32>
    %95 = vector.broadcast %94 : vector<1x20xf32> to vector<48x20xf32>
    %96 = arith.addf %93, %95 : vector<48x20xf32>
    %97 = arith.addf %76, %96 : vector<48x20xf32>
    %98 = vector.extract_strided_slice %5 {offsets = [4, 0], sizes = [1, 20], strides = [1, 1]} : vector<6x20xf32> to vector<1x20xf32>
    %99 = vector.extract_strided_slice %5 {offsets = [5, 0], sizes = [1, 20], strides = [1, 1]} : vector<6x20xf32> to vector<1x20xf32>
    %cst_32 = arith.constant dense<0.000000e+00> : vector<48xf32>
    %100 = vector.multi_reduction <add>, %97, %cst_32 [1] : vector<48x20xf32> to vector<48xf32>
    %101 = vector.shape_cast %100 : vector<48xf32> to vector<48x1xf32>
    %cst_33 = arith.constant 2.000000e+01 : f32
    %102 = vector.broadcast %cst_33 : f32 to vector<48x1xf32>
    %103 = arith.divf %101, %102 : vector<48x1xf32>
    %104 = vector.broadcast %103 : vector<48x1xf32> to vector<48x20xf32>
    %105 = arith.subf %97, %104 : vector<48x20xf32>
    %106 = arith.mulf %105, %105 : vector<48x20xf32>
    %cst_34 = arith.constant dense<0.000000e+00> : vector<48xf32>
    %107 = vector.multi_reduction <add>, %106, %cst_34 [1] : vector<48x20xf32> to vector<48xf32>
    %108 = vector.shape_cast %107 : vector<48xf32> to vector<48x1xf32>
    %cst_35 = arith.constant 2.000000e+01 : f32
    %109 = vector.broadcast %cst_35 : f32 to vector<48x1xf32>
    %110 = arith.divf %108, %109 : vector<48x1xf32>
    %cst_36 = arith.constant 9.99999974E-6 : f32
    %111 = vector.broadcast %cst_36 : f32 to vector<48x1xf32>
    %112 = arith.addf %110, %111 : vector<48x1xf32>
    %113 = math.rsqrt %112 : vector<48x1xf32>
    %114 = vector.broadcast %113 : vector<48x1xf32> to vector<48x20xf32>
    %115 = arith.mulf %105, %114 : vector<48x20xf32>
    %116 = vector.broadcast %98 : vector<1x20xf32> to vector<48x20xf32>
    %117 = arith.mulf %115, %116 : vector<48x20xf32>
    %118 = vector.broadcast %99 : vector<1x20xf32> to vector<48x20xf32>
    %119 = arith.addf %117, %118 : vector<48x20xf32>
    %c1_i32 = arith.constant 1 : i32
    %120 = arith.index_cast %c1_i32 : i32 to index
    %c0_37 = arith.constant 0 : index
    %c0_38 = arith.constant 0 : index
    %121 = vector.load %arg11[%120, %c0_37, %c0_38] : memref<3x6x20xf32, #tpu.memory_space<vmem>>, vector<1x6x20xf32>
    %122 = vector.shape_cast %121 : vector<1x6x20xf32> to vector<6x20xf32>
    %123 = arith.index_cast %c1_i32 : i32 to index
    %c0_39 = arith.constant 0 : index
    %c0_40 = arith.constant 0 : index
    %124 = vector.load %arg5[%123, %c0_39, %c0_40] : memref<3x20x60xbf16, #tpu.memory_space<vmem>>, vector<1x20x60xbf16>
    %125 = vector.shape_cast %124 : vector<1x20x60xbf16> to vector<20x60xbf16>
    %126 = arith.truncf %119 : vector<48x20xf32> to vector<48x20xbf16>
    %cst_41 = arith.constant dense<0.000000e+00> : vector<48x60xf32>
    %127 = tpu.matmul %126, %125, %cst_41 {dimension_numbers = #tpu.dot_dimension_numbers<[1], [0], [0], [1], [0, 0, 1, 1], [], []>} : vector<48x20xbf16>, vector<20x60xbf16>, vector<48x60xf32> -> vector<48x60xf32>
    %128 = arith.index_cast %c1_i32 : i32 to index
    %c0_42 = arith.constant 0 : index
    %c0_43 = arith.constant 0 : index
    %129 = vector.load %arg6[%128, %c0_42, %c0_43] : memref<3x1x60xf32, #tpu.memory_space<vmem>>, vector<1x1x60xf32>
    %130 = vector.shape_cast %129 : vector<1x1x60xf32> to vector<1x60xf32>
    %131 = vector.broadcast %130 : vector<1x60xf32> to vector<48x60xf32>
    %132 = arith.addf %127, %131 : vector<48x60xf32>
    %133 = vector.extract_strided_slice %132 {offsets = [0, 0], sizes = [48, 20], strides = [1, 1]} : vector<48x60xf32> to vector<48x20xf32>
    %134 = vector.extract_strided_slice %132 {offsets = [0, 20], sizes = [48, 20], strides = [1, 1]} : vector<48x60xf32> to vector<48x20xf32>
    %135 = vector.extract_strided_slice %132 {offsets = [0, 40], sizes = [48, 20], strides = [1, 1]} : vector<48x60xf32> to vector<48x20xf32>
    %136 = tpu.concatenate %133, %133, %133, %133 in 0 : vector<48x20xf32>, vector<48x20xf32>, vector<48x20xf32>, vector<48x20xf32> -> vector<192x20xf32>
    %137 = arith.mulf %136, %1 : vector<192x20xf32>
    %138 = arith.truncf %137 : vector<192x20xf32> to vector<192x20xbf16>
    %139 = arith.truncf %134 : vector<48x20xf32> to vector<48x20xbf16>
    %cst_44 = arith.constant dense<0.000000e+00> : vector<192x48xf32>
    %140 = tpu.matmul %138, %139, %cst_44 {dimension_numbers = #tpu.dot_dimension_numbers<[1], [1], [0], [0], [0, 0, 1, 0], [], []>} : vector<192x20xbf16>, vector<48x20xbf16>, vector<192x48xf32> -> vector<192x48xf32>
    %141 = arith.addf %140, %0 : vector<192x48xf32>
    %cst_45 = arith.constant dense<0xFF800000> : vector<192xf32>
    %142 = vector.multi_reduction <maximumf>, %141, %cst_45 [1] : vector<192x48xf32> to vector<192xf32>
    %143 = vector.shape_cast %142 : vector<192xf32> to vector<192x1xf32>
    %144 = vector.broadcast %143 : vector<192x1xf32> to vector<192x48xf32>
    %145 = arith.subf %141, %144 : vector<192x48xf32>
    %146 = math.exp %145 : vector<192x48xf32>
    %cst_46 = arith.constant dense<0.000000e+00> : vector<192xf32>
    %147 = vector.multi_reduction <add>, %146, %cst_46 [1] : vector<192x48xf32> to vector<192xf32>
    %148 = vector.shape_cast %147 : vector<192xf32> to vector<192x1xf32>
    %149 = tpu.reciprocal %148 {approx = true} : vector<192x1xf32> -> vector<192x1xf32>
    %150 = vector.broadcast %149 : vector<192x1xf32> to vector<192x48xf32>
    %151 = arith.mulf %146, %150 : vector<192x48xf32>
    %152 = arith.truncf %151 : vector<192x48xf32> to vector<192x48xbf16>
    %153 = arith.truncf %135 : vector<48x20xf32> to vector<48x20xbf16>
    %cst_47 = arith.constant dense<0.000000e+00> : vector<192x20xf32>
    %154 = tpu.matmul %152, %153, %cst_47 {dimension_numbers = #tpu.dot_dimension_numbers<[1], [0], [0], [1], [0, 0, 1, 1], [], []>} : vector<192x48xbf16>, vector<48x20xbf16>, vector<192x20xf32> -> vector<192x20xf32>
    %155 = arith.mulf %154, %1 : vector<192x20xf32>
    %156 = vector.extract_strided_slice %155 {offsets = [0, 0], sizes = [48, 20], strides = [1, 1]} : vector<192x20xf32> to vector<48x20xf32>
    %157 = vector.extract_strided_slice %155 {offsets = [48, 0], sizes = [48, 20], strides = [1, 1]} : vector<192x20xf32> to vector<48x20xf32>
    %158 = arith.addf %156, %157 : vector<48x20xf32>
    %159 = vector.extract_strided_slice %155 {offsets = [96, 0], sizes = [48, 20], strides = [1, 1]} : vector<192x20xf32> to vector<48x20xf32>
    %160 = arith.addf %158, %159 : vector<48x20xf32>
    %161 = vector.extract_strided_slice %155 {offsets = [144, 0], sizes = [48, 20], strides = [1, 1]} : vector<192x20xf32> to vector<48x20xf32>
    %162 = arith.addf %160, %161 : vector<48x20xf32>
    %163 = arith.index_cast %c1_i32 : i32 to index
    %c0_48 = arith.constant 0 : index
    %c0_49 = arith.constant 0 : index
    %164 = vector.load %arg7[%163, %c0_48, %c0_49] : memref<3x20x20xbf16, #tpu.memory_space<vmem>>, vector<1x20x20xbf16>
    %165 = vector.shape_cast %164 : vector<1x20x20xbf16> to vector<20x20xbf16>
    %166 = arith.truncf %162 : vector<48x20xf32> to vector<48x20xbf16>
    %cst_50 = arith.constant dense<0.000000e+00> : vector<48x20xf32>
    %167 = tpu.matmul %166, %165, %cst_50 {dimension_numbers = #tpu.dot_dimension_numbers<[1], [0], [0], [1], [0, 0, 1, 1], [], []>} : vector<48x20xbf16>, vector<20x20xbf16>, vector<48x20xf32> -> vector<48x20xf32>
    %168 = vector.extract_strided_slice %122 {offsets = [0, 0], sizes = [1, 20], strides = [1, 1]} : vector<6x20xf32> to vector<1x20xf32>
    %169 = vector.broadcast %168 : vector<1x20xf32> to vector<48x20xf32>
    %170 = arith.addf %167, %169 : vector<48x20xf32>
    %171 = arith.addf %119, %170 : vector<48x20xf32>
    %172 = vector.extract_strided_slice %122 {offsets = [2, 0], sizes = [1, 20], strides = [1, 1]} : vector<6x20xf32> to vector<1x20xf32>
    %173 = vector.extract_strided_slice %122 {offsets = [3, 0], sizes = [1, 20], strides = [1, 1]} : vector<6x20xf32> to vector<1x20xf32>
    %cst_51 = arith.constant dense<0.000000e+00> : vector<48xf32>
    %174 = vector.multi_reduction <add>, %171, %cst_51 [1] : vector<48x20xf32> to vector<48xf32>
    %175 = vector.shape_cast %174 : vector<48xf32> to vector<48x1xf32>
    %cst_52 = arith.constant 2.000000e+01 : f32
    %176 = vector.broadcast %cst_52 : f32 to vector<48x1xf32>
    %177 = arith.divf %175, %176 : vector<48x1xf32>
    %178 = vector.broadcast %177 : vector<48x1xf32> to vector<48x20xf32>
    %179 = arith.subf %171, %178 : vector<48x20xf32>
    %180 = arith.mulf %179, %179 : vector<48x20xf32>
    %cst_53 = arith.constant dense<0.000000e+00> : vector<48xf32>
    %181 = vector.multi_reduction <add>, %180, %cst_53 [1] : vector<48x20xf32> to vector<48xf32>
    %182 = vector.shape_cast %181 : vector<48xf32> to vector<48x1xf32>
    %cst_54 = arith.constant 2.000000e+01 : f32
    %183 = vector.broadcast %cst_54 : f32 to vector<48x1xf32>
    %184 = arith.divf %182, %183 : vector<48x1xf32>
    %cst_55 = arith.constant 9.99999974E-6 : f32
    %185 = vector.broadcast %cst_55 : f32 to vector<48x1xf32>
    %186 = arith.addf %184, %185 : vector<48x1xf32>
    %187 = math.rsqrt %186 : vector<48x1xf32>
    %188 = vector.broadcast %187 : vector<48x1xf32> to vector<48x20xf32>
    %189 = arith.mulf %179, %188 : vector<48x20xf32>
    %190 = vector.broadcast %172 : vector<1x20xf32> to vector<48x20xf32>
    %191 = arith.mulf %189, %190 : vector<48x20xf32>
    %192 = vector.broadcast %173 : vector<1x20xf32> to vector<48x20xf32>
    %193 = arith.addf %191, %192 : vector<48x20xf32>
    %194 = arith.index_cast %c1_i32 : i32 to index
    %c0_56 = arith.constant 0 : index
    %c0_57 = arith.constant 0 : index
    %195 = vector.load %arg8[%194, %c0_56, %c0_57] : memref<3x20x12xbf16, #tpu.memory_space<vmem>>, vector<1x20x12xbf16>
    %196 = vector.shape_cast %195 : vector<1x20x12xbf16> to vector<20x12xbf16>
    %197 = arith.truncf %193 : vector<48x20xf32> to vector<48x20xbf16>
    %cst_58 = arith.constant dense<0.000000e+00> : vector<48x12xf32>
    %198 = tpu.matmul %197, %196, %cst_58 {dimension_numbers = #tpu.dot_dimension_numbers<[1], [0], [0], [1], [0, 0, 1, 1], [], []>} : vector<48x20xbf16>, vector<20x12xbf16>, vector<48x12xf32> -> vector<48x12xf32>
    %199 = arith.index_cast %c1_i32 : i32 to index
    %c0_59 = arith.constant 0 : index
    %c0_60 = arith.constant 0 : index
    %200 = vector.load %arg9[%199, %c0_59, %c0_60] : memref<3x1x12xf32, #tpu.memory_space<vmem>>, vector<1x1x12xf32>
    %201 = vector.shape_cast %200 : vector<1x1x12xf32> to vector<1x12xf32>
    %202 = vector.broadcast %201 : vector<1x12xf32> to vector<48x12xf32>
    %203 = arith.addf %198, %202 : vector<48x12xf32>
    %cst_61 = arith.constant 0.000000e+00 : f32
    %204 = vector.broadcast %cst_61 : f32 to vector<48x12xf32>
    %205 = arith.maximumf %203, %204 : vector<48x12xf32>
    %206 = arith.index_cast %c1_i32 : i32 to index
    %c0_62 = arith.constant 0 : index
    %c0_63 = arith.constant 0 : index
    %207 = vector.load %arg10[%206, %c0_62, %c0_63] : memref<3x12x20xbf16, #tpu.memory_space<vmem>>, vector<1x12x20xbf16>
    %208 = vector.shape_cast %207 : vector<1x12x20xbf16> to vector<12x20xbf16>
    %209 = arith.truncf %205 : vector<48x12xf32> to vector<48x12xbf16>
    %cst_64 = arith.constant dense<0.000000e+00> : vector<48x20xf32>
    %210 = tpu.matmul %209, %208, %cst_64 {dimension_numbers = #tpu.dot_dimension_numbers<[1], [0], [0], [1], [0, 0, 1, 1], [], []>} : vector<48x12xbf16>, vector<12x20xbf16>, vector<48x20xf32> -> vector<48x20xf32>
    %211 = vector.extract_strided_slice %122 {offsets = [1, 0], sizes = [1, 20], strides = [1, 1]} : vector<6x20xf32> to vector<1x20xf32>
    %212 = vector.broadcast %211 : vector<1x20xf32> to vector<48x20xf32>
    %213 = arith.addf %210, %212 : vector<48x20xf32>
    %214 = arith.addf %193, %213 : vector<48x20xf32>
    %215 = vector.extract_strided_slice %122 {offsets = [4, 0], sizes = [1, 20], strides = [1, 1]} : vector<6x20xf32> to vector<1x20xf32>
    %216 = vector.extract_strided_slice %122 {offsets = [5, 0], sizes = [1, 20], strides = [1, 1]} : vector<6x20xf32> to vector<1x20xf32>
    %cst_65 = arith.constant dense<0.000000e+00> : vector<48xf32>
    %217 = vector.multi_reduction <add>, %214, %cst_65 [1] : vector<48x20xf32> to vector<48xf32>
    %218 = vector.shape_cast %217 : vector<48xf32> to vector<48x1xf32>
    %cst_66 = arith.constant 2.000000e+01 : f32
    %219 = vector.broadcast %cst_66 : f32 to vector<48x1xf32>
    %220 = arith.divf %218, %219 : vector<48x1xf32>
    %221 = vector.broadcast %220 : vector<48x1xf32> to vector<48x20xf32>
    %222 = arith.subf %214, %221 : vector<48x20xf32>
    %223 = arith.mulf %222, %222 : vector<48x20xf32>
    %cst_67 = arith.constant dense<0.000000e+00> : vector<48xf32>
    %224 = vector.multi_reduction <add>, %223, %cst_67 [1] : vector<48x20xf32> to vector<48xf32>
    %225 = vector.shape_cast %224 : vector<48xf32> to vector<48x1xf32>
    %cst_68 = arith.constant 2.000000e+01 : f32
    %226 = vector.broadcast %cst_68 : f32 to vector<48x1xf32>
    %227 = arith.divf %225, %226 : vector<48x1xf32>
    %cst_69 = arith.constant 9.99999974E-6 : f32
    %228 = vector.broadcast %cst_69 : f32 to vector<48x1xf32>
    %229 = arith.addf %227, %228 : vector<48x1xf32>
    %230 = math.rsqrt %229 : vector<48x1xf32>
    %231 = vector.broadcast %230 : vector<48x1xf32> to vector<48x20xf32>
    %232 = arith.mulf %222, %231 : vector<48x20xf32>
    %233 = vector.broadcast %215 : vector<1x20xf32> to vector<48x20xf32>
    %234 = arith.mulf %232, %233 : vector<48x20xf32>
    %235 = vector.broadcast %216 : vector<1x20xf32> to vector<48x20xf32>
    %236 = arith.addf %234, %235 : vector<48x20xf32>
    %c2_i32 = arith.constant 2 : i32
    %237 = arith.index_cast %c2_i32 : i32 to index
    %c0_70 = arith.constant 0 : index
    %c0_71 = arith.constant 0 : index
    %238 = vector.load %arg11[%237, %c0_70, %c0_71] : memref<3x6x20xf32, #tpu.memory_space<vmem>>, vector<1x6x20xf32>
    %239 = vector.shape_cast %238 : vector<1x6x20xf32> to vector<6x20xf32>
    %240 = arith.index_cast %c2_i32 : i32 to index
    %c0_72 = arith.constant 0 : index
    %c0_73 = arith.constant 0 : index
    %241 = vector.load %arg5[%240, %c0_72, %c0_73] : memref<3x20x60xbf16, #tpu.memory_space<vmem>>, vector<1x20x60xbf16>
    %242 = vector.shape_cast %241 : vector<1x20x60xbf16> to vector<20x60xbf16>
    %243 = arith.truncf %236 : vector<48x20xf32> to vector<48x20xbf16>
    %cst_74 = arith.constant dense<0.000000e+00> : vector<48x60xf32>
    %244 = tpu.matmul %243, %242, %cst_74 {dimension_numbers = #tpu.dot_dimension_numbers<[1], [0], [0], [1], [0, 0, 1, 1], [], []>} : vector<48x20xbf16>, vector<20x60xbf16>, vector<48x60xf32> -> vector<48x60xf32>
    %245 = arith.index_cast %c2_i32 : i32 to index
    %c0_75 = arith.constant 0 : index
    %c0_76 = arith.constant 0 : index
    %246 = vector.load %arg6[%245, %c0_75, %c0_76] : memref<3x1x60xf32, #tpu.memory_space<vmem>>, vector<1x1x60xf32>
    %247 = vector.shape_cast %246 : vector<1x1x60xf32> to vector<1x60xf32>
    %248 = vector.broadcast %247 : vector<1x60xf32> to vector<48x60xf32>
    %249 = arith.addf %244, %248 : vector<48x60xf32>
    %250 = vector.extract_strided_slice %249 {offsets = [0, 0], sizes = [48, 20], strides = [1, 1]} : vector<48x60xf32> to vector<48x20xf32>
    %251 = vector.extract_strided_slice %249 {offsets = [0, 20], sizes = [48, 20], strides = [1, 1]} : vector<48x60xf32> to vector<48x20xf32>
    %252 = vector.extract_strided_slice %249 {offsets = [0, 40], sizes = [48, 20], strides = [1, 1]} : vector<48x60xf32> to vector<48x20xf32>
    %253 = tpu.concatenate %250, %250, %250, %250 in 0 : vector<48x20xf32>, vector<48x20xf32>, vector<48x20xf32>, vector<48x20xf32> -> vector<192x20xf32>
    %254 = arith.mulf %253, %1 : vector<192x20xf32>
    %255 = arith.truncf %254 : vector<192x20xf32> to vector<192x20xbf16>
    %256 = arith.truncf %251 : vector<48x20xf32> to vector<48x20xbf16>
    %cst_77 = arith.constant dense<0.000000e+00> : vector<192x48xf32>
    %257 = tpu.matmul %255, %256, %cst_77 {dimension_numbers = #tpu.dot_dimension_numbers<[1], [1], [0], [0], [0, 0, 1, 0], [], []>} : vector<192x20xbf16>, vector<48x20xbf16>, vector<192x48xf32> -> vector<192x48xf32>
    %258 = arith.addf %257, %0 : vector<192x48xf32>
    %cst_78 = arith.constant dense<0xFF800000> : vector<192xf32>
    %259 = vector.multi_reduction <maximumf>, %258, %cst_78 [1] : vector<192x48xf32> to vector<192xf32>
    %260 = vector.shape_cast %259 : vector<192xf32> to vector<192x1xf32>
    %261 = vector.broadcast %260 : vector<192x1xf32> to vector<192x48xf32>
    %262 = arith.subf %258, %261 : vector<192x48xf32>
    %263 = math.exp %262 : vector<192x48xf32>
    %cst_79 = arith.constant dense<0.000000e+00> : vector<192xf32>
    %264 = vector.multi_reduction <add>, %263, %cst_79 [1] : vector<192x48xf32> to vector<192xf32>
    %265 = vector.shape_cast %264 : vector<192xf32> to vector<192x1xf32>
    %266 = tpu.reciprocal %265 {approx = true} : vector<192x1xf32> -> vector<192x1xf32>
    %267 = vector.broadcast %266 : vector<192x1xf32> to vector<192x48xf32>
    %268 = arith.mulf %263, %267 : vector<192x48xf32>
    %269 = arith.truncf %268 : vector<192x48xf32> to vector<192x48xbf16>
    %270 = arith.truncf %252 : vector<48x20xf32> to vector<48x20xbf16>
    %cst_80 = arith.constant dense<0.000000e+00> : vector<192x20xf32>
    %271 = tpu.matmul %269, %270, %cst_80 {dimension_numbers = #tpu.dot_dimension_numbers<[1], [0], [0], [1], [0, 0, 1, 1], [], []>} : vector<192x48xbf16>, vector<48x20xbf16>, vector<192x20xf32> -> vector<192x20xf32>
    %272 = arith.mulf %271, %1 : vector<192x20xf32>
    %273 = vector.extract_strided_slice %272 {offsets = [0, 0], sizes = [48, 20], strides = [1, 1]} : vector<192x20xf32> to vector<48x20xf32>
    %274 = vector.extract_strided_slice %272 {offsets = [48, 0], sizes = [48, 20], strides = [1, 1]} : vector<192x20xf32> to vector<48x20xf32>
    %275 = arith.addf %273, %274 : vector<48x20xf32>
    %276 = vector.extract_strided_slice %272 {offsets = [96, 0], sizes = [48, 20], strides = [1, 1]} : vector<192x20xf32> to vector<48x20xf32>
    %277 = arith.addf %275, %276 : vector<48x20xf32>
    %278 = vector.extract_strided_slice %272 {offsets = [144, 0], sizes = [48, 20], strides = [1, 1]} : vector<192x20xf32> to vector<48x20xf32>
    %279 = arith.addf %277, %278 : vector<48x20xf32>
    %280 = arith.index_cast %c2_i32 : i32 to index
    %c0_81 = arith.constant 0 : index
    %c0_82 = arith.constant 0 : index
    %281 = vector.load %arg7[%280, %c0_81, %c0_82] : memref<3x20x20xbf16, #tpu.memory_space<vmem>>, vector<1x20x20xbf16>
    %282 = vector.shape_cast %281 : vector<1x20x20xbf16> to vector<20x20xbf16>
    %283 = arith.truncf %279 : vector<48x20xf32> to vector<48x20xbf16>
    %cst_83 = arith.constant dense<0.000000e+00> : vector<48x20xf32>
    %284 = tpu.matmul %283, %282, %cst_83 {dimension_numbers = #tpu.dot_dimension_numbers<[1], [0], [0], [1], [0, 0, 1, 1], [], []>} : vector<48x20xbf16>, vector<20x20xbf16>, vector<48x20xf32> -> vector<48x20xf32>
    %285 = vector.extract_strided_slice %239 {offsets = [0, 0], sizes = [1, 20], strides = [1, 1]} : vector<6x20xf32> to vector<1x20xf32>
    %286 = vector.broadcast %285 : vector<1x20xf32> to vector<48x20xf32>
    %287 = arith.addf %284, %286 : vector<48x20xf32>
    %288 = arith.addf %236, %287 : vector<48x20xf32>
    %289 = vector.extract_strided_slice %239 {offsets = [2, 0], sizes = [1, 20], strides = [1, 1]} : vector<6x20xf32> to vector<1x20xf32>
    %290 = vector.extract_strided_slice %239 {offsets = [3, 0], sizes = [1, 20], strides = [1, 1]} : vector<6x20xf32> to vector<1x20xf32>
    %cst_84 = arith.constant dense<0.000000e+00> : vector<48xf32>
    %291 = vector.multi_reduction <add>, %288, %cst_84 [1] : vector<48x20xf32> to vector<48xf32>
    %292 = vector.shape_cast %291 : vector<48xf32> to vector<48x1xf32>
    %cst_85 = arith.constant 2.000000e+01 : f32
    %293 = vector.broadcast %cst_85 : f32 to vector<48x1xf32>
    %294 = arith.divf %292, %293 : vector<48x1xf32>
    %295 = vector.broadcast %294 : vector<48x1xf32> to vector<48x20xf32>
    %296 = arith.subf %288, %295 : vector<48x20xf32>
    %297 = arith.mulf %296, %296 : vector<48x20xf32>
    %cst_86 = arith.constant dense<0.000000e+00> : vector<48xf32>
    %298 = vector.multi_reduction <add>, %297, %cst_86 [1] : vector<48x20xf32> to vector<48xf32>
    %299 = vector.shape_cast %298 : vector<48xf32> to vector<48x1xf32>
    %cst_87 = arith.constant 2.000000e+01 : f32
    %300 = vector.broadcast %cst_87 : f32 to vector<48x1xf32>
    %301 = arith.divf %299, %300 : vector<48x1xf32>
    %cst_88 = arith.constant 9.99999974E-6 : f32
    %302 = vector.broadcast %cst_88 : f32 to vector<48x1xf32>
    %303 = arith.addf %301, %302 : vector<48x1xf32>
    %304 = math.rsqrt %303 : vector<48x1xf32>
    %305 = vector.broadcast %304 : vector<48x1xf32> to vector<48x20xf32>
    %306 = arith.mulf %296, %305 : vector<48x20xf32>
    %307 = vector.broadcast %289 : vector<1x20xf32> to vector<48x20xf32>
    %308 = arith.mulf %306, %307 : vector<48x20xf32>
    %309 = vector.broadcast %290 : vector<1x20xf32> to vector<48x20xf32>
    %310 = arith.addf %308, %309 : vector<48x20xf32>
    %311 = arith.index_cast %c2_i32 : i32 to index
    %c0_89 = arith.constant 0 : index
    %c0_90 = arith.constant 0 : index
    %312 = vector.load %arg8[%311, %c0_89, %c0_90] : memref<3x20x12xbf16, #tpu.memory_space<vmem>>, vector<1x20x12xbf16>
    %313 = vector.shape_cast %312 : vector<1x20x12xbf16> to vector<20x12xbf16>
    %314 = arith.truncf %310 : vector<48x20xf32> to vector<48x20xbf16>
    %cst_91 = arith.constant dense<0.000000e+00> : vector<48x12xf32>
    %315 = tpu.matmul %314, %313, %cst_91 {dimension_numbers = #tpu.dot_dimension_numbers<[1], [0], [0], [1], [0, 0, 1, 1], [], []>} : vector<48x20xbf16>, vector<20x12xbf16>, vector<48x12xf32> -> vector<48x12xf32>
    %316 = arith.index_cast %c2_i32 : i32 to index
    %c0_92 = arith.constant 0 : index
    %c0_93 = arith.constant 0 : index
    %317 = vector.load %arg9[%316, %c0_92, %c0_93] : memref<3x1x12xf32, #tpu.memory_space<vmem>>, vector<1x1x12xf32>
    %318 = vector.shape_cast %317 : vector<1x1x12xf32> to vector<1x12xf32>
    %319 = vector.broadcast %318 : vector<1x12xf32> to vector<48x12xf32>
    %320 = arith.addf %315, %319 : vector<48x12xf32>
    %cst_94 = arith.constant 0.000000e+00 : f32
    %321 = vector.broadcast %cst_94 : f32 to vector<48x12xf32>
    %322 = arith.maximumf %320, %321 : vector<48x12xf32>
    %323 = arith.index_cast %c2_i32 : i32 to index
    %c0_95 = arith.constant 0 : index
    %c0_96 = arith.constant 0 : index
    %324 = vector.load %arg10[%323, %c0_95, %c0_96] : memref<3x12x20xbf16, #tpu.memory_space<vmem>>, vector<1x12x20xbf16>
    %325 = vector.shape_cast %324 : vector<1x12x20xbf16> to vector<12x20xbf16>
    %326 = arith.truncf %322 : vector<48x12xf32> to vector<48x12xbf16>
    %cst_97 = arith.constant dense<0.000000e+00> : vector<48x20xf32>
    %327 = tpu.matmul %326, %325, %cst_97 {dimension_numbers = #tpu.dot_dimension_numbers<[1], [0], [0], [1], [0, 0, 1, 1], [], []>} : vector<48x12xbf16>, vector<12x20xbf16>, vector<48x20xf32> -> vector<48x20xf32>
    %328 = vector.extract_strided_slice %239 {offsets = [1, 0], sizes = [1, 20], strides = [1, 1]} : vector<6x20xf32> to vector<1x20xf32>
    %329 = vector.broadcast %328 : vector<1x20xf32> to vector<48x20xf32>
    %330 = arith.addf %327, %329 : vector<48x20xf32>
    %331 = arith.addf %310, %330 : vector<48x20xf32>
    %332 = vector.extract_strided_slice %239 {offsets = [4, 0], sizes = [1, 20], strides = [1, 1]} : vector<6x20xf32> to vector<1x20xf32>
    %333 = vector.extract_strided_slice %239 {offsets = [5, 0], sizes = [1, 20], strides = [1, 1]} : vector<6x20xf32> to vector<1x20xf32>
    %cst_98 = arith.constant dense<0.000000e+00> : vector<48xf32>
    %334 = vector.multi_reduction <add>, %331, %cst_98 [1] : vector<48x20xf32> to vector<48xf32>
    %335 = vector.shape_cast %334 : vector<48xf32> to vector<48x1xf32>
    %cst_99 = arith.constant 2.000000e+01 : f32
    %336 = vector.broadcast %cst_99 : f32 to vector<48x1xf32>
    %337 = arith.divf %335, %336 : vector<48x1xf32>
    %338 = vector.broadcast %337 : vector<48x1xf32> to vector<48x20xf32>
    %339 = arith.subf %331, %338 : vector<48x20xf32>
    %340 = arith.mulf %339, %339 : vector<48x20xf32>
    %cst_100 = arith.constant dense<0.000000e+00> : vector<48xf32>
    %341 = vector.multi_reduction <add>, %340, %cst_100 [1] : vector<48x20xf32> to vector<48xf32>
    %342 = vector.shape_cast %341 : vector<48xf32> to vector<48x1xf32>
    %cst_101 = arith.constant 2.000000e+01 : f32
    %343 = vector.broadcast %cst_101 : f32 to vector<48x1xf32>
    %344 = arith.divf %342, %343 : vector<48x1xf32>
    %cst_102 = arith.constant 9.99999974E-6 : f32
    %345 = vector.broadcast %cst_102 : f32 to vector<48x1xf32>
    %346 = arith.addf %344, %345 : vector<48x1xf32>
    %347 = math.rsqrt %346 : vector<48x1xf32>
    %348 = vector.broadcast %347 : vector<48x1xf32> to vector<48x20xf32>
    %349 = arith.mulf %339, %348 : vector<48x20xf32>
    %350 = vector.broadcast %332 : vector<1x20xf32> to vector<48x20xf32>
    %351 = arith.mulf %349, %350 : vector<48x20xf32>
    %352 = vector.broadcast %333 : vector<1x20xf32> to vector<48x20xf32>
    %353 = arith.addf %351, %352 : vector<48x20xf32>
    %c3_i32 = arith.constant 3 : i32
    %c0_103 = arith.constant 0 : index
    %c0_104 = arith.constant 0 : index
    %354 = vector.load %arg12[%c0_103, %c0_104] : memref<20x32xbf16, #tpu.memory_space<vmem>>, vector<20x32xbf16>
    %355 = arith.truncf %353 : vector<48x20xf32> to vector<48x20xbf16>
    %cst_105 = arith.constant dense<0.000000e+00> : vector<48x32xf32>
    %356 = tpu.matmul %355, %354, %cst_105 {dimension_numbers = #tpu.dot_dimension_numbers<[1], [0], [0], [1], [0, 0, 1, 1], [], []>} : vector<48x20xbf16>, vector<20x32xbf16>, vector<48x32xf32> -> vector<48x32xf32>
    %c0_106 = arith.constant 0 : index
    %c0_107 = arith.constant 0 : index
    %357 = vector.load %arg14[%c0_106, %c0_107] : memref<1x32xf32, #tpu.memory_space<vmem>>, vector<1x32xf32>
    %358 = vector.broadcast %357 : vector<1x32xf32> to vector<48x32xf32>
    %359 = arith.addf %356, %358 : vector<48x32xf32>
    %360 = vector.extract_strided_slice %359 {offsets = [0, 0], sizes = [12, 32], strides = [1, 1]} : vector<48x32xf32> to vector<12x32xf32>
    %c0_108 = arith.constant 0 : index
    %c0_109 = arith.constant 0 : index
    %c0_110 = arith.constant 0 : index
    %361 = vector.load %arg18[%c0_108, %c0_109, %c0_110] : memref<4x12x32xf32, #tpu.memory_space<vmem>>, vector<1x12x32xf32>
    %362 = vector.shape_cast %361 : vector<1x12x32xf32> to vector<12x32xf32>
    %363 = vector.shape_cast %360 : vector<12x32xf32> to vector<1x12x32xf32>
    tpu.vector_store %arg18[%c0_108, %c0_109, %c0_110], %363 {strides = array<i32>} : memref<4x12x32xf32, #tpu.memory_space<vmem>>, vector<1x12x32xf32>,
    %364 = vector.extract_strided_slice %359 {offsets = [12, 0], sizes = [12, 32], strides = [1, 1]} : vector<48x32xf32> to vector<12x32xf32>
    %c1 = arith.constant 1 : index
    %c0_111 = arith.constant 0 : index
    %c0_112 = arith.constant 0 : index
    %365 = vector.load %arg18[%c1, %c0_111, %c0_112] : memref<4x12x32xf32, #tpu.memory_space<vmem>>, vector<1x12x32xf32>
    %366 = vector.shape_cast %365 : vector<1x12x32xf32> to vector<12x32xf32>
    %367 = vector.shape_cast %364 : vector<12x32xf32> to vector<1x12x32xf32>
    tpu.vector_store %arg18[%c1, %c0_111, %c0_112], %367 {strides = array<i32>} : memref<4x12x32xf32, #tpu.memory_space<vmem>>, vector<1x12x32xf32>,
    %368 = vector.extract_strided_slice %359 {offsets = [24, 0], sizes = [12, 32], strides = [1, 1]} : vector<48x32xf32> to vector<12x32xf32>
    %c2 = arith.constant 2 : index
    %c0_113 = arith.constant 0 : index
    %c0_114 = arith.constant 0 : index
    %369 = vector.load %arg18[%c2, %c0_113, %c0_114] : memref<4x12x32xf32, #tpu.memory_space<vmem>>, vector<1x12x32xf32>
    %370 = vector.shape_cast %369 : vector<1x12x32xf32> to vector<12x32xf32>
    %371 = vector.shape_cast %368 : vector<12x32xf32> to vector<1x12x32xf32>
    tpu.vector_store %arg18[%c2, %c0_113, %c0_114], %371 {strides = array<i32>} : memref<4x12x32xf32, #tpu.memory_space<vmem>>, vector<1x12x32xf32>,
    %372 = vector.extract_strided_slice %359 {offsets = [36, 0], sizes = [12, 32], strides = [1, 1]} : vector<48x32xf32> to vector<12x32xf32>
    %c3 = arith.constant 3 : index
    %c0_115 = arith.constant 0 : index
    %c0_116 = arith.constant 0 : index
    %373 = vector.load %arg18[%c3, %c0_115, %c0_116] : memref<4x12x32xf32, #tpu.memory_space<vmem>>, vector<1x12x32xf32>
    %374 = vector.shape_cast %373 : vector<1x12x32xf32> to vector<12x32xf32>
    %375 = vector.shape_cast %372 : vector<12x32xf32> to vector<1x12x32xf32>
    tpu.vector_store %arg18[%c3, %c0_115, %c0_116], %375 {strides = array<i32>} : memref<4x12x32xf32, #tpu.memory_space<vmem>>, vector<1x12x32xf32>,
    %cst_117 = arith.constant 0.000000e+00 : f32
    %376 = vector.broadcast %cst_117 : f32 to vector<12x8xf32>
    %cst_118 = arith.constant 0.000000e+00 : f32
    %377 = vector.broadcast %cst_118 : f32 to vector<12x8xf32>
    %c0_i32_119 = arith.constant 0 : i32
    %378 = arith.index_cast %c0_i32_119 : i32 to index
    %c0_120 = arith.constant 0 : index
    %c0_121 = arith.constant 0 : index
    %379 = vector.load %arg18[%378, %c0_120, %c0_121] : memref<4x12x32xf32, #tpu.memory_space<vmem>>, vector<1x12x32xf32>
    %380 = vector.shape_cast %379 : vector<1x12x32xf32> to vector<12x32xf32>
    %c0_122 = arith.constant 0 : index
    %c0_123 = arith.constant 0 : index
    %381 = vector.load %arg13[%c0_122, %c0_123] : memref<8x32xbf16, #tpu.memory_space<vmem>>, vector<8x32xbf16>
    %382 = arith.truncf %376 : vector<12x8xf32> to vector<12x8xbf16>
    %cst_124 = arith.constant dense<0.000000e+00> : vector<12x32xf32>
    %383 = tpu.matmul %382, %381, %cst_124 {dimension_numbers = #tpu.dot_dimension_numbers<[1], [0], [0], [1], [0, 0, 1, 1], [], []>} : vector<12x8xbf16>, vector<8x32xbf16>, vector<12x32xf32> -> vector<12x32xf32>
    %384 = arith.addf %380, %383 : vector<12x32xf32>
    %385 = vector.extract_strided_slice %384 {offsets = [0, 0], sizes = [12, 8], strides = [1, 1]} : vector<12x32xf32> to vector<12x8xf32>
    %386 = arith.negf %385 : vector<12x8xf32>
    %387 = math.exp %386 : vector<12x8xf32>
    %cst_125 = arith.constant 1.000000e+00 : f32
    %388 = vector.broadcast %cst_125 : f32 to vector<12x8xf32>
    %389 = arith.addf %388, %387 : vector<12x8xf32>
    %390 = arith.divf %388, %389 : vector<12x8xf32>
    %391 = vector.extract_strided_slice %384 {offsets = [0, 8], sizes = [12, 8], strides = [1, 1]} : vector<12x32xf32> to vector<12x8xf32>
    %392 = arith.negf %391 : vector<12x8xf32>
    %393 = math.exp %392 : vector<12x8xf32>
    %cst_126 = arith.constant 1.000000e+00 : f32
    %394 = vector.broadcast %cst_126 : f32 to vector<12x8xf32>
    %395 = arith.addf %394, %393 : vector<12x8xf32>
    %396 = arith.divf %394, %395 : vector<12x8xf32>
    %397 = vector.extract_strided_slice %384 {offsets = [0, 16], sizes = [12, 8], strides = [1, 1]} : vector<12x32xf32> to vector<12x8xf32>
    %398 = math.tanh %397 : vector<12x8xf32>
    %399 = vector.extract_strided_slice %384 {offsets = [0, 24], sizes = [12, 8], strides = [1, 1]} : vector<12x32xf32> to vector<12x8xf32>
    %400 = arith.negf %399 : vector<12x8xf32>
    %401 = math.exp %400 : vector<12x8xf32>
    %cst_127 = arith.constant 1.000000e+00 : f32
    %402 = vector.broadcast %cst_127 : f32 to vector<12x8xf32>
    %403 = arith.addf %402, %401 : vector<12x8xf32>
    %404 = arith.divf %402, %403 : vector<12x8xf32>
    %405 = arith.mulf %396, %377 : vector<12x8xf32>
    %406 = arith.mulf %390, %398 : vector<12x8xf32>
    %407 = arith.addf %405, %406 : vector<12x8xf32>
    %408 = math.tanh %407 : vector<12x8xf32>
    %409 = arith.mulf %404, %408 : vector<12x8xf32>
    %c1_i32_128 = arith.constant 1 : i32
    %410 = arith.index_cast %c1_i32_128 : i32 to index
    %c0_129 = arith.constant 0 : index
    %c0_130 = arith.constant 0 : index
    %411 = vector.load %arg18[%410, %c0_129, %c0_130] : memref<4x12x32xf32, #tpu.memory_space<vmem>>, vector<1x12x32xf32>
    %412 = vector.shape_cast %411 : vector<1x12x32xf32> to vector<12x32xf32>
    %c0_131 = arith.constant 0 : index
    %c0_132 = arith.constant 0 : index
    %413 = vector.load %arg13[%c0_131, %c0_132] : memref<8x32xbf16, #tpu.memory_space<vmem>>, vector<8x32xbf16>
    %414 = arith.truncf %409 : vector<12x8xf32> to vector<12x8xbf16>
    %cst_133 = arith.constant dense<0.000000e+00> : vector<12x32xf32>
    %415 = tpu.matmul %414, %413, %cst_133 {dimension_numbers = #tpu.dot_dimension_numbers<[1], [0], [0], [1], [0, 0, 1, 1], [], []>} : vector<12x8xbf16>, vector<8x32xbf16>, vector<12x32xf32> -> vector<12x32xf32>
    %416 = arith.addf %412, %415 : vector<12x32xf32>
    %417 = vector.extract_strided_slice %416 {offsets = [0, 0], sizes = [12, 8], strides = [1, 1]} : vector<12x32xf32> to vector<12x8xf32>
    %418 = arith.negf %417 : vector<12x8xf32>
    %419 = math.exp %418 : vector<12x8xf32>
    %cst_134 = arith.constant 1.000000e+00 : f32
    %420 = vector.broadcast %cst_134 : f32 to vector<12x8xf32>
    %421 = arith.addf %420, %419 : vector<12x8xf32>
    %422 = arith.divf %420, %421 : vector<12x8xf32>
    %423 = vector.extract_strided_slice %416 {offsets = [0, 8], sizes = [12, 8], strides = [1, 1]} : vector<12x32xf32> to vector<12x8xf32>
    %424 = arith.negf %423 : vector<12x8xf32>
    %425 = math.exp %424 : vector<12x8xf32>
    %cst_135 = arith.constant 1.000000e+00 : f32
    %426 = vector.broadcast %cst_135 : f32 to vector<12x8xf32>
    %427 = arith.addf %426, %425 : vector<12x8xf32>
    %428 = arith.divf %426, %427 : vector<12x8xf32>
    %429 = vector.extract_strided_slice %416 {offsets = [0, 16], sizes = [12, 8], strides = [1, 1]} : vector<12x32xf32> to vector<12x8xf32>
    %430 = math.tanh %429 : vector<12x8xf32>
    %431 = vector.extract_strided_slice %416 {offsets = [0, 24], sizes = [12, 8], strides = [1, 1]} : vector<12x32xf32> to vector<12x8xf32>
    %432 = arith.negf %431 : vector<12x8xf32>
    %433 = math.exp %432 : vector<12x8xf32>
    %cst_136 = arith.constant 1.000000e+00 : f32
    %434 = vector.broadcast %cst_136 : f32 to vector<12x8xf32>
    %435 = arith.addf %434, %433 : vector<12x8xf32>
    %436 = arith.divf %434, %435 : vector<12x8xf32>
    %437 = arith.mulf %428, %407 : vector<12x8xf32>
    %438 = arith.mulf %422, %430 : vector<12x8xf32>
    %439 = arith.addf %437, %438 : vector<12x8xf32>
    %440 = math.tanh %439 : vector<12x8xf32>
    %441 = arith.mulf %436, %440 : vector<12x8xf32>
    %c2_i32_137 = arith.constant 2 : i32
    %442 = arith.index_cast %c2_i32_137 : i32 to index
    %c0_138 = arith.constant 0 : index
    %c0_139 = arith.constant 0 : index
    %443 = vector.load %arg18[%442, %c0_138, %c0_139] : memref<4x12x32xf32, #tpu.memory_space<vmem>>, vector<1x12x32xf32>
    %444 = vector.shape_cast %443 : vector<1x12x32xf32> to vector<12x32xf32>
    %c0_140 = arith.constant 0 : index
    %c0_141 = arith.constant 0 : index
    %445 = vector.load %arg13[%c0_140, %c0_141] : memref<8x32xbf16, #tpu.memory_space<vmem>>, vector<8x32xbf16>
    %446 = arith.truncf %441 : vector<12x8xf32> to vector<12x8xbf16>
    %cst_142 = arith.constant dense<0.000000e+00> : vector<12x32xf32>
    %447 = tpu.matmul %446, %445, %cst_142 {dimension_numbers = #tpu.dot_dimension_numbers<[1], [0], [0], [1], [0, 0, 1, 1], [], []>} : vector<12x8xbf16>, vector<8x32xbf16>, vector<12x32xf32> -> vector<12x32xf32>
    %448 = arith.addf %444, %447 : vector<12x32xf32>
    %449 = vector.extract_strided_slice %448 {offsets = [0, 0], sizes = [12, 8], strides = [1, 1]} : vector<12x32xf32> to vector<12x8xf32>
    %450 = arith.negf %449 : vector<12x8xf32>
    %451 = math.exp %450 : vector<12x8xf32>
    %cst_143 = arith.constant 1.000000e+00 : f32
    %452 = vector.broadcast %cst_143 : f32 to vector<12x8xf32>
    %453 = arith.addf %452, %451 : vector<12x8xf32>
    %454 = arith.divf %452, %453 : vector<12x8xf32>
    %455 = vector.extract_strided_slice %448 {offsets = [0, 8], sizes = [12, 8], strides = [1, 1]} : vector<12x32xf32> to vector<12x8xf32>
    %456 = arith.negf %455 : vector<12x8xf32>
    %457 = math.exp %456 : vector<12x8xf32>
    %cst_144 = arith.constant 1.000000e+00 : f32
    %458 = vector.broadcast %cst_144 : f32 to vector<12x8xf32>
    %459 = arith.addf %458, %457 : vector<12x8xf32>
    %460 = arith.divf %458, %459 : vector<12x8xf32>
    %461 = vector.extract_strided_slice %448 {offsets = [0, 16], sizes = [12, 8], strides = [1, 1]} : vector<12x32xf32> to vector<12x8xf32>
    %462 = math.tanh %461 : vector<12x8xf32>
    %463 = vector.extract_strided_slice %448 {offsets = [0, 24], sizes = [12, 8], strides = [1, 1]} : vector<12x32xf32> to vector<12x8xf32>
    %464 = arith.negf %463 : vector<12x8xf32>
    %465 = math.exp %464 : vector<12x8xf32>
    %cst_145 = arith.constant 1.000000e+00 : f32
    %466 = vector.broadcast %cst_145 : f32 to vector<12x8xf32>
    %467 = arith.addf %466, %465 : vector<12x8xf32>
    %468 = arith.divf %466, %467 : vector<12x8xf32>
    %469 = arith.mulf %460, %439 : vector<12x8xf32>
    %470 = arith.mulf %454, %462 : vector<12x8xf32>
    %471 = arith.addf %469, %470 : vector<12x8xf32>
    %472 = math.tanh %471 : vector<12x8xf32>
    %473 = arith.mulf %468, %472 : vector<12x8xf32>
    %c3_i32_146 = arith.constant 3 : i32
    %474 = arith.index_cast %c3_i32_146 : i32 to index
    %c0_147 = arith.constant 0 : index
    %c0_148 = arith.constant 0 : index
    %475 = vector.load %arg18[%474, %c0_147, %c0_148] : memref<4x12x32xf32, #tpu.memory_space<vmem>>, vector<1x12x32xf32>
    %476 = vector.shape_cast %475 : vector<1x12x32xf32> to vector<12x32xf32>
    %c0_149 = arith.constant 0 : index
    %c0_150 = arith.constant 0 : index
    %477 = vector.load %arg13[%c0_149, %c0_150] : memref<8x32xbf16, #tpu.memory_space<vmem>>, vector<8x32xbf16>
    %478 = arith.truncf %473 : vector<12x8xf32> to vector<12x8xbf16>
    %cst_151 = arith.constant dense<0.000000e+00> : vector<12x32xf32>
    %479 = tpu.matmul %478, %477, %cst_151 {dimension_numbers = #tpu.dot_dimension_numbers<[1], [0], [0], [1], [0, 0, 1, 1], [], []>} : vector<12x8xbf16>, vector<8x32xbf16>, vector<12x32xf32> -> vector<12x32xf32>
    %480 = arith.addf %476, %479 : vector<12x32xf32>
    %481 = vector.extract_strided_slice %480 {offsets = [0, 0], sizes = [12, 8], strides = [1, 1]} : vector<12x32xf32> to vector<12x8xf32>
    %482 = arith.negf %481 : vector<12x8xf32>
    %483 = math.exp %482 : vector<12x8xf32>
    %cst_152 = arith.constant 1.000000e+00 : f32
    %484 = vector.broadcast %cst_152 : f32 to vector<12x8xf32>
    %485 = arith.addf %484, %483 : vector<12x8xf32>
    %486 = arith.divf %484, %485 : vector<12x8xf32>
    %487 = vector.extract_strided_slice %480 {offsets = [0, 8], sizes = [12, 8], strides = [1, 1]} : vector<12x32xf32> to vector<12x8xf32>
    %488 = arith.negf %487 : vector<12x8xf32>
    %489 = math.exp %488 : vector<12x8xf32>
    %cst_153 = arith.constant 1.000000e+00 : f32
    %490 = vector.broadcast %cst_153 : f32 to vector<12x8xf32>
    %491 = arith.addf %490, %489 : vector<12x8xf32>
    %492 = arith.divf %490, %491 : vector<12x8xf32>
    %493 = vector.extract_strided_slice %480 {offsets = [0, 16], sizes = [12, 8], strides = [1, 1]} : vector<12x32xf32> to vector<12x8xf32>
    %494 = math.tanh %493 : vector<12x8xf32>
    %495 = vector.extract_strided_slice %480 {offsets = [0, 24], sizes = [12, 8], strides = [1, 1]} : vector<12x32xf32> to vector<12x8xf32>
    %496 = arith.negf %495 : vector<12x8xf32>
    %497 = math.exp %496 : vector<12x8xf32>
    %cst_154 = arith.constant 1.000000e+00 : f32
    %498 = vector.broadcast %cst_154 : f32 to vector<12x8xf32>
    %499 = arith.addf %498, %497 : vector<12x8xf32>
    %500 = arith.divf %498, %499 : vector<12x8xf32>
    %501 = arith.mulf %492, %471 : vector<12x8xf32>
    %502 = arith.mulf %486, %494 : vector<12x8xf32>
    %503 = arith.addf %501, %502 : vector<12x8xf32>
    %504 = math.tanh %503 : vector<12x8xf32>
    %505 = arith.mulf %500, %504 : vector<12x8xf32>
    %c4_i32 = arith.constant 4 : i32
    %c0_155 = arith.constant 0 : index
    %c0_156 = arith.constant 0 : index
    %506 = vector.load %arg15[%c0_155, %c0_156] : memref<1x8xf32, #tpu.memory_space<vmem>>, vector<1x8xf32>
    %507 = vector.broadcast %506 : vector<1x8xf32> to vector<12x8xf32>
    %508 = arith.mulf %505, %507 : vector<12x8xf32>
    %cst_157 = arith.constant dense<0.000000e+00> : vector<12xf32>
    %509 = vector.multi_reduction <add>, %508, %cst_157 [1] : vector<12x8xf32> to vector<12xf32>
    %510 = vector.shape_cast %509 : vector<12xf32> to vector<12x1xf32>
    %c0_158 = arith.constant 0 : index
    %c0_159 = arith.constant 0 : index
    %511 = vector.load %arg16[%c0_158, %c0_159] : memref<1x1xf32, #tpu.memory_space<vmem>>, vector<1x1xf32>
    %512 = vector.broadcast %511 : vector<1x1xf32> to vector<12x1xf32>
    %513 = arith.addf %510, %512 : vector<12x1xf32>
    %c0_160 = arith.constant 0 : index
    %c0_161 = arith.constant 0 : index
    %514 = vector.load %arg2[%c0_160, %c0_161] : memref<12x2xf32, #tpu.memory_space<vmem>>, vector<12x2xf32>
    %515 = vector.broadcast %513 : vector<12x1xf32> to vector<12x2xf32>
    %516 = arith.mulf %514, %515 : vector<12x2xf32>
    %cst_162 = arith.constant dense<0.000000e+00> : vector<2xf32>
    %517 = vector.multi_reduction <add>, %516, %cst_162 [0] : vector<12x2xf32> to vector<2xf32>
    %518 = vector.shape_cast %517 : vector<2xf32> to vector<1x2xf32>
    %c0_163 = arith.constant 0 : index
    %c0_164 = arith.constant 0 : index
    %519 = vector.load %arg17[%c0_163, %c0_164] : memref<1x2xf32, #tpu.memory_space<vmem>>, vector<1x2xf32>
    tpu.vector_store %arg17[%c0_163, %c0_164], %518 {strides = array<i32>} : memref<1x2xf32, #tpu.memory_space<vmem>>, vector<1x2xf32>,
    return
  }
  func.func @transform_0(%arg0: i32) -> (i32, i32) {
    %c0_i32 = arith.constant 0 : i32
    %c0_i32_0 = arith.constant 0 : i32
    %c0_i32_1 = arith.constant 0 : i32
    return %c0_i32, %c0_i32_0 : i32, i32
  }
  func.func @transform_1(%arg0: i32) -> (i32, i32) {
    %c0_i32 = arith.constant 0 : i32
    %c0_i32_0 = arith.constant 0 : i32
    %c0_i32_1 = arith.constant 0 : i32
    return %c0_i32, %c0_i32_0 : i32, i32
  }
  func.func @transform_2(%arg0: i32) -> (i32, i32) {
    %c0_i32 = arith.constant 0 : i32
    %c0_i32_0 = arith.constant 0 : i32
    %c0_i32_1 = arith.constant 0 : i32
    return %c0_i32, %c0_i32_0 : i32, i32
  }
  func.func @transform_3(%arg0: i32) -> (i32, i32) {
    %c0_i32 = arith.constant 0 : i32
    %c0_i32_0 = arith.constant 0 : i32
    %c0_i32_1 = arith.constant 0 : i32
    return %c0_i32, %c0_i32_0 : i32, i32
  }
  func.func @transform_4(%arg0: i32) -> (i32, i32, i32) {
    %c0_i32 = arith.constant 0 : i32
    %c0_i32_0 = arith.constant 0 : i32
    %c0_i32_1 = arith.constant 0 : i32
    %c0_i32_2 = arith.constant 0 : i32
    return %c0_i32, %c0_i32_0, %c0_i32_1 : i32, i32, i32
  }
  func.func @transform_5(%arg0: i32) -> (i32, i32, i32) {
    %c0_i32 = arith.constant 0 : i32
    %c0_i32_0 = arith.constant 0 : i32
    %c0_i32_1 = arith.constant 0 : i32
    %c0_i32_2 = arith.constant 0 : i32
    return %c0_i32, %c0_i32_0, %c0_i32_1 : i32, i32, i32
  }
  func.func @transform_6(%arg0: i32) -> (i32, i32, i32) {
    %c0_i32 = arith.constant 0 : i32
    %c0_i32_0 = arith.constant 0 : i32
    %c0_i32_1 = arith.constant 0 : i32
    %c0_i32_2 = arith.constant 0 : i32
    return %c0_i32, %c0_i32_0, %c0_i32_1 : i32, i32, i32
  }
  func.func @transform_7(%arg0: i32) -> (i32, i32, i32) {
    %c0_i32 = arith.constant 0 : i32
    %c0_i32_0 = arith.constant 0 : i32
    %c0_i32_1 = arith.constant 0 : i32
    %c0_i32_2 = arith.constant 0 : i32
    return %c0_i32, %c0_i32_0, %c0_i32_1 : i32, i32, i32
  }
  func.func @transform_8(%arg0: i32) -> (i32, i32, i32) {
    %c0_i32 = arith.constant 0 : i32
    %c0_i32_0 = arith.constant 0 : i32
    %c0_i32_1 = arith.constant 0 : i32
    %c0_i32_2 = arith.constant 0 : i32
    return %c0_i32, %c0_i32_0, %c0_i32_1 : i32, i32, i32
  }
  func.func @transform_9(%arg0: i32) -> (i32, i32, i32) {
    %c0_i32 = arith.constant 0 : i32
    %c0_i32_0 = arith.constant 0 : i32
    %c0_i32_1 = arith.constant 0 : i32
    %c0_i32_2 = arith.constant 0 : i32
    return %c0_i32, %c0_i32_0, %c0_i32_1 : i32, i32, i32
  }
  func.func @transform_10(%arg0: i32) -> (i32, i32, i32) {
    %c0_i32 = arith.constant 0 : i32
    %c0_i32_0 = arith.constant 0 : i32
    %c0_i32_1 = arith.constant 0 : i32
    %c0_i32_2 = arith.constant 0 : i32
    return %c0_i32, %c0_i32_0, %c0_i32_1 : i32, i32, i32
  }
  func.func @transform_11(%arg0: i32) -> (i32, i32) {
    %c0_i32 = arith.constant 0 : i32
    %c0_i32_0 = arith.constant 0 : i32
    %c0_i32_1 = arith.constant 0 : i32
    return %c0_i32, %c0_i32_0 : i32, i32
  }
  func.func @transform_12(%arg0: i32) -> (i32, i32) {
    %c0_i32 = arith.constant 0 : i32
    %c0_i32_0 = arith.constant 0 : i32
    %c0_i32_1 = arith.constant 0 : i32
    return %c0_i32, %c0_i32_0 : i32, i32
  }
  func.func @transform_13(%arg0: i32) -> (i32, i32) {
    %c0_i32 = arith.constant 0 : i32
    %c0_i32_0 = arith.constant 0 : i32
    %c0_i32_1 = arith.constant 0 : i32
    return %c0_i32, %c0_i32_0 : i32, i32
  }
  func.func @transform_14(%arg0: i32) -> (i32, i32) {
    %c0_i32 = arith.constant 0 : i32
    %c0_i32_0 = arith.constant 0 : i32
    %c0_i32_1 = arith.constant 0 : i32
    return %c0_i32, %c0_i32_0 : i32, i32
  }
  func.func @transform_15(%arg0: i32) -> (i32, i32) {
    %c0_i32 = arith.constant 0 : i32
    %c0_i32_0 = arith.constant 0 : i32
    %c0_i32_1 = arith.constant 0 : i32
    return %c0_i32, %c0_i32_0 : i32, i32
  }
  func.func @transform_16(%arg0: i32) -> (i32, i32) {
    %c0_i32 = arith.constant 0 : i32
    %c0_i32_0 = arith.constant 0 : i32
    %c0_i32_1 = arith.constant 0 : i32
    return %c0_i32, %c0_i32_0 : i32, i32
  }
}

</mosaic_0001>

<bundles_post_ra>
// kernel: game_rating_forward.1
= control target key start
LH: loop header
LB: loop body
LE: loop exit
PB: predicated region body
PF: predicated region fallthrough
CT: control target
= control target key end

     0   :  { %v5887_v0 = vmov 0.0   ;;  %vm143_vm0 = vcmask 1041408   ;;  %vm5888_vm1 = vmmov 0   ;;  %vm133_vm2 = vcmask 162816   ;;  %s5889_s28 = smov 108   ;;  %s5894_s18 = smov 16   ;;  %s8378_s4 = inlined_call_operand.vmem [shape: bf16[3,20,60], index: 4, kind: input, shape index: {}]   ;;  %s8379_s0 = inlined_call_operand.vmem [shape: f32[48,20], index: 0, kind: input, shape index: {}]   ;;  %s8380_s5 = inlined_call_operand.vmem [shape: f32[3,1,60], index: 5, kind: input, shape index: {}]   ;;  %s8381_s3 = inlined_call_operand.vmem [shape: f32[192,20], index: 3, kind: input, shape index: {}]   ;;  %s8382_s2 = inlined_call_operand.vmem [shape: f32[192,48], index: 2, kind: input, shape index: {}]   ;;  %s8383_s6 = inlined_call_operand.vmem [shape: bf16[3,20,20], index: 6, kind: input, shape index: {}]   ;;  %s8384_s10 = inlined_call_operand.vmem [shape: f32[3,6,20], index: 10, kind: input, shape index: {}]   ;;  %s8385_s7 = inlined_call_operand.vmem [shape: bf16[3,20,12], index: 7, kind: input, shape index: {}]   ;;  %s8386_s9 = inlined_call_operand.vmem [shape: bf16[3,12,20], index: 9, kind: input, shape index: {}]   ;;  %s8387_s8 = inlined_call_operand.vmem [shape: f32[3,1,12], index: 8, kind: input, shape index: {}]   ;;  %s8388_s11 = inlined_call_operand.vmem [shape: bf16[20,32], index: 11, kind: input, shape index: {}]   ;;  %s8389_s12 = inlined_call_operand.vmem [shape: bf16[8,32], index: 12, kind: input, shape index: {}]   ;;  %s8390_s13 = inlined_call_operand.vmem [shape: f32[1,32], index: 13, kind: input, shape index: {}]   ;;  %s8391_s14 = inlined_call_operand.vmem [shape: f32[1,8], index: 14, kind: input, shape index: {}]   ;;  %s8392_s15 = inlined_call_operand.<no memory space> [shape: f32[1,1], index: 15, kind: input, shape index: {}]   ;;  %s8393_s1 = inlined_call_operand.vmem [shape: f32[12,2], index: 1, kind: input, shape index: {}]   ;;  %s8394_s16 = inlined_call_operand.vmem [shape: f32[1,2], index: 16, kind: output, shape index: {}]  }
   0x1   :  { %8396 = sst [smem:[#allocation4_spill]] %s8378_s4  ;;  %4891 = vmatprep.subr.bf16.mxu0 %v5887_v0  ;;  %4895 = vmatprep.mubr.msk.bf16.mxu0 %vm5888_vm1, %v5887_v0  ;;  %v104_v3 = vld [vmem:[%s8379_s0] sm:$0xff]  ;;  %v105_v4 = vld [vmem:[%s8379_s0 + $0x8] sm:$0xff]  ;;  %v106_v7 = vld [vmem:[%s8379_s0 + $0x10] sm:$0xff]  ;;  %vm426_vm3 = vcmask 392192   ;;  %s5890_s4 = smov 88  }
   0x2   :  { %s8397_s23 = sld [smem:[#allocation4_spill]]  ;;  %v114_v6 = vpack.c.bf16 %v105_v4, %v104_v3  ;;  %v107_v8 = vld [vmem:[%s8379_s0 + $0x18] sm:$0xff]  ;;  %v108_v10 = vld [vmem:[%s8379_s0 + $0x20] sm:$0xff]  ;;  %v109_v11 = vld [vmem:[%s8379_s0 + $0x28] sm:$0xff]  ;;  %vm1233_vm4 = vcmask 1045504   ;;  %vm1223_vm5 = vcmask 97280  }
   0x3   :  { %v115_v9 = vpack.c.bf16 %v107_v8, %v106_v7  ;;  %v116_v12 = vpack.c.bf16 %v109_v11, %v108_v10  ;;  %v6021_v13 = vld [vmem:[%s8380_s5] ss:$0 sm:$0xff]  ;;  %v86_v18 = vld [vmem:[%s8381_s3 + $0x30] sm:$0xff]  ;;  %v81_v21 = vld [vmem:[%s8381_s3 + $0x8] sm:$0xff]  ;;  %vm4088_vm6 = vcmask 1043456   ;;  %vm4067_vm7 = vcmask 261120  }
   0x4   :  { %v80_v17 = vld [vmem:[%s8381_s3] sm:$0xff]  ;;  %v87_v22 = vld [vmem:[%s8381_s3 + $0x38] sm:$0xff]  ;;  %v93_v23 = vld [vmem:[%s8381_s3 + $0x68] sm:$0xff]  ;;  %vm4069_vm8 = vcmask 257024   ;;  %vm4072_vm9 = vcmask 261124   ;;  %vm4084_vm10 = vcmask 64512  }
   0x5   :  { %v92_v19 = vld [vmem:[%s8381_s3 + $0x60] sm:$0xff]  ;;  %v98_v26 = vld [vmem:[%s8381_s3 + $0x90] sm:$0xff]  ;;  %v99_v27 = vld [vmem:[%s8381_s3 + $0x98] sm:$0xff]  ;;  %s5896_s20 = smov 24   ;;  %vm4505_vm11 = vcmask 60416   ;;  %vm4532_vm12 = vcmask 15360  }
   0x6   :  { %v82_v44 = vld [vmem:[%s8381_s3 + $0x10] sm:$0xff]  ;;  %v88_v45 = vld [vmem:[%s8381_s3 + $0x40] sm:$0xff]  ;;  %v83_v48 = vld [vmem:[%s8381_s3 + $0x18] sm:$0xff]  ;;  %vm4534_vm13 = vcmask 11264   ;;  %vm4543_vm14 = vcmask 8192  }
   0x7   :  { %v94_v46 = vld [vmem:[%s8381_s3 + $0x70] sm:$0xff]  ;;  %v89_v49 = vld [vmem:[%s8381_s3 + $0x48] sm:$0xff]  ;;  %v95_v50 = vld [vmem:[%s8381_s3 + $0x78] sm:$0xff] }
   0x8   :  { %v5318_v1 = vld [vmem:[%s8397_s23] sm:$0xff]   ;;  %v5319_v2 = vld [vmem:[%s8397_s23 + $0x8] ss:$0 sps:$4 sm:$0x33]  }
   0x9   :  { %4892 = vmatpush3.bf16.msra.mxu0 %v5318_v1  ;;  %v145_v5 = vsel %vm143_vm0, %v5319_v2, 0  ;;  %v100_v53 = vld [vmem:[%s8381_s3 + $0xa0] sm:$0xff]  ;;  %v101_v54 = vld [vmem:[%s8381_s3 + $0xa8] sm:$0xff] }
   0xa   :  { %4893 = vmatprep.subr.bf16.mxu0 %v5887_v0  ;;  %v6106_v8 = vld [vmem:[%s8381_s3 + $0x20] sm:$0xff] }
   0xb   :  { %v96_v10 = vld [vmem:[%s8381_s3 + $0x80] sm:$0xff] }
   0xd   :  { %4894 = vmatpush3.bf16.msra.mxu0 %v145_v5 }
  0x10   :  { %4896 = vmatmul.mubr.msk.bf16.vlgmr.msra.gmra.mrb[0].mxu0 %vm133_vm2, %v114_v6 }
  0x11   :  { %4899 = vmatprep.mubr.msk.bf16.mxu0 %vm5888_vm1, %v5887_v0 }
  0x18   :  { %4900 = vmatmul.mubr.msk.bf16.gmra.mrb[4].mxu0 %vm133_vm2, %v115_v9  ;;  %v6111_v9 = vld [vmem:[%s8381_s3 + $0x50] sm:$0xff] }
  0x19   :  { %4903 = vmatprep.mubr.msk.bf16.mxu0 %vm5888_vm1, %v5887_v0 }
  0x20   :  { %4904 = vmatmul.mubr.msk.bf16.gmra.mrb[8].mxu0 %vm133_vm2, %v116_v12  ;;  %v6119_v12 = vld [vmem:[%s8381_s3 + $0x28] sm:$0xff] }
  0xe3   :  { %v181_v14 = vpop.f32.mrb[0].mxu0 }
  0xe4   :  { %v182_v15 = vadd.f32 %v6021_v13, %v181_v14  ;;  %v4897_v16 = vpop.f32.mrb[1].mxu0  ;;  %v6124_v14 = vld [vmem:[%s8381_s3 + $0x58] sm:$0xff] }
  0xe5   :  { %v184_v20 = vpop.f32.mrb[2].mxu0 }
  0xe6   :  { %v185_v24 = vadd.f32 %v6021_v13, %v184_v20  ;;  %v4898_v25 = vpop.f32.mrb[3].mxu0  ;;  %v204_v28 = vmul.f32 %v182_v15, %v80_v17  ;;  %v6049_v29 = vmul.f32 %v182_v15, %v86_v18  ;;  %v6051_v30 = vmul.f32 %v182_v15, %v92_v19  ;;  %v102_v18 = vld [vmem:[%s8381_s3 + $0xb0] sm:$0xff]  ;;  %v103_v19 = vld [vmem:[%s8381_s3 + $0xb8] sm:$0xff] }
  0xe7   :  { %v6059_v35 = vmul.f32 %v182_v15, %v98_v26 }
  0xe8   :  { %v6053_v31 = vpack.c.bf16 %v185_v24, %v182_v15  ;;  %v205_v32 = vmul.f32 %v185_v24, %v81_v21  ;;  %v6055_v33 = vmul.f32 %v185_v24, %v87_v22  ;;  %v6057_v34 = vmul.f32 %v185_v24, %v93_v23  ;;  %v97_v15 = vld [vmem:[%s8381_s3 + $0x88] sm:$0xff] }
  0xe9   :  { %v6061_v36 = vmul.f32 %v185_v24, %v99_v27 }
  0xea   :  { %246 = vrot.lane.b32.xlu0 %v6053_v31, %s5889_s28  ;;  %v228_v37 = vpack.c.bf16 %v205_v32, %v204_v28  ;;  %v231_v38 = vpack.c.bf16 %v6055_v33, %v6049_v29  ;;  %v234_v39 = vpack.c.bf16 %v6057_v34, %v6051_v30  ;;  %v58_v29 = vld [vmem:[%s8382_s2 + $0x10] sm:$0xff]  ;;  %v56_v30 = vld [vmem:[%s8382_s2] sm:$0xff] }
  0xeb   :  { %v189_v40 = vpop.f32.mrb[4].mxu0  ;;  %v237_v41 = vpack.c.bf16 %v6061_v36, %v6059_v35  ;;  %v59_v36 = vld [vmem:[%s8382_s2 + $0x18] sm:$0xff] }
  0xec   :  { %v190_v42 = vadd.f32 %v6021_v13, %v189_v40  ;;  %v4901_v43 = vpop.f32.mrb[5].mxu0  ;;  %4913 = vmatprep.mubr.msk.bf16.mxu1 %vm133_vm2, %v228_v37 }
  0xed   :  { %v192_v47 = vpop.f32.mrb[6].mxu0 }
  0xee   :  { %v193_v51 = vadd.f32 %v6021_v13, %v192_v47  ;;  %v4902_v52 = vpop.f32.mrb[7].mxu0  ;;  %v206_v55 = vmul.f32 %v190_v42, %v82_v44  ;;  %v212_v56 = vmul.f32 %v190_v42, %v88_v45  ;;  %v218_v57 = vmul.f32 %v190_v42, %v94_v46 }
  0xef   :  { %v224_v62 = vmul.f32 %v190_v42, %v100_v53 }
  0xf0   :  { %v6098_v58 = vpack.c.bf16 %v193_v51, %v190_v42  ;;  %v207_v59 = vmul.f32 %v193_v51, %v83_v48  ;;  %v213_v60 = vmul.f32 %v193_v51, %v89_v49  ;;  %v219_v61 = vmul.f32 %v193_v51, %v95_v50 }
  0xf1   :  { %v225_v63 = vmul.f32 %v193_v51, %v101_v54  ;;  %v62_v54 = vld [vmem:[%s8382_s2 + $0x30] sm:$0xff] }
  0xf2   :  { %248 = vrot.lane.b32.xlu0 %v6098_v58, %s5889_s28  ;;  %v229_v1 = vpack.c.bf16 %v207_v59, %v206_v55  ;;  %v232_v2 = vpack.c.bf16 %v213_v60, %v212_v56  ;;  %v235_v3 = vpack.c.bf16 %v219_v61, %v218_v57  ;;  %v60_v57 = vld [vmem:[%s8382_s2 + $0x20] sm:$0xff]  ;;  %v63_v59 = vld [vmem:[%s8382_s2 + $0x38] sm:$0xff] }
  0xf3   :  { %v197_v4 = vpop.f32.mrb[8].mxu0  ;;  %v238_v5 = vpack.c.bf16 %v225_v63, %v224_v62  ;;  %v61_v63 = vld [vmem:[%s8382_s2 + $0x28] sm:$0xff] }
  0xf4   :  { %v198_v6 = vadd.f32 %v6021_v13, %v197_v4  ;;  %v4905_v7 = vpop.f32.mrb[9].mxu0 }
  0xf5   :  { %v200_v11 = vpop.f32.mrb[10].mxu0  ;;  %v66_v7 = vld [vmem:[%s8382_s2 + $0x50] sm:$0xff] }
  0xf6   :  { %v201_v16 = vadd.f32 %v6021_v13, %v200_v11  ;;  %v4906_v17 = vpop.f32.mrb[11].mxu0  ;;  %v208_v20 = vmul.f32 %v198_v6, %v6106_v8  ;;  %v214_v21 = vmul.f32 %v198_v6, %v6111_v9  ;;  %v220_v22 = vmul.f32 %v198_v6, %v96_v10 }
  0xf7   :  { %v226_v26 = vmul.f32 %v198_v6, %v102_v18 }
  0xf8   :  { %v6138_v23 = vpack.c.bf16 %v201_v16, %v198_v6  ;;  %v209_v24 = vmul.f32 %v201_v16, %v6119_v12  ;;  %v215_v13 = vmul.f32 %v201_v16, %v6124_v14  ;;  %v221_v25 = vmul.f32 %v201_v16, %v97_v15  ;;  %v64_v15 = vld [vmem:[%s8382_s2 + $0x40] sm:$0xff] }
  0xf9   :  { %v227_v27 = vmul.f32 %v201_v16, %v103_v19  ;;  %v67_v16 = vld [vmem:[%s8382_s2 + $0x58] sm:$0xff] }
  0xfa   :  { %250 = vrot.lane.b32.xlu1 %v6138_v23, %s5889_s28  ;;  %v230_v28 = vpack.c.bf16 %v209_v24, %v208_v20  ;;  %v233_v32 = vpack.c.bf16 %v215_v13, %v214_v21  ;;  %v236_v37 = vpack.c.bf16 %v221_v25, %v220_v22  ;;  %v65_v21 = vld [vmem:[%s8382_s2 + $0x48] sm:$0xff] }
  0xfb   :  { %v239_v40 = vpack.c.bf16 %v227_v27, %v226_v26 }
 0x15c   :  { %v247_v42 = vpop.permute.xlu0 %246 }
 0x15d   :  { %5297 = vmatprep.subr.msk.bf16.mxu1 %vm133_vm2, %v247_v42  ;;  %v289_v43 = vsel %vm133_vm2, %v247_v42, 0  ;;  %v71_v42 = vld [vmem:[%s8382_s2 + $0x78] sm:$0xff] }
 0x15e   :  { %4908 = vmatpush3.bf16.xpose.msra.mxu1 %v289_v43 }
 0x164   :  { %v249_v44 = vpop.permute.xlu0 %248 }
 0x165   :  { %5298 = vmatprep.subr.msk.bf16.mxu1 %vm133_vm2, %v249_v44  ;;  %v292_v45 = vsel %vm133_vm2, %v249_v44, 0 }
 0x166   :  { %4910 = vmatpush3.bf16.xpose.msra.mxu1 %v292_v45 }
 0x16c   :  { %v251_v46 = vpop.permute.xlu1 %250 }
 0x16d   :  { %5299 = vmatprep.subr.msk.bf16.mxu1 %vm133_vm2, %v251_v46  ;;  %v295_v47 = vsel %vm133_vm2, %v251_v46, 0 }
 0x16e   :  { %4912 = vmatpush3.bf16.xpose.msra.mxu1 %v295_v47  ;;  %v69_v47 = vld [vmem:[%s8382_s2 + $0x68] sm:$0xff] }
 0x16f   :  { %4967 = vmatprep.subr.bf16.mxu1 %v5887_v0 }
 0x175   :  { %4914 = vmatmul.mubr.msk.bf16.vlgmr.msra.gmra.mrb[0].mxu1 %vm133_vm2, %v229_v1 }
 0x176   :  { %4917 = vmatprep.mubr.msk.bf16.mxu1 %vm133_vm2, %v230_v28  ;;  %v70_v28 = vld [vmem:[%s8382_s2 + $0x70] sm:$0xff] }
 0x17d   :  { %4918 = vmatmul.mubr.msk.bf16.gmra.mrb[4].mxu1 %vm133_vm2, %v231_v38  ;;  %v57_v38 = vld [vmem:[%s8382_s2 + $0x8] sm:$0xff] }
 0x17e   :  { %4921 = vmatprep.mubr.msk.bf16.mxu1 %vm133_vm2, %v232_v2 }
 0x185   :  { %4922 = vmatmul.mubr.msk.bf16.gmra.mrb[8].mxu1 %vm133_vm2, %v233_v32 }
 0x186   :  { %4925 = vmatprep.mubr.msk.bf16.mxu1 %vm133_vm2, %v234_v39 }
 0x18d   :  { %4926 = vmatmul.mubr.msk.bf16.gmra.mrb[12].mxu1 %vm133_vm2, %v235_v3 }
 0x18e   :  { %4929 = vmatprep.mubr.msk.bf16.mxu1 %vm133_vm2, %v236_v37 }
 0x195   :  { %4930 = vmatmul.mubr.msk.bf16.gmra.mrb[16].mxu1 %vm133_vm2, %v237_v41 }
 0x196   :  { %4933 = vmatprep.mubr.msk.bf16.mxu1 %vm133_vm2, %v238_v5 }
 0x19d   :  { %4934 = vmatmul.mubr.msk.bf16.gmra.mrb[20].mxu1 %vm133_vm2, %v239_v40  ;;  %v68_v40 = vld [vmem:[%s8382_s2 + $0x60] sm:$0xff] }
 0x19e   :  { %4971 = vmatprep.mubr.msk.bf16.mxu1 %vm5888_vm1, %v5887_v0 }
 0x248   :  { %v4915_v33 = vpop.f32.mrb[0].mxu1 }
 0x249   :  { %v6179_v34 = vadd.f32 %v4915_v33, %v58_v29  ;;  %v331_v35 = vpop.f32.mrb[1].mxu1 }
 0x24a   :  { %v6187_v39 = vadd.f32 %v331_v35, %v56_v30  ;;  %v4916_v41 = vpop.f32.mrb[2].mxu1 }
 0x24b   :  { %v334_v48 = vpop.f32.mrb[3].mxu1  ;;  %v433_v49 = vsel %vm426_vm3, %v6179_v34, -inf  ;;  %v6191_v50 = vadd.f32 %v4916_v41, %v59_v36  ;;  %v74_v41 = vld [vmem:[%s8382_s2 + $0x90] sm:$0xff] }
 0x24c   :  { %v6193_v51 = vadd.f32 %v334_v48, %v57_v38  ;;  %434 = vmax.xlane.f32.xlu0 %v433_v49  ;;  %v427_v52 = vsel %vm426_vm3, %v6187_v39, -inf }
 0x24d   :  { %428 = vmax.xlane.f32.xlu1 %v427_v52  ;;  %v436_v56 = vsel %vm426_vm3, %v6191_v50, -inf  ;;  %v72_v52 = vld [vmem:[%s8382_s2 + $0x80] sm:$0xff] }
 0x24e   :  { %v430_v53 = vsel %vm426_vm3, %v6193_v51, -inf }
 0x250   :  { %431 = vmax.xlane.f32.xlu0 %v430_v53  ;;  %v4919_v55 = vpop.f32.mrb[4].mxu1  ;;  %v75_v53 = vld [vmem:[%s8382_s2 + $0x98] sm:$0xff] }
 0x251   :  { %v6210_v60 = vadd.f32 %v4919_v55, %v62_v54  ;;  %437 = vmax.xlane.f32.xlu1 %v436_v56  ;;  %v347_v61 = vpop.f32.mrb[5].mxu1 }
 0x252   :  { %v4920_v62 = vpop.f32.mrb[6].mxu1  ;;  %v6215_v1 = vadd.f32 %v347_v61, %v60_v57 }
 0x253   :  { %v6217_v2 = vadd.f32 %v4920_v62, %v63_v59  ;;  %v350_v3 = vpop.f32.mrb[7].mxu1  ;;  %v445_v4 = vsel %vm426_vm3, %v6210_v60, -inf  ;;  %v73_v59 = vld [vmem:[%s8382_s2 + $0x88] sm:$0xff] }
 0x254   :  { %446 = vmax.xlane.f32.xlu0 %v445_v4  ;;  %v6221_v5 = vadd.f32 %v350_v3, %v61_v63  ;;  %v439_v10 = vsel %vm426_vm3, %v6215_v1, -inf }
 0x255   :  { %v448_v6 = vsel %vm426_vm3, %v6217_v2, -inf }
 0x256   :  { %449 = vmax.xlane.f32.xlu1 %v448_v6  ;;  %v442_v19 = vsel %vm426_vm3, %v6221_v5, -inf }
 0x258   :  { %v4923_v11 = vpop.f32.mrb[8].mxu1  ;;  %440 = vmax.xlane.f32.xlu0 %v439_v10 }
 0x259   :  { %v6236_v17 = vadd.f32 %v4923_v11, %v66_v7  ;;  %v363_v18 = vpop.f32.mrb[9].mxu1  ;;  %v78_v7 = vld [vmem:[%s8382_s2 + $0xb0] sm:$0xff] }
 0x25a   :  { %v4924_v20 = vpop.f32.mrb[10].mxu1  ;;  %443 = vmax.xlane.f32.xlu1 %v442_v19  ;;  %v6243_v22 = vadd.f32 %v363_v18, %v64_v15  ;;  %v76_v15 = vld [vmem:[%s8382_s2 + $0xa0] sm:$0xff] }
 0x25b   :  { %v6245_v24 = vadd.f32 %v4924_v20, %v67_v16  ;;  %v366_v13 = vpop.f32.mrb[11].mxu1  ;;  %v457_v25 = vsel %vm426_vm3, %v6236_v17, -inf  ;;  %v79_v16 = vld [vmem:[%s8382_s2 + $0xb8] sm:$0xff] }
 0x25c   :  { %458 = vmax.xlane.f32.xlu0 %v457_v25  ;;  %v6249_v26 = vadd.f32 %v366_v13, %v65_v21  ;;  %v451_v32 = vsel %vm426_vm3, %v6243_v22, -inf  ;;  %v77_v13 = vld [vmem:[%s8382_s2 + $0xa8] sm:$0xff] }
 0x25d   :  { %v460_v27 = vsel %vm426_vm3, %v6245_v24, -inf }
 0x25e   :  { %461 = vmax.xlane.f32.xlu1 %v460_v27  ;;  %v454_v45 = vsel %vm426_vm3, %v6249_v26, -inf }
 0x260   :  { %v4927_v37 = vpop.f32.mrb[12].mxu1  ;;  %452 = vmax.xlane.f32.xlu0 %v451_v32 }
 0x261   :  { %v6264_v43 = vadd.f32 %v4927_v37, %v70_v28  ;;  %v379_v44 = vpop.f32.mrb[13].mxu1 }
 0x262   :  { %v4928_v46 = vpop.f32.mrb[14].mxu1  ;;  %455 = vmax.xlane.f32.xlu1 %v454_v45  ;;  %v6271_v29 = vadd.f32 %v379_v44, %v68_v40 }
 0x263   :  { %v6273_v30 = vadd.f32 %v4928_v46, %v71_v42  ;;  %v382_v33 = vpop.f32.mrb[15].mxu1  ;;  %v469_v35 = vsel %vm426_vm3, %v6264_v43, -inf }
 0x264   :  { %470 = vmax.xlane.f32.xlu0 %v469_v35  ;;  %v6277_v36 = vadd.f32 %v382_v33, %v69_v47  ;;  %v463_v48 = vsel %vm426_vm3, %v6271_v29, -inf }
 0x265   :  { %v472_v38 = vsel %vm426_vm3, %v6273_v30, -inf }
 0x266   :  { %473 = vmax.xlane.f32.xlu1 %v472_v38  ;;  %v466_v56 = vsel %vm426_vm3, %v6277_v36, -inf }
 0x268   :  { %v4931_v49 = vpop.f32.mrb[16].mxu1  ;;  %464 = vmax.xlane.f32.xlu0 %v463_v48 }
 0x269   :  { %v6292_v54 = vadd.f32 %v4931_v49, %v74_v41  ;;  %v395_v55 = vpop.f32.mrb[17].mxu1 }
 0x26a   :  { %v4932_v57 = vpop.f32.mrb[18].mxu1  ;;  %467 = vmax.xlane.f32.xlu1 %v466_v56  ;;  %v6299_v61 = vadd.f32 %v395_v55, %v72_v52 }
 0x26b   :  { %v6301_v62 = vadd.f32 %v4932_v57, %v75_v53  ;;  %v398_v63 = vpop.f32.mrb[19].mxu1  ;;  %v481_v3 = vsel %vm426_vm3, %v6292_v54, -inf }
 0x26c   :  { %482 = vmax.xlane.f32.xlu0 %v481_v3  ;;  %v6305_v4 = vadd.f32 %v398_v63, %v73_v59  ;;  %v475_v10 = vsel %vm426_vm3, %v6299_v61, -inf }
 0x26d   :  { %v484_v6 = vsel %vm426_vm3, %v6301_v62, -inf }
 0x26e   :  { %485 = vmax.xlane.f32.xlu1 %v484_v6  ;;  %v478_v20 = vsel %vm426_vm3, %v6305_v4, -inf }
 0x270   :  { %v4935_v11 = vpop.f32.mrb[20].mxu1  ;;  %476 = vmax.xlane.f32.xlu0 %v475_v10 }
 0x271   :  { %v6320_v18 = vadd.f32 %v4935_v11, %v78_v7  ;;  %v411_v19 = vpop.f32.mrb[21].mxu1 }
 0x272   :  { %v4936_v21 = vpop.f32.mrb[22].mxu1  ;;  %479 = vmax.xlane.f32.xlu1 %v478_v20  ;;  %v6327_v25 = vadd.f32 %v411_v19, %v76_v15 }
 0x273   :  { %v6329_v27 = vadd.f32 %v4936_v21, %v79_v16  ;;  %v414_v28 = vpop.f32.mrb[23].mxu1  ;;  %v493_v32 = vsel %vm426_vm3, %v6320_v18, -inf }
 0x274   :  { %494 = vmax.xlane.f32.xlu0 %v493_v32  ;;  %v6333_v37 = vadd.f32 %v414_v28, %v77_v13  ;;  %v487_v42 = vsel %vm426_vm3, %v6327_v25, -inf }
 0x275   :  { %v496_v40 = vsel %vm426_vm3, %v6329_v27, -inf }
 0x276   :  { %497 = vmax.xlane.f32.xlu1 %v496_v40  ;;  %v490_v44 = vsel %vm426_vm3, %v6333_v37, -inf }
 0x278   :  { %488 = vmax.xlane.f32.xlu0 %v487_v42 }
 0x27a   :  { %491 = vmax.xlane.f32.xlu1 %v490_v44 }
 0x28b   :  { %705 = vrot.lane.b32.xlu1 %v6098_v58, %s5890_s4 }
 0x28e   :  { %703 = vrot.lane.b32.xlu0 %v6053_v31, %s5890_s4 }
 0x2d9   :  { %v435_v45 = vpop.xlane.xlu0 %434 }
 0x2da   :  { %v501_v46 = vsub.f32 %v6179_v34, %v435_v45  ;;  %v429_v47 = vpop.xlane.xlu1 %428 }
 0x2db   :  { %v499_v33 = vsub.f32 %v6187_v39, %v429_v47 }
 0x2dc   :  { %v527_v35 = vmul.f32 1.442695, %v501_v46 }
 0x2dd   :  { %v523_v38 = vmul.f32 1.442695, %v499_v33  ;;  %v432_v41 = vpop.xlane.xlu0 %431 }
 0x2de   :  { %5341 = vpow2.f32 %v527_v35  ;;  %v500_v48 = vsub.f32 %v6193_v51, %v432_v41  ;;  %v438_v49 = vpop.xlane.xlu1 %437 }
 0x2df   :  { %v502_v52 = vsub.f32 %v6191_v50, %v438_v49  ;;  %5343 = vpow2.f32 %v523_v38 }
 0x2e0   :  { %v525_v58 = vmul.f32 1.442695, %v500_v48 }
 0x2e1   :  { %v529_v53 = vmul.f32 1.442695, %v502_v52  ;;  %v447_v55 = vpop.xlane.xlu0 %446 }
 0x2e2   :  { %v505_v31 = vsub.f32 %v6210_v60, %v447_v55 }
 0x2e3   :  { %5345 = vpow2.f32 %v529_v53  ;;  %v450_v34 = vpop.xlane.xlu1 %449 }
 0x2e4   :  { %v535_v56 = vmul.f32 1.442695, %v505_v31  ;;  %v506_v39 = vsub.f32 %v6217_v2, %v450_v34  ;;  %5347 = vpow2.f32 %v525_v58 }
 0x2e5   :  { %v441_v57 = vpop.xlane.xlu0 %440 }
 0x2e6   :  { %5349 = vpow2.f32 %v535_v56  ;;  %v537_v59 = vmul.f32 1.442695, %v506_v39  ;;  %v503_v51 = vsub.f32 %v6215_v1, %v441_v57 }
 0x2e7   :  { %v444_v63 = vpop.xlane.xlu1 %443 }
 0x2e8   :  { %v6352_v3 = vpop.eup %5341  ;;  %v531_v50 = vmul.f32 1.442695, %v503_v51  ;;  %v504_v6 = vsub.f32 %v6221_v5, %v444_v63  ;;  %5351 = vpow2.f32 %v537_v59 }
 0x2e9   :  { %v459_v7 = vpop.xlane.xlu0 %458  ;;  %v577_v60 = vsel %vm426_vm3, %v6352_v3, 0.0  ;;  %v6357_v10 = vpop.eup %5343 }
 0x2ea   :  { %5353 = vpow2.f32 %v531_v50  ;;  %v533_v2 = vmul.f32 1.442695, %v504_v6  ;;  %v509_v11 = vsub.f32 %v6236_v17, %v459_v7  ;;  %578 = vadd.xlane.f32.xlu0 %v577_v60  ;;  %v571_v20 = vsel %vm426_vm3, %v6357_v10, 0.0 }
 0x2eb   :  { %v462_v15 = vpop.xlane.xlu1 %461 }
 0x2ec   :  { %v543_v1 = vmul.f32 1.442695, %v509_v11  ;;  %v510_v16 = vsub.f32 %v6245_v24, %v462_v15  ;;  %5355 = vpow2.f32 %v533_v2 }
 0x2ed   :  { %v6361_v19 = vpop.eup %5345  ;;  %v453_v5 = vpop.xlane.xlu0 %452 }
 0x2ee   :  { %5357 = vpow2.f32 %v543_v1  ;;  %v545_v21 = vmul.f32 1.442695, %v510_v16  ;;  %v507_v13 = vsub.f32 %v6243_v22, %v453_v5  ;;  %572 = vadd.xlane.f32.xlu0 %v571_v20  ;;  %v580_v17 = vsel %vm426_vm3, %v6361_v19, 0.0  ;;  %v6368_v28 = vpop.eup %5347 }
 0x2ef   :  { %581 = vadd.xlane.f32.xlu1 %v580_v17  ;;  %v456_v32 = vpop.xlane.xlu1 %455  ;;  %v574_v47 = vsel %vm426_vm3, %v6368_v28, 0.0 }
 0x2f0   :  { %v6370_v24 = vpop.eup %5349  ;;  %v539_v40 = vmul.f32 1.442695, %v507_v13  ;;  %v508_v42 = vsub.f32 %v6249_v26, %v456_v32  ;;  %5359 = vpow2.f32 %v545_v21 }
 0x2f1   :  { %v471_v44 = vpop.xlane.xlu0 %470  ;;  %v589_v45 = vsel %vm426_vm3, %v6370_v24, 0.0 }
 0x2f2   :  { %5361 = vpow2.f32 %v539_v40  ;;  %v541_v22 = vmul.f32 1.442695, %v508_v42  ;;  %v513_v46 = vsub.f32 %v6264_v43, %v471_v44  ;;  %590 = vadd.xlane.f32.xlu0 %v589_v45  ;;  %v6378_v33 = vpop.eup %5351 }
 0x2f3   :  { %575 = vadd.xlane.f32.xlu1 %v574_v47  ;;  %v474_v35 = vpop.xlane.xlu1 %473  ;;  %v592_v52 = vsel %vm426_vm3, %v6378_v33, 0.0 }
 0x2f4   :  { %v6380_v38 = vpop.eup %5353  ;;  %v551_v26 = vmul.f32 1.442695, %v513_v46  ;;  %5363 = vpow2.f32 %v541_v22  ;;  %v514_v41 = vsub.f32 %v6273_v30, %v474_v35 }
 0x2f5   :  { %v465_v48 = vpop.xlane.xlu0 %464  ;;  %v583_v49 = vsel %vm426_vm3, %v6380_v38, 0.0 }
 0x2f6   :  { %5365 = vpow2.f32 %v551_v26  ;;  %v511_v43 = vsub.f32 %v6271_v29, %v465_v48  ;;  %584 = vadd.xlane.f32.xlu0 %v583_v49  ;;  %v6388_v58 = vpop.eup %5355  ;;  %v553_v34 = vmul.f32 1.442695, %v514_v41 }
 0x2f7   :  { %593 = vadd.xlane.f32.xlu1 %v592_v52  ;;  %v468_v53 = vpop.xlane.xlu1 %467  ;;  %v586_v59 = vsel %vm426_vm3, %v6388_v58, 0.0 }
 0x2f8   :  { %v6390_v55 = vpop.eup %5357  ;;  %v547_v31 = vmul.f32 1.442695, %v511_v43  ;;  %v512_v30 = vsub.f32 %v6277_v36, %v468_v53 }
 0x2f9   :  { %v483_v56 = vpop.xlane.xlu0 %482  ;;  %v601_v39 = vsel %vm426_vm3, %v6390_v55, 0.0 }
 0x2fa   :  { %5367 = vpow2.f32 %v547_v31  ;;  %v549_v29 = vmul.f32 1.442695, %v512_v30  ;;  %v517_v57 = vsub.f32 %v6292_v54, %v483_v56  ;;  %602 = vadd.xlane.f32.xlu0 %v601_v39  ;;  %v6398_v51 = vpop.eup %5359 }
 0x2fb   :  { %587 = vadd.xlane.f32.xlu1 %v586_v59  ;;  %v486_v63 = vpop.xlane.xlu1 %485  ;;  %v604_v54 = vsel %vm426_vm3, %v6398_v51, 0.0 }
 0x2fc   :  { %v6400_v50 = vpop.eup %5361  ;;  %5369 = vpow2.f32 %v549_v29  ;;  %v559_v36 = vmul.f32 1.442695, %v517_v57  ;;  %v518_v1 = vsub.f32 %v6301_v62, %v486_v63 }
 0x2fd   :  { %5371 = vpow2.f32 %v553_v34  ;;  %v477_v6 = vpop.xlane.xlu0 %476  ;;  %v595_v7 = vsel %vm426_vm3, %v6400_v50, 0.0 }
 0x2fe   :  { %v515_v60 = vsub.f32 %v6299_v61, %v477_v6  ;;  %596 = vadd.xlane.f32.xlu0 %v595_v7  ;;  %v6407_v2 = vpop.eup %5363  ;;  %5373 = vpow2.f32 %v559_v36  ;;  %v561_v17 = vmul.f32 1.442695, %v518_v1 }
 0x2ff   :  { %605 = vadd.xlane.f32.xlu1 %v604_v54  ;;  %v480_v11 = vpop.xlane.xlu1 %479  ;;  %v598_v61 = vsel %vm426_vm3, %v6407_v2, 0.0 }
 0x300   :  { %v6409_v15 = vpop.eup %5365  ;;  %v555_v16 = vmul.f32 1.442695, %v515_v60  ;;  %v516_v32 = vsub.f32 %v6305_v4, %v480_v11 }
 0x301   :  { %v495_v5 = vpop.xlane.xlu0 %494  ;;  %v613_v20 = vsel %vm426_vm3, %v6409_v15, 0.0 }
 0x302   :  { %614 = vadd.xlane.f32.xlu0 %v613_v20  ;;  %5375 = vpow2.f32 %v555_v16  ;;  %v557_v46 = vmul.f32 1.442695, %v516_v32  ;;  %v521_v6 = vsub.f32 %v6320_v18, %v495_v5 }
 0x303   :  { %599 = vadd.xlane.f32.xlu1 %v598_v61  ;;  %v498_v21 = vpop.xlane.xlu1 %497  ;;  %5377 = vpow2.f32 %v561_v17 }
 0x304   :  { %v6416_v13 = vpop.eup %5367  ;;  %5379 = vpow2.f32 %v557_v46  ;;  %v567_v7 = vmul.f32 1.442695, %v521_v6 }
 0x305   :  { %v489_v40 = vpop.xlane.xlu0 %488  ;;  %v607_v62 = vsel %vm426_vm3, %v6416_v13, 0.0 }
 0x306   :  { %v6421_v42 = vpop.eup %5369  ;;  %v519_v47 = vsub.f32 %v6327_v25, %v489_v40  ;;  %v522_v25 = vsub.f32 %v6329_v27, %v498_v21 }
 0x307   :  { %v6423_v44 = vpop.eup %5371  ;;  %v492_v45 = vpop.xlane.xlu1 %491  ;;  %608 = vadd.xlane.f32.xlu1 %v607_v62  ;;  %v610_v22 = vsel %vm426_vm3, %v6421_v42, 0.0 }
 0x308   :  { %611 = vadd.xlane.f32.xlu0 %v610_v22  ;;  %v616_v4 = vsel %vm426_vm3, %v6423_v44, 0.0  ;;  %v6430_v26 = vpop.eup %5373  ;;  %v563_v48 = vmul.f32 1.442695, %v519_v47  ;;  %v520_v49 = vsub.f32 %v6333_v37, %v492_v45  ;;  %v569_v34 = vmul.f32 1.442695, %v522_v25 }
 0x309   :  { %v704_v35 = vpop.permute.xlu0 %703  ;;  %v625_v43 = vsel %vm426_vm3, %v6430_v26, 0.0 }
 0x30a   :  { %4937 = vmatprep.subr.bf16.mxu0 %v704_v35  ;;  %5381 = vpow2.f32 %v563_v48  ;;  %v565_v53 = vmul.f32 1.442695, %v520_v49 }
 0x30b   :  { %v706_v41 = vpop.permute.xlu1 %705  ;;  %617 = vadd.xlane.f32.xlu1 %v616_v4  ;;  %4938 = vmatpush3.bf16.msra.mxu0 %v704_v35 }
 0x30c   :  { %4939 = vmatprep.subr.bf16.mxu0 %v706_v41  ;;  %v6435_v52 = vpop.eup %5375  ;;  %5383 = vpow2.f32 %v565_v53 }
 0x30d   :  { %v619_v31 = vsel %vm426_vm3, %v6435_v52, 0.0  ;;  %v6440_v30 = vpop.eup %5377  ;;  %5385 = vpow2.f32 %v569_v34 }
 0x30e   :  { %v628_v37 = vsel %vm426_vm3, %v6440_v30, 0.0  ;;  %v6444_v56 = vpop.eup %5379  ;;  %5387 = vpow2.f32 %v567_v7 }
 0x30f   :  { %626 = vadd.xlane.f32.xlu1 %v625_v43  ;;  %4940 = vmatpush3.bf16.msra.mxu0 %v706_v41  ;;  %v622_v27 = vsel %vm426_vm3, %v6444_v56, 0.0 }
 0x313   :  { %620 = vadd.xlane.f32.xlu1 %v619_v31 }
 0x314   :  { %v6448_v39 = vpop.eup %5381 }
 0x315   :  { %v631_v29 = vsel %vm426_vm3, %v6448_v39, 0.0 }
 0x316   :  { %v6454_v57 = vpop.eup %5383 }
 0x317   :  { %629 = vadd.xlane.f32.xlu1 %v628_v37  ;;  %v634_v59 = vsel %vm426_vm3, %v6454_v57, 0.0  ;;  %v6458_v63 = vpop.eup %5385 }
 0x318   :  { %v640_v36 = vsel %vm426_vm3, %v6458_v63, 0.0 }
 0x31b   :  { %623 = vadd.xlane.f32.xlu1 %v622_v27 }
 0x31e   :  { %707 = vrot.lane.b32.xlu0 %v6138_v23, %s5890_s4  ;;  %v6463_v23 = vpop.eup %5387 }
 0x31f   :  { %632 = vadd.xlane.f32.xlu1 %v631_v29  ;;  %v637_v60 = vsel %vm426_vm3, %v6463_v23, 0.0 }
 0x323   :  { %635 = vadd.xlane.f32.xlu1 %v634_v59 }
 0x327   :  { %641 = vadd.xlane.f32.xlu1 %v640_v36 }
 0x33d   :  { %638 = vadd.xlane.f32.xlu0 %v637_v60 }
 0x377   :  { %v579_v54 = vpop.xlane.xlu0 %578 }
 0x37b   :  { %v573_v11 = vpop.xlane.xlu0 %572 }
 0x37c   :  { %v582_v1 = vpop.xlane.xlu1 %581  ;;  %5389 = vrcp.f32 %v573_v11 }
 0x37f   :  { %v591_v16 = vpop.xlane.xlu0 %590 }
 0x380   :  { %v576_v20 = vpop.xlane.xlu1 %575 }
 0x381   :  { %5391 = vrcp.f32 %v576_v20 }
 0x382   :  { %5393 = vrcp.f32 %v582_v1 }
 0x383   :  { %v585_v61 = vpop.xlane.xlu0 %584 }
 0x384   :  { %v594_v21 = vpop.xlane.xlu1 %593 }
 0x386   :  { %v5390_v5 = vpop.eup %5389 }
 0x387   :  { %v603_v17 = vpop.xlane.xlu0 %602  ;;  %v667_v45 = vmul.f32 %v5390_v5, %v6357_v10 }
 0x388   :  { %v588_v18 = vpop.xlane.xlu1 %587 }
 0x389   :  { %5395 = vrcp.f32 %v588_v18 }
 0x38a   :  { %5397 = vrcp.f32 %v579_v54 }
 0x38b   :  { %v5392_v32 = vpop.eup %5391  ;;  %v597_v40 = vpop.xlane.xlu0 %596  ;;  %5399 = vrcp.f32 %v585_v61 }
 0x38c   :  { %v606_v62 = vpop.xlane.xlu1 %605  ;;  %v668_v22 = vmul.f32 %v5392_v32, %v6368_v28  ;;  %5401 = vrcp.f32 %v594_v21  ;;  %v5394_v41 = vpop.eup %5393 }
 0x38d   :  { %v670_v10 = vmul.f32 %v5394_v41, %v6361_v19 }
 0x38e   :  { %v691_v46 = vpack.c.bf16 %v668_v22, %v667_v45 }
 0x38f   :  { %v615_v35 = vpop.xlane.xlu0 %614 }
 0x390   :  { %v600_v47 = vpop.xlane.xlu1 %599  ;;  %4943 = vmatprep.mubr.msk.bf16.mxu0 %vm426_vm3, %v691_v46 }
 0x391   :  { %5403 = vrcp.f32 %v600_v47 }
 0x392   :  { %5405 = vrcp.f32 %v591_v16 }
 0x393   :  { %v5396_v49 = vpop.eup %5395  ;;  %5407 = vrcp.f32 %v597_v40 }
 0x394   :  { %v609_v4 = vpop.xlane.xlu1 %608  ;;  %v5398_v43 = vpop.eup %5397  ;;  %v672_v31 = vmul.f32 %v5396_v49, %v6388_v58  ;;  %5409 = vrcp.f32 %v606_v62 }
 0x395   :  { %v612_v48 = vpop.xlane.xlu0 %611  ;;  %v5400_v25 = vpop.eup %5399  ;;  %v669_v34 = vmul.f32 %v5398_v43, %v6352_v3  ;;  %5411 = vrcp.f32 %v609_v4 }
 0x396   :  { %v671_v37 = vmul.f32 %v5400_v25, %v6380_v38  ;;  %5413 = vrcp.f32 %v612_v48  ;;  %v5402_v59 = vpop.eup %5401 }
 0x397   :  { %v692_v27 = vpack.c.bf16 %v670_v10, %v669_v34  ;;  %5415 = vrcp.f32 %v603_v17  ;;  %v674_v7 = vmul.f32 %v5402_v59, %v6378_v33 }
 0x398   :  { %v618_v28 = vpop.xlane.xlu1 %617  ;;  %v693_v19 = vpack.c.bf16 %v672_v31, %v671_v37 }
 0x399   :  { %v708_v53 = vpop.permute.xlu0 %707  ;;  %5417 = vrcp.f32 %v618_v28 }
 0x39a   :  { %4941 = vmatprep.subr.bf16.mxu0 %v708_v53  ;;  %5419 = vrcp.f32 %v615_v35 }
 0x39b   :  { %4942 = vmatpush3.bf16.msra.mxu0 %v708_v53  ;;  %v5404_v36 = vpop.eup %5403 }
 0x39c   :  { %v627_v29 = vpop.xlane.xlu1 %626  ;;  %4983 = vmatprep.subr.bf16.mxu0 %v5887_v0  ;;  %v5406_v58 = vpop.eup %5405  ;;  %v676_v38 = vmul.f32 %v5404_v36, %v6407_v2  ;;  %v6518_v36 = vld [vmem:[%s8381_s3] sm:$0xff] }
 0x39d   :  { %v5408_v3 = vpop.eup %5407  ;;  %v673_v60 = vmul.f32 %v5406_v58, %v6370_v24 }
 0x39e   :  { %4944 = vmatmul.mubr.msk.bf16.vlgmr.msra.gmra.mrb[12].mxu0 %vm426_vm3, %v692_v27  ;;  %v675_v54 = vmul.f32 %v5408_v3, %v6400_v50  ;;  %v5410_v11 = vpop.eup %5409  ;;  %v6524_v3 = vld [vmem:[%s8381_s3 + $0x30] sm:$0xff] }
 0x39f   :  { %4947 = vmatprep.mubr.msk.bf16.mxu0 %vm426_vm3, %v693_v19  ;;  %v694_v16 = vpack.c.bf16 %v674_v7, %v673_v60  ;;  %v5412_v20 = vpop.eup %5411  ;;  %v678_v2 = vmul.f32 %v5410_v11, %v6398_v51  ;;  %v6530_v60 = vld [vmem:[%s8381_s3 + $0x8] sm:$0xff] }
 0x3a0   :  { %v621_v6 = vpop.xlane.xlu1 %620  ;;  %v695_v61 = vpack.c.bf16 %v676_v38, %v675_v54  ;;  %v5414_v21 = vpop.eup %5413  ;;  %v679_v24 = vmul.f32 %v5412_v20, %v6416_v13 }
 0x3a1   :  { %v5416_v17 = vpop.eup %5415  ;;  %5421 = vrcp.f32 %v621_v6  ;;  %v680_v50 = vmul.f32 %v5414_v21, %v6421_v42 }
 0x3a2   :  { %v677_v18 = vmul.f32 %v5416_v17, %v6390_v55 }
 0x3a3   :  { %v5418_v40 = vpop.eup %5417  ;;  %v697_v62 = vpack.c.bf16 %v680_v50, %v679_v24  ;;  %v6544_v24 = vld [vmem:[%s8381_s3 + $0x10] sm:$0xff] }
 0x3a4   :  { %v630_v1 = vpop.xlane.xlu1 %629  ;;  %v696_v32 = vpack.c.bf16 %v678_v2, %v677_v18  ;;  %v5420_v45 = vpop.eup %5419  ;;  %v682_v22 = vmul.f32 %v5418_v40, %v6423_v44  ;;  %v6550_v18 = vld [vmem:[%s8381_s3 + $0x40] sm:$0xff] }
 0x3a5   :  { %v681_v42 = vmul.f32 %v5420_v45, %v6409_v15  ;;  %v6558_v45 = vld [vmem:[%s8381_s3 + $0x18] sm:$0xff] }
 0x3a6   :  { %4948 = vmatmul.mubr.msk.bf16.gmra.mrb[16].mxu0 %vm426_vm3, %v694_v16 }
 0x3a7   :  { %4951 = vmatprep.mubr.msk.bf16.mxu0 %vm426_vm3, %v695_v61  ;;  %v698_v46 = vpack.c.bf16 %v682_v22, %v681_v42 }
 0x3a8   :  { %v624_v33 = vpop.xlane.xlu1 %623 }
 0x3a9   :  { %5423 = vrcp.f32 %v624_v33 }
 0x3aa   :  { %5425 = vrcp.f32 %v630_v1  ;;  %v6536_v1 = vld [vmem:[%s8381_s3 + $0x38] sm:$0xff] }
 0x3ab   :  { %5427 = vrcp.f32 %v627_v29  ;;  %v5422_v13 = vpop.eup %5421 }
 0x3ac   :  { %v633_v5 = vpop.xlane.xlu1 %632  ;;  %v683_v47 = vmul.f32 %v5422_v13, %v6435_v52  ;;  %v6564_v13 = vld [vmem:[%s8381_s3 + $0x48] sm:$0xff] }
 0x3ad   :  { %5429 = vrcp.f32 %v633_v5 }
 0x3ae   :  { %4952 = vmatmul.mubr.msk.bf16.gmra.mrb[20].mxu0 %vm426_vm3, %v696_v32 }
 0x3af   :  { %4955 = vmatprep.mubr.msk.bf16.mxu0 %vm426_vm3, %v697_v62 }
 0x3b0   :  { %v636_v51 = vpop.xlane.xlu1 %635 }
 0x3b1   :  { %5431 = vrcp.f32 %v636_v51 }
 0x3b3   :  { %v5424_v55 = vpop.eup %5423 }
 0x3b4   :  { %v684_v35 = vmul.f32 %v5424_v55, %v6444_v56  ;;  %v5426_v4 = vpop.eup %5425  ;;  %v642_v28 = vpop.xlane.xlu1 %641 }
 0x3b5   :  { %v5428_v48 = vpop.eup %5427  ;;  %v686_v49 = vmul.f32 %v5426_v4, %v6440_v30  ;;  %5433 = vrcp.f32 %v642_v28  ;;  %v6576_v4 = vld [vmem:[%s8381_s3 + $0x60] sm:$0xff] }
 0x3b6   :  { %4956 = vmatmul.mubr.msk.bf16.gmra.mrb[24].mxu0 %vm426_vm3, %v698_v46  ;;  %v699_v41 = vpack.c.bf16 %v684_v35, %v683_v47  ;;  %v685_v43 = vmul.f32 %v5428_v48, %v6430_v26 }
 0x3b7   :  { %v5430_v44 = vpop.eup %5429 }
 0x3b8   :  { %4959 = vmatprep.mubr.msk.bf16.mxu0 %vm426_vm3, %v699_v41  ;;  %v700_v15 = vpack.c.bf16 %v686_v49, %v685_v43  ;;  %v687_v10 = vmul.f32 %v5430_v44, %v6448_v39  ;;  %v5320_v39 = vld [vmem:[%s8383_s6] sm:$0xff]   ;;  %v6582_v44 = vld [vmem:[%s8381_s3 + $0x78] sm:$0xff] }
 0x3b9   :  { %4968 = vmatpush3.bf16.msra.mxu1 %v5320_v39 }
 0x3ba   :  { %4969 = vmatprep.subr.bf16.mxu1 %v5887_v0 }
 0x3bb   :  { %v5432_v25 = vpop.eup %5431 }
 0x3bc   :  { %v688_v52 = vmul.f32 %v5432_v25, %v6454_v57  ;;  %v5321_v57 = vld [vmem:[%s8383_s6 + $0x8] ss:$0 sps:$4 sm:$0x33]  }
 0x3be   :  { %4960 = vmatmul.mubr.msk.bf16.gmra.mrb[28].mxu0 %vm426_vm3, %v700_v15  ;;  %v701_v56 = vpack.c.bf16 %v688_v52, %v687_v10  ;;  %v6588_v10 = vld [vmem:[%s8381_s3 + $0x68] sm:$0xff] }
 0x3bf   :  { %v5434_v31 = vpop.eup %5433 }
 0x3c0   :  { %4963 = vmatprep.mubr.msk.bf16.mxu0 %vm426_vm3, %v701_v56  ;;  %v690_v26 = vmul.f32 %v5434_v31, %v6458_v63  ;;  %v6594_v31 = vld [vmem:[%s8381_s3 + $0x90] sm:$0xff] }
 0x3ca   :  { %v639_v53 = vpop.xlane.xlu0 %638 }
 0x3cb   :  { %5435 = vrcp.f32 %v639_v53 }
 0x3d5   :  { %v5436_v30 = vpop.eup %5435 }
 0x3d6   :  { %v689_v34 = vmul.f32 %v5436_v30, %v6463_v23  ;;  %v948_v23 = vsel %vm143_vm0, %v5321_v57, 0 }
 0x3d7   :  { %4970 = vmatpush3.bf16.msra.mxu1 %v948_v23  ;;  %v6606_v23 = vld [vmem:[%s8381_s3 + $0x98] sm:$0xff] }
 0x3d8   :  { %v702_v37 = vpack.c.bf16 %v690_v26, %v689_v34  ;;  %4999 = vmatprep.subr.bf16.mxu1 %v5887_v0  ;;  %v6600_v26 = vld [vmem:[%s8381_s3 + $0x80] sm:$0xff] }
 0x3da   :  { %4964 = vmatmul.mubr.msk.bf16.gmra.mrb[32].mxu0 %vm426_vm3, %v702_v37 }
 0x3db   :  { %4987 = vmatprep.mubr.msk.bf16.mxu0 %vm5888_vm1, %v5887_v0 }
 0x471   :  { %v4945_v63 = vpop.f32.mrb[12].mxu0 }
 0x472   :  { %v782_v27 = vpop.f32.mrb[13].mxu0  ;;  %v879_v50 = vmul.f32 %v6544_v24, %v4945_v63 }
 0x473   :  { %v4946_v29 = vpop.f32.mrb[14].mxu0  ;;  %v877_v58 = vmul.f32 %v6518_v36, %v782_v27 }
 0x474   :  { %v785_v59 = vpop.f32.mrb[15].mxu0  ;;  %v880_v51 = vmul.f32 %v6558_v45, %v4946_v29 }
 0x475   :  { %v878_v54 = vmul.f32 %v6530_v60, %v785_v59  ;;  %v6612_v59 = vld [vmem:[%s8381_s3 + $0x88] sm:$0xff] }
 0x479   :  { %v4949_v19 = vpop.f32.mrb[16].mxu0 }
 0x47a   :  { %v883_v6 = vmul.f32 %v6524_v3, %v4949_v19  ;;  %v798_v7 = vpop.f32.mrb[17].mxu0 }
 0x47b   :  { %v4950_v38 = vpop.f32.mrb[18].mxu0  ;;  %v881_v17 = vmul.f32 %v798_v7, %v6106_v8 }
 0x47c   :  { %v901_v11 = vadd.f32 %v883_v6, %v877_v58  ;;  %v884_v16 = vmul.f32 %v6536_v1, %v4950_v38  ;;  %v801_v20 = vpop.f32.mrb[19].mxu0 }
 0x47d   :  { %v882_v8 = vmul.f32 %v801_v20, %v6119_v12  ;;  %v6627_v20 = vld [vmem:[%s8381_s3 + $0xa0] sm:$0xff] }
 0x47e   :  { %v902_v61 = vadd.f32 %v884_v16, %v878_v54  ;;  %v6621_v54 = vld [vmem:[%s8381_s3 + $0xb0] sm:$0xff] }
 0x481   :  { %v4953_v21 = vpop.f32.mrb[20].mxu0 }
 0x482   :  { %v887_v33 = vmul.f32 %v4953_v21, %v6111_v9  ;;  %v814_v2 = vpop.f32.mrb[21].mxu0 }
 0x483   :  { %v885_v5 = vmul.f32 %v6550_v18, %v814_v2  ;;  %v4954_v32 = vpop.f32.mrb[22].mxu0 }
 0x484   :  { %v905_v40 = vadd.f32 %v887_v33, %v881_v17  ;;  %v888_v9 = vmul.f32 %v4954_v32, %v6124_v14  ;;  %v817_v62 = vpop.f32.mrb[23].mxu0  ;;  %v6570_v14 = vld [vmem:[%s8381_s3 + $0x70] sm:$0xff]  ;;  %v6633_v33 = vld [vmem:[%s8381_s3 + $0xb8] sm:$0xff]  ;;  %v6639_v32 = vld [vmem:[%s8381_s3 + $0xa8] sm:$0xff] }
 0x485   :  { %v903_v22 = vadd.f32 %v885_v5, %v879_v50  ;;  %v886_v42 = vmul.f32 %v6564_v13, %v817_v62 }
 0x486   :  { %v906_v12 = vadd.f32 %v888_v9, %v882_v8 }
 0x487   :  { %v904_v55 = vadd.f32 %v886_v42, %v880_v51 }
 0x489   :  { %v4957_v46 = vpop.f32.mrb[24].mxu0 }
 0x48a   :  { %v891_v47 = vmul.f32 %v6570_v14, %v4957_v46  ;;  %v830_v35 = vpop.f32.mrb[25].mxu0 }
 0x48b   :  { %v889_v41 = vmul.f32 %v6576_v4, %v830_v35  ;;  %v4958_v48 = vpop.f32.mrb[26].mxu0 }
 0x48c   :  { %v909_v49 = vadd.f32 %v903_v22, %v891_v47  ;;  %v892_v43 = vmul.f32 %v6582_v44, %v4958_v48  ;;  %v833_v25 = vpop.f32.mrb[27].mxu0  ;;  %v925_v22 = vlaneseq }
 0x48d   :  { %v907_v15 = vadd.f32 %v901_v11, %v889_v41  ;;  %v890_v52 = vmul.f32 %v6588_v10, %v833_v25  ;;  %v5785_v25 = vld [vmem:[%s8379_s0] sm:$0xff] }
 0x48e   :  { %v910_v56 = vadd.f32 %v904_v55, %v892_v43  ;;  %v6648_v42 = vshrl.u32 %v925_v22, 7  ;;  %v6656_v55 = vld [vmem:[%s8384_s10] sm:$0x3f] }
 0x48f   :  { %v908_v28 = vadd.f32 %v902_v61, %v890_v52 }
 0x491   :  { %v4961_v53 = vpop.f32.mrb[28].mxu0 }
 0x492   :  { %v895_v30 = vmul.f32 %v6594_v31, %v4961_v53  ;;  %v846_v34 = vpop.f32.mrb[29].mxu0 }
 0x493   :  { %v893_v37 = vmul.f32 %v6600_v26, %v846_v34  ;;  %v4962_v39 = vpop.f32.mrb[30].mxu0 }
 0x494   :  { %v913_v57 = vadd.f32 %v907_v15, %v895_v30  ;;  %v896_v63 = vmul.f32 %v6606_v23, %v4962_v39  ;;  %v849_v27 = vpop.f32.mrb[31].mxu0 }
 0x495   :  { %v911_v29 = vadd.f32 %v905_v40, %v893_v37  ;;  %v894_v19 = vmul.f32 %v6612_v59, %v849_v27  ;;  %v5787_v27 = vld [vmem:[%s8379_s0 + $0x10] sm:$0xff] }
 0x496   :  { %v914_v58 = vadd.f32 %v908_v28, %v896_v63 }
 0x497   :  { %v912_v6 = vadd.f32 %v906_v12, %v894_v19  ;;  %v6651_v12 = vsub.s32 0, %v6648_v42 }
 0x498   :  { %v922_v7 = vpack.c.bf16 %v914_v58, %v913_v57  ;;  %v5788_v58 = vld [vmem:[%s8379_s0 + $0x18] sm:$0xff] }
 0x499   :  { %v928_v46 = vrot.slane %v6656_v55, %v6651_v12 }
 0x49a   :  { %4972 = vmatmul.mubr.msk.bf16.vlgmr.msra.gmra.mrb[24].mxu1 %vm133_vm2, %v922_v7 }
 0x49b   :  { %4975 = vmatprep.mubr.msk.bf16.mxu1 %vm5888_vm1, %v5887_v0 }
 0x4ad   :  { %v4965_v38 = vpop.f32.mrb[32].mxu0 }
 0x4ae   :  { %v899_v11 = vmul.f32 %v6621_v54, %v4965_v38  ;;  %v862_v16 = vpop.f32.mrb[33].mxu0 }
 0x4af   :  { %v897_v61 = vmul.f32 %v6627_v20, %v862_v16  ;;  %v4966_v21 = vpop.f32.mrb[34].mxu0 }
 0x4b0   :  { %v917_v17 = vadd.f32 %v911_v29, %v899_v11  ;;  %v900_v2 = vmul.f32 %v6633_v33, %v4966_v21  ;;  %v865_v50 = vpop.f32.mrb[35].mxu0 }
 0x4b1   :  { %v915_v5 = vadd.f32 %v909_v49, %v897_v61  ;;  %v898_v8 = vmul.f32 %v6639_v32, %v865_v50 }
 0x4b2   :  { %v918_v40 = vadd.f32 %v912_v6, %v900_v2  ;;  %v5789_v2 = vld [vmem:[%s8379_s0 + $0x20] sm:$0xff] }
 0x4b3   :  { %v916_v9 = vadd.f32 %v910_v56, %v898_v8  ;;  %v5786_v56 = vld [vmem:[%s8379_s0 + $0x8] sm:$0xff] }
 0x4b4   :  { %v924_v62 = vpack.c.bf16 %v918_v40, %v917_v17  ;;  %v5790_v8 = vld [vmem:[%s8379_s0 + $0x28] sm:$0xff] }
 0x4b5   :  { %v923_v51 = vpack.c.bf16 %v916_v9, %v915_v5 }
 0x4b7   :  { %4976 = vmatmul.mubr.msk.bf16.gmra.mrb[28].mxu1 %vm133_vm2, %v923_v51 }
 0x4b8   :  { %4979 = vmatprep.mubr.msk.bf16.mxu1 %vm5888_vm1, %v5887_v0 }
 0x4bf   :  { %4980 = vmatmul.mubr.msk.bf16.gmra.mrb[32].mxu1 %vm133_vm2, %v924_v62 }
 0x4c0   :  { %5001 = vmatprep.mubr.msk.bf16.mxu1 %vm5888_vm1, %v5887_v0 }
 0x56d   :  { %v984_v47 = vpop.f32.mrb[24].mxu1 }
 0x56e   :  { %v985_v35 = vadd.f32 %v984_v47, %v928_v46  ;;  %v4973_v41 = vpop.f32.mrb[25].mxu1 }
 0x56f   :  { %v987_v48 = vpop.f32.mrb[26].mxu1 }
 0x570   :  { %v988_v49 = vadd.f32 %v987_v48, %v928_v46  ;;  %v4974_v43 = vpop.f32.mrb[27].mxu1  ;;  %v1007_v15 = vadd.f32 %v5785_v25, %v985_v35 }
 0x572   :  { %v1013_v52 = vsel %vm133_vm2, %v1007_v15, 0.0  ;;  %v1008_v28 = vadd.f32 %v5786_v56, %v988_v49 }
 0x573   :  { %1014 = vadd.xlane.f32.xlu1 %v1013_v52 }
 0x574   :  { %v1016_v53 = vsel %vm133_vm2, %v1008_v28, 0.0 }
 0x577   :  { %1017 = vadd.xlane.f32.xlu1 %v1016_v53 }
 0x58a   :  { %v992_v30 = vpop.f32.mrb[28].mxu1 }
 0x58b   :  { %v993_v34 = vadd.f32 %v992_v30, %v928_v46  ;;  %v4977_v37 = vpop.f32.mrb[29].mxu1 }
 0x58c   :  { %v995_v39 = vpop.f32.mrb[30].mxu1 }
 0x58d   :  { %v996_v57 = vadd.f32 %v995_v39, %v928_v46  ;;  %v4978_v63 = vpop.f32.mrb[31].mxu1  ;;  %v1009_v29 = vadd.f32 %v5787_v27, %v993_v34 }
 0x58f   :  { %v1019_v19 = vsel %vm133_vm2, %v1009_v29, 0.0  ;;  %v1010_v6 = vadd.f32 %v5788_v58, %v996_v57 }
 0x590   :  { %1020 = vadd.xlane.f32.xlu1 %v1019_v19  ;;  %v5322_v19 = vld [vmem:[%s8385_s7] sm:$0xff]  }
 0x591   :  { %v1022_v16 = vsel %vm133_vm2, %v1010_v6, 0.0  ;;  %4984 = vmatpush3.bf16.msra.mxu0 %v5322_v19 }
 0x592   :  { %v1000_v7 = vpop.f32.mrb[32].mxu1  ;;  %4985 = vmatprep.subr.bf16.mxu0 %v5887_v0 }
 0x593   :  { %v1001_v38 = vadd.f32 %v1000_v7, %v928_v46  ;;  %v4981_v11 = vpop.f32.mrb[33].mxu1 }
 0x594   :  { %1023 = vadd.xlane.f32.xlu1 %v1022_v16  ;;  %v1003_v61 = vpop.f32.mrb[34].mxu1  ;;  %v5323_v11 = vld [vmem:[%s8385_s7 + $0x8] ss:$0 sps:$4 sm:$0x33]  }
 0x595   :  { %v1004_v21 = vadd.f32 %v1003_v61, %v928_v46  ;;  %v4982_v17 = vpop.f32.mrb[35].mxu1  ;;  %v1011_v50 = vadd.f32 %v5789_v2, %v1001_v38  ;;  %v1144_v61 = vsel %vm143_vm0, %v5323_v11, 0 }
 0x596   :  { %4986 = vmatpush3.bf16.msra.mxu0 %v1144_v61 }
 0x597   :  { %v1025_v5 = vsel %vm133_vm2, %v1011_v50, 0.0  ;;  %v1012_v40 = vadd.f32 %v5790_v8, %v1004_v21  ;;  %5013 = vmatprep.subr.bf16.mxu0 %v5887_v0 }
 0x598   :  { %1026 = vadd.xlane.f32.xlu1 %v1025_v5 }
 0x599   :  { %v1028_v9 = vsel %vm133_vm2, %v1012_v40, 0.0 }
 0x59c   :  { %1029 = vadd.xlane.f32.xlu1 %v1028_v9  ;;  %v6716_v9 = vsub.s32 2, %v6648_v42 }
 0x600   :  { %v1015_v62 = vpop.xlane.xlu1 %1014 }
 0x601   :  { %v1032_v51 = vmul.f32 0.05, %v1015_v62 }
 0x603   :  { %v1038_v22 = vsub.f32 %v1007_v15, %v1032_v51  ;;  %v1095_v51 = vrot.slane %v6656_v55, %v6716_v9 }
 0x604   :  { %v1018_v46 = vpop.xlane.xlu1 %1017 }
 0x605   :  { %v1033_v47 = vmul.f32 0.05, %v1018_v46  ;;  %v1044_v35 = vmul.f32 %v1038_v22, %v1038_v22  ;;  %v6721_v46 = vsub.s32 3, %v6648_v42 }
 0x607   :  { %v1039_v41 = vsub.f32 %v1008_v28, %v1033_v47  ;;  %v1050_v48 = vsel %vm133_vm2, %v1044_v35, 0.0 }
 0x608   :  { %1051 = vadd.xlane.f32.xlu0 %v1050_v48  ;;  %v1105_v48 = vrot.slane %v6656_v55, %v6721_v46 }
 0x609   :  { %v1045_v49 = vmul.f32 %v1039_v41, %v1039_v41 }
 0x60b   :  { %v1053_v43 = vsel %vm133_vm2, %v1045_v49, 0.0 }
 0x60c   :  { %1054 = vadd.xlane.f32.xlu1 %v1053_v43 }
 0x61d   :  { %v1021_v25 = vpop.xlane.xlu1 %1020 }
 0x61e   :  { %v1034_v52 = vmul.f32 0.05, %v1021_v25 }
 0x620   :  { %v6686_v56 = vsub.f32 %v1009_v29, %v1034_v52 }
 0x621   :  { %v1024_v53 = vpop.xlane.xlu1 %1023 }
 0x622   :  { %v1035_v30 = vmul.f32 0.05, %v1024_v53  ;;  %v1046_v15 = vmul.f32 %v6686_v56, %v6686_v56 }
 0x624   :  { %v6690_v34 = vsub.f32 %v1010_v6, %v1035_v30  ;;  %v1056_v28 = vsel %vm133_vm2, %v1046_v15, 0.0 }
 0x625   :  { %1057 = vadd.xlane.f32.xlu0 %v1056_v28  ;;  %v1027_v37 = vpop.xlane.xlu1 %1026 }
 0x626   :  { %v1036_v39 = vmul.f32 0.05, %v1027_v37  ;;  %v1047_v57 = vmul.f32 %v6690_v34, %v6690_v34 }
 0x628   :  { %v6695_v63 = vsub.f32 %v1011_v50, %v1036_v39  ;;  %v1059_v27 = vsel %vm133_vm2, %v1047_v57, 0.0 }
 0x629   :  { %1060 = vadd.xlane.f32.xlu1 %v1059_v27  ;;  %v1030_v29 = vpop.xlane.xlu1 %1029 }
 0x62a   :  { %v1037_v58 = vmul.f32 0.05, %v1030_v29  ;;  %v1048_v6 = vmul.f32 %v6695_v63, %v6695_v63 }
 0x62c   :  { %v6703_v7 = vsub.f32 %v1012_v40, %v1037_v58  ;;  %v1062_v38 = vsel %vm133_vm2, %v1048_v6, 0.0 }
 0x62d   :  { %1063 = vadd.xlane.f32.xlu0 %v1062_v38 }
 0x62e   :  { %v1049_v16 = vmul.f32 %v6703_v7, %v6703_v7 }
 0x630   :  { %v1065_v21 = vsel %vm133_vm2, %v1049_v16, 0.0 }
 0x631   :  { %1066 = vadd.xlane.f32.xlu1 %v1065_v21 }
 0x695   :  { %v1052_v17 = vpop.xlane.xlu0 %1051 }
 0x696   :  { %v1068_v2 = vmul.f32 0.05, %v1052_v17 }
 0x698   :  { %v1074_v50 = vadd.f32 1e-05, %v1068_v2 }
 0x699   :  { %v1055_v5 = vpop.xlane.xlu1 %1054 }
 0x69a   :  { %5437 = vrsqrt.f32 %v1074_v50  ;;  %v1069_v8 = vmul.f32 0.05, %v1055_v5 }
 0x69c   :  { %v1075_v40 = vadd.f32 1e-05, %v1069_v8 }
 0x69e   :  { %5439 = vrsqrt.f32 %v1075_v40 }
 0x6a4   :  { %v5438_v62 = vpop.eup %5437 }
 0x6a5   :  { %v1086_v47 = vmul.f32 %v5438_v62, %v1038_v22 }
 0x6a7   :  { %v1096_v49 = vmul.f32 %v1095_v51, %v1086_v47 }
 0x6a8   :  { %v5440_v35 = vpop.eup %5439 }
 0x6a9   :  { %v1087_v43 = vmul.f32 %v5440_v35, %v1039_v41  ;;  %v6725_v52 = vadd.f32 %v1105_v48, %v1096_v49 }
 0x6ab   :  { %v1097_v25 = vmul.f32 %v1095_v51, %v1087_v43 }
 0x6ad   :  { %v6727_v53 = vadd.f32 %v1105_v48, %v1097_v25 }
 0x6af   :  { %v1115_v30 = vpack.c.bf16 %v6727_v53, %v6725_v52 }
 0x6b1   :  { %4988 = vmatmul.mubr.msk.bf16.vlgmr.msra.gmra.mrb[36].mxu0 %vm133_vm2, %v1115_v30 }
 0x6b2   :  { %v1058_v15 = vpop.xlane.xlu0 %1057  ;;  %4991 = vmatprep.mubr.msk.bf16.mxu0 %vm5888_vm1, %v5887_v0 }
 0x6b3   :  { %v1070_v22 = vmul.f32 0.05, %v1058_v15 }
 0x6b5   :  { %v1076_v28 = vadd.f32 1e-05, %v1070_v22 }
 0x6b6   :  { %v1061_v37 = vpop.xlane.xlu1 %1060 }
 0x6b7   :  { %5441 = vrsqrt.f32 %v1076_v28  ;;  %v1071_v39 = vmul.f32 0.05, %v1061_v37 }
 0x6b9   :  { %v1077_v41 = vadd.f32 1e-05, %v1071_v39 }
 0x6ba   :  { %v1064_v57 = vpop.xlane.xlu0 %1063 }
 0x6bb   :  { %5443 = vrsqrt.f32 %v1077_v41  ;;  %v1072_v27 = vmul.f32 0.05, %v1064_v57 }
 0x6bd   :  { %v1078_v29 = vadd.f32 1e-05, %v1072_v27 }
 0x6be   :  { %v1067_v19 = vpop.xlane.xlu1 %1066 }
 0x6bf   :  { %5445 = vrsqrt.f32 %v1078_v29  ;;  %v1073_v58 = vmul.f32 0.05, %v1067_v19 }
 0x6c1   :  { %v5442_v6 = vpop.eup %5441  ;;  %v1079_v38 = vadd.f32 1e-05, %v1073_v58 }
 0x6c2   :  { %v1088_v11 = vmul.f32 %v5442_v6, %v6686_v56 }
 0x6c3   :  { %5447 = vrsqrt.f32 %v1079_v38 }
 0x6c4   :  { %v1098_v21 = vmul.f32 %v1095_v51, %v1088_v11 }
 0x6c5   :  { %v5444_v16 = vpop.eup %5443 }
 0x6c6   :  { %v1089_v61 = vmul.f32 %v5444_v16, %v6690_v34  ;;  %v6736_v50 = vadd.f32 %v1105_v48, %v1098_v21 }
 0x6c8   :  { %v1099_v17 = vmul.f32 %v1095_v51, %v1089_v61 }
 0x6c9   :  { %v5446_v2 = vpop.eup %5445 }
 0x6ca   :  { %v6738_v5 = vadd.f32 %v1105_v48, %v1099_v17  ;;  %v1090_v8 = vmul.f32 %v5446_v2, %v6695_v63 }
 0x6cc   :  { %v1116_v40 = vpack.c.bf16 %v6738_v5, %v6736_v50  ;;  %v1100_v47 = vmul.f32 %v1095_v51, %v1090_v8 }
 0x6cd   :  { %v5448_v62 = vpop.eup %5447 }
 0x6ce   :  { %4992 = vmatmul.mubr.msk.bf16.gmra.mrb[40].mxu0 %vm133_vm2, %v1116_v40  ;;  %v1091_v56 = vmul.f32 %v5448_v62, %v6703_v7  ;;  %v6747_v35 = vadd.f32 %v1105_v48, %v1100_v47  ;;  %v5324_v7 = vld [vmem:[%s8386_s9] sm:$0x3f]  }
 0x6cf   :  { %4995 = vmatprep.mubr.msk.bf16.mxu0 %vm5888_vm1, %v5887_v0  ;;  %v1235_v43 = vsel %vm1233_vm4, %v5324_v7, 0 }
 0x6d0   :  { %v1101_v34 = vmul.f32 %v1095_v51, %v1091_v56  ;;  %5000 = vmatpush3.bf16.msra.mxu1 %v1235_v43  ;;  %v4584_v51 = vld [vmem:[%s8387_s8] ss:$0 sm:$0xff] }
 0x6d2   :  { %v6749_v49 = vadd.f32 %v1105_v48, %v1101_v34  ;;  %v6771_v34 = vsub.s32 1, %v6648_v42 }
 0x6d4   :  { %v1117_v63 = vpack.c.bf16 %v6749_v49, %v6747_v35 }
 0x6d6   :  { %4996 = vmatmul.mubr.msk.bf16.gmra.mrb[44].mxu0 %vm133_vm2, %v1117_v63  ;;  %v1217_v63 = vrot.slane %v6656_v55, %v6771_v34 }
 0x6d7   :  { %5017 = vmatprep.mubr.msk.bf16.mxu0 %vm5888_vm1, %v5887_v0 }
 0x784   :  { %v1180_v48 = vpop.f32.mrb[36].mxu0 }
 0x785   :  { %v1181_v25 = vadd.f32 %v4584_v51, %v1180_v48  ;;  %v4989_v30 = vpop.f32.mrb[37].mxu0 }
 0x786   :  { %v1183_v15 = vpop.f32.mrb[38].mxu0 }
 0x787   :  { %v1184_v22 = vadd.f32 %v4584_v51, %v1183_v15  ;;  %v4990_v28 = vpop.f32.mrb[39].mxu0  ;;  %v1203_v37 = vmax.f32 %v1181_v25, 0.0 }
 0x789   :  { %v1204_v39 = vmax.f32 %v1184_v22, 0.0 }
 0x78b   :  { %v1211_v41 = vpack.c.bf16 %v1204_v39, %v1203_v37 }
 0x78d   :  { %5002 = vmatmul.mubr.msk.bf16.vlgmr.msra.gmra.mrb[36].mxu1 %vm1223_vm5, %v1211_v41 }
 0x78e   :  { %5005 = vmatprep.mubr.msk.bf16.mxu1 %vm5888_vm1, %v5887_v0 }
 0x7a1   :  { %v1188_v57 = vpop.f32.mrb[40].mxu0 }
 0x7a2   :  { %v1189_v27 = vadd.f32 %v4584_v51, %v1188_v57  ;;  %v4993_v29 = vpop.f32.mrb[41].mxu0 }
 0x7a3   :  { %v1191_v19 = vpop.f32.mrb[42].mxu0 }
 0x7a4   :  { %v1192_v58 = vadd.f32 %v4584_v51, %v1191_v19  ;;  %v4994_v6 = vpop.f32.mrb[43].mxu0  ;;  %v1205_v38 = vmax.f32 %v1189_v27, 0.0 }
 0x7a6   :  { %v1206_v11 = vmax.f32 %v1192_v58, 0.0 }
 0x7a8   :  { %v1212_v16 = vpack.c.bf16 %v1206_v11, %v1205_v38 }
 0x7a9   :  { %v1196_v61 = vpop.f32.mrb[44].mxu0 }
 0x7aa   :  { %v1197_v21 = vadd.f32 %v4584_v51, %v1196_v61  ;;  %v4997_v17 = vpop.f32.mrb[45].mxu0  ;;  %5006 = vmatmul.mubr.msk.bf16.gmra.mrb[40].mxu1 %vm1223_vm5, %v1212_v16 }
 0x7ab   :  { %v1199_v2 = vpop.f32.mrb[46].mxu0  ;;  %5009 = vmatprep.mubr.msk.bf16.mxu1 %vm5888_vm1, %v5887_v0 }
 0x7ac   :  { %v1200_v8 = vadd.f32 %v4584_v51, %v1199_v2  ;;  %v4998_v40 = vpop.f32.mrb[47].mxu0  ;;  %v1207_v62 = vmax.f32 %v1197_v21, 0.0 }
 0x7ae   :  { %v1208_v56 = vmax.f32 %v1200_v8, 0.0 }
 0x7b0   :  { %v1213_v47 = vpack.c.bf16 %v1208_v56, %v1207_v62 }
 0x7b2   :  { %5010 = vmatmul.mubr.msk.bf16.gmra.mrb[44].mxu1 %vm1223_vm5, %v1213_v47 }
 0x860   :  { %v1271_v7 = vpop.f32.mrb[36].mxu1 }
 0x861   :  { %v1272_v43 = vadd.f32 %v1271_v7, %v1217_v63  ;;  %v5003_v48 = vpop.f32.mrb[37].mxu1 }
 0x862   :  { %v1274_v25 = vpop.f32.mrb[38].mxu1 }
 0x863   :  { %v1275_v30 = vadd.f32 %v1274_v25, %v1217_v63  ;;  %v5004_v15 = vpop.f32.mrb[39].mxu1  ;;  %v1294_v51 = vadd.f32 %v1272_v43, %v6725_v52 }
 0x865   :  { %v1300_v22 = vsel %vm133_vm2, %v1294_v51, 0.0  ;;  %v1295_v28 = vadd.f32 %v1275_v30, %v6727_v53 }
 0x866   :  { %1301 = vadd.xlane.f32.xlu0 %v1300_v22 }
 0x867   :  { %v1303_v37 = vsel %vm133_vm2, %v1295_v28, 0.0 }
 0x868   :  { %1304 = vadd.xlane.f32.xlu1 %v1303_v37 }
 0x87d   :  { %v1279_v39 = vpop.f32.mrb[40].mxu1 }
 0x87e   :  { %v1280_v41 = vadd.f32 %v1279_v39, %v1217_v63  ;;  %v5007_v57 = vpop.f32.mrb[41].mxu1 }
 0x87f   :  { %v1282_v27 = vpop.f32.mrb[42].mxu1 }
 0x880   :  { %v1283_v29 = vadd.f32 %v1282_v27, %v1217_v63  ;;  %v5008_v19 = vpop.f32.mrb[43].mxu1  ;;  %v1296_v58 = vadd.f32 %v1280_v41, %v6736_v50 }
 0x882   :  { %v1306_v6 = vsel %vm133_vm2, %v1296_v58, 0.0  ;;  %v1297_v52 = vadd.f32 %v1283_v29, %v6738_v5 }
 0x883   :  { %1307 = vadd.xlane.f32.xlu0 %v1306_v6 }
 0x884   :  { %v1309_v38 = vsel %vm133_vm2, %v1297_v52, 0.0 }
 0x885   :  { %1310 = vadd.xlane.f32.xlu1 %v1309_v38  ;;  %v1287_v53 = vpop.f32.mrb[44].mxu1 }
 0x886   :  { %v1288_v11 = vadd.f32 %v1287_v53, %v1217_v63  ;;  %v5011_v16 = vpop.f32.mrb[45].mxu1 }
 0x887   :  { %v1290_v61 = vpop.f32.mrb[46].mxu1 }
 0x888   :  { %v1291_v21 = vadd.f32 %v1290_v61, %v1217_v63  ;;  %v5012_v17 = vpop.f32.mrb[47].mxu1  ;;  %v1298_v2 = vadd.f32 %v1288_v11, %v6747_v35  ;;  %v5326_v11 = vld [vmem:[%s8397_s23 + $0x14] ss:$0 sps:$4 sm:$0x33]  }
 0x88a   :  { %v1312_v8 = vsel %vm133_vm2, %v1298_v2, 0.0  ;;  %v1299_v50 = vadd.f32 %v1291_v21, %v6749_v49  ;;  %v1434_v21 = vsel %vm143_vm0, %v5326_v11, 0 }
 0x88b   :  { %1313 = vadd.xlane.f32.xlu0 %v1312_v8 }
 0x88c   :  { %v1315_v40 = vsel %vm133_vm2, %v1299_v50, 0.0 }
 0x88d   :  { %1316 = vadd.xlane.f32.xlu1 %v1315_v40 }
 0x8f3   :  { %v1302_v5 = vpop.xlane.xlu0 %1301 }
 0x8f4   :  { %v1318_v62 = vmul.f32 0.05, %v1302_v5 }
 0x8f5   :  { %v1305_v56 = vpop.xlane.xlu1 %1304 }
 0x8f6   :  { %v1324_v47 = vsub.f32 %v1294_v51, %v1318_v62  ;;  %v1319_v7 = vmul.f32 0.05, %v1305_v56  ;;  %v6818_v56 = vsub.s32 4, %v6648_v42 }
 0x8f8   :  { %v1325_v43 = vsub.f32 %v1295_v28, %v1319_v7  ;;  %v1330_v48 = vmul.f32 %v1324_v47, %v1324_v47  ;;  %v1381_v7 = vrot.slane %v6656_v55, %v6818_v56 }
 0x8fa   :  { %v1336_v63 = vsel %vm133_vm2, %v1330_v48, 0.0  ;;  %v1331_v25 = vmul.f32 %v1325_v43, %v1325_v43  ;;  %v6823_v48 = vsub.s32 5, %v6648_v42 }
 0x8fb   :  { %1337 = vadd.xlane.f32.xlu0 %v1336_v63 }
 0x8fc   :  { %v1339_v35 = vsel %vm133_vm2, %v1331_v25, 0.0 }
 0x8fd   :  { %1340 = vadd.xlane.f32.xlu1 %v1339_v35 }
 0x910   :  { %v1308_v30 = vpop.xlane.xlu0 %1307 }
 0x911   :  { %v1320_v49 = vmul.f32 0.05, %v1308_v30  ;;  %v1391_v30 = vrot.slane %v6656_v55, %v6823_v48 }
 0x912   :  { %v1311_v15 = vpop.xlane.xlu1 %1310 }
 0x913   :  { %v6789_v22 = vsub.f32 %v1296_v58, %v1320_v49  ;;  %v1321_v37 = vmul.f32 0.05, %v1311_v15  ;;  %v5325_v58 = vld [vmem:[%s8397_s23 + $0xc] sm:$0xff]  }
 0x914   :  { %5014 = vmatpush3.bf16.msra.mxu0 %v5325_v58 }
 0x915   :  { %v6791_v39 = vsub.f32 %v1297_v52, %v1321_v37  ;;  %v1332_v51 = vmul.f32 %v6789_v22, %v6789_v22  ;;  %5015 = vmatprep.subr.bf16.mxu0 %v5887_v0 }
 0x917   :  { %v1342_v28 = vsel %vm133_vm2, %v1332_v51, 0.0  ;;  %v1333_v41 = vmul.f32 %v6791_v39, %v6791_v39 }
 0x918   :  { %1343 = vadd.xlane.f32.xlu0 %v1342_v28  ;;  %v1314_v57 = vpop.xlane.xlu0 %1313  ;;  %5016 = vmatpush3.bf16.msra.mxu0 %v1434_v21 }
 0x919   :  { %v1322_v27 = vmul.f32 0.05, %v1314_v57  ;;  %v1345_v29 = vsel %vm133_vm2, %v1333_v41, 0.0 }
 0x91a   :  { %1346 = vadd.xlane.f32.xlu1 %v1345_v29  ;;  %v1317_v19 = vpop.xlane.xlu1 %1316 }
 0x91b   :  { %v6802_v6 = vsub.f32 %v1298_v2, %v1322_v27  ;;  %v1323_v52 = vmul.f32 0.05, %v1317_v19 }
 0x91d   :  { %v6804_v38 = vsub.f32 %v1299_v50, %v1323_v52  ;;  %v1334_v53 = vmul.f32 %v6802_v6, %v6802_v6 }
 0x91f   :  { %v1348_v16 = vsel %vm133_vm2, %v1334_v53, 0.0  ;;  %v1335_v61 = vmul.f32 %v6804_v38, %v6804_v38 }
 0x920   :  { %1349 = vadd.xlane.f32.xlu0 %v1348_v16 }
 0x921   :  { %v1351_v17 = vsel %vm133_vm2, %v1335_v61, 0.0 }
 0x922   :  { %1352 = vadd.xlane.f32.xlu1 %v1351_v17 }
 0x988   :  { %v1338_v2 = vpop.xlane.xlu0 %1337 }
 0x989   :  { %v1354_v8 = vmul.f32 0.05, %v1338_v2 }
 0x98a   :  { %v1341_v50 = vpop.xlane.xlu1 %1340 }
 0x98b   :  { %v1360_v40 = vadd.f32 1e-05, %v1354_v8  ;;  %v1355_v5 = vmul.f32 0.05, %v1341_v50 }
 0x98d   :  { %5449 = vrsqrt.f32 %v1360_v40  ;;  %v1361_v62 = vadd.f32 1e-05, %v1355_v5 }
 0x98f   :  { %5451 = vrsqrt.f32 %v1361_v62 }
 0x997   :  { %v5450_v63 = vpop.eup %5449 }
 0x998   :  { %v1372_v25 = vmul.f32 %v5450_v63, %v1324_v47 }
 0x999   :  { %v5452_v35 = vpop.eup %5451 }
 0x99a   :  { %v1382_v49 = vmul.f32 %v1381_v7, %v1372_v25  ;;  %v1373_v15 = vmul.f32 %v5452_v35, %v1325_v43 }
 0x99c   :  { %v1383_v37 = vmul.f32 %v1381_v7, %v1373_v15  ;;  %v6827_v51 = vadd.f32 %v1391_v30, %v1382_v49 }
 0x99e   :  { %v6829_v28 = vadd.f32 %v1391_v30, %v1383_v37 }
 0x9a0   :  { %v1404_v41 = vpack.c.bf16 %v6829_v28, %v6827_v51 }
 0x9a2   :  { %5018 = vmatmul.mubr.msk.bf16.vlgmr.msra.gmra.mrb[48].mxu0 %vm133_vm2, %v1404_v41 }
 0x9a3   :  { %5021 = vmatprep.mubr.msk.bf16.mxu0 %vm5888_vm1, %v5887_v0 }
 0x9a5   :  { %v1344_v42 = vpop.xlane.xlu0 %1343 }
 0x9a6   :  { %v1356_v47 = vmul.f32 0.05, %v1344_v42 }
 0x9a7   :  { %v1347_v57 = vpop.xlane.xlu1 %1346 }
 0x9a8   :  { %v1362_v27 = vadd.f32 1e-05, %v1356_v47  ;;  %v1357_v55 = vmul.f32 0.05, %v1347_v57 }
 0x9aa   :  { %5453 = vrsqrt.f32 %v1362_v27  ;;  %v1363_v43 = vadd.f32 1e-05, %v1357_v55 }
 0x9ac   :  { %5455 = vrsqrt.f32 %v1363_v43 }
 0x9ad   :  { %v1350_v29 = vpop.xlane.xlu0 %1349 }
 0x9ae   :  { %v1358_v19 = vmul.f32 0.05, %v1350_v29 }
 0x9af   :  { %v1353_v58 = vpop.xlane.xlu1 %1352 }
 0x9b0   :  { %v1364_v52 = vadd.f32 1e-05, %v1358_v19  ;;  %v1359_v53 = vmul.f32 0.05, %v1353_v58 }
 0x9b2   :  { %5457 = vrsqrt.f32 %v1364_v52  ;;  %v1365_v11 = vadd.f32 1e-05, %v1359_v53 }
 0x9b4   :  { %v5454_v16 = vpop.eup %5453  ;;  %5459 = vrsqrt.f32 %v1365_v11 }
 0x9b5   :  { %v1374_v61 = vmul.f32 %v5454_v16, %v6789_v22 }
 0x9b6   :  { %v5456_v21 = vpop.eup %5455 }
 0x9b7   :  { %v1375_v17 = vmul.f32 %v5456_v21, %v6791_v39  ;;  %v1384_v2 = vmul.f32 %v1381_v7, %v1374_v61 }
 0x9b9   :  { %v1385_v8 = vmul.f32 %v1381_v7, %v1375_v17  ;;  %v6838_v50 = vadd.f32 %v1391_v30, %v1384_v2 }
 0x9bb   :  { %v6840_v40 = vadd.f32 %v1391_v30, %v1385_v8 }
 0x9bc   :  { %v5458_v5 = vpop.eup %5457 }
 0x9bd   :  { %v1405_v62 = vpack.c.bf16 %v6840_v40, %v6838_v50  ;;  %v1376_v63 = vmul.f32 %v5458_v5, %v6802_v6  ;;  %v4599_v6 = vld [vmem:[%s8380_s5 + $0x1] ss:$0 sm:$0xff] }
 0x9be   :  { %v5460_v25 = vpop.eup %5459 }
 0x9bf   :  { %5022 = vmatmul.mubr.msk.bf16.gmra.mrb[52].mxu0 %vm133_vm2, %v1405_v62  ;;  %v1377_v22 = vmul.f32 %v5460_v25, %v6804_v38  ;;  %v1386_v35 = vmul.f32 %v1381_v7, %v1376_v63 }
 0x9c0   :  { %5025 = vmatprep.mubr.msk.bf16.mxu0 %vm5888_vm1, %v5887_v0 }
 0x9c1   :  { %v1387_v39 = vmul.f32 %v1381_v7, %v1377_v22  ;;  %v6849_v49 = vadd.f32 %v1391_v30, %v1386_v35 }
 0x9c3   :  { %v6851_v15 = vadd.f32 %v1391_v30, %v1387_v39 }
 0x9c5   :  { %v1406_v37 = vpack.c.bf16 %v6851_v15, %v6849_v49 }
 0x9c7   :  { %5026 = vmatmul.mubr.msk.bf16.gmra.mrb[56].mxu0 %vm133_vm2, %v1406_v37 }
 0xa75   :  { %v1470_v41 = vpop.f32.mrb[48].mxu0 }
 0xa76   :  { %v1471_v38 = vadd.f32 %v4599_v6, %v1470_v41  ;;  %v5019_v42 = vpop.f32.mrb[49].mxu0 }
 0xa77   :  { %v1473_v47 = vpop.f32.mrb[50].mxu0 }
 0xa78   :  { %v1474_v57 = vadd.f32 %v4599_v6, %v1473_v47  ;;  %v5020_v27 = vpop.f32.mrb[51].mxu0  ;;  %v1493_v7 = vmul.f32 %v6518_v36, %v1471_v38  ;;  %v6861_v30 = vmul.f32 %v6524_v3, %v1471_v38  ;;  %v6864_v55 = vmul.f32 %v6576_v4, %v1471_v38 }
 0xa79   :  { %v6876_v52 = vmul.f32 %v6594_v31, %v1471_v38  ;;  %v6926_v27 = vld [vmem:[%s8381_s3 + $0x58] sm:$0xff] }
 0xa7a   :  { %v6866_v43 = vpack.c.bf16 %v1474_v57, %v1471_v38  ;;  %v1494_v29 = vmul.f32 %v6530_v60, %v1474_v57  ;;  %v6870_v19 = vmul.f32 %v6536_v1, %v1474_v57  ;;  %v6873_v58 = vmul.f32 %v6588_v10, %v1474_v57 }
 0xa7b   :  { %v6879_v36 = vmul.f32 %v6606_v23, %v1474_v57 }
 0xa7c   :  { %1535 = vrot.lane.b32.xlu0 %v6866_v43, %s5889_s28  ;;  %v1517_v3 = vpack.c.bf16 %v1494_v29, %v1493_v7  ;;  %v1520_v4 = vpack.c.bf16 %v6870_v19, %v6861_v30  ;;  %v1523_v60 = vpack.c.bf16 %v6873_v58, %v6864_v55  ;;  %v5795_v55 = vld [vmem:[%s8382_s2 + $0x10] sm:$0xff] }
 0xa7d   :  { %v1526_v1 = vpack.c.bf16 %v6879_v36, %v6876_v52  ;;  %v5796_v52 = vld [vmem:[%s8382_s2] sm:$0xff] }
 0xa7e   :  { %5035 = vmatprep.mubr.msk.bf16.mxu1 %vm133_vm2, %v1517_v3 }
 0xa92   :  { %v1478_v10 = vpop.f32.mrb[52].mxu0 }
 0xa93   :  { %v1479_v31 = vadd.f32 %v4599_v6, %v1478_v10  ;;  %v5023_v53 = vpop.f32.mrb[53].mxu0 }
 0xa94   :  { %v1481_v23 = vpop.f32.mrb[54].mxu0 }
 0xa95   :  { %v1482_v11 = vadd.f32 %v4599_v6, %v1481_v23  ;;  %v5024_v16 = vpop.f32.mrb[55].mxu0  ;;  %v1495_v61 = vmul.f32 %v6544_v24, %v1479_v31  ;;  %v1501_v21 = vmul.f32 %v6550_v18, %v1479_v31  ;;  %v1507_v17 = vmul.f32 %v6570_v14, %v1479_v31 }
 0xa96   :  { %v1513_v63 = vmul.f32 %v6627_v20, %v1479_v31  ;;  %v6911_v20 = vld [vmem:[%s8381_s3 + $0x50] sm:$0xff] }
 0xa97   :  { %v1496_v2 = vmul.f32 %v6558_v45, %v1482_v11  ;;  %v6894_v8 = vpack.c.bf16 %v1482_v11, %v1479_v31  ;;  %v1502_v5 = vmul.f32 %v6564_v13, %v1482_v11  ;;  %v1508_v62 = vmul.f32 %v6582_v44, %v1482_v11  ;;  %v6905_v13 = vld [vmem:[%s8381_s3 + $0x20] sm:$0xff] }
 0xa98   :  { %v1514_v25 = vmul.f32 %v6639_v32, %v1482_v11 }
 0xa99   :  { %v1518_v22 = vpack.c.bf16 %v1496_v2, %v1495_v61  ;;  %1537 = vrot.lane.b32.xlu1 %v6894_v8, %s5889_s28  ;;  %v1521_v24 = vpack.c.bf16 %v1502_v5, %v1501_v21  ;;  %v1524_v18 = vpack.c.bf16 %v1508_v62, %v1507_v17  ;;  %v5798_v5 = vld [vmem:[%s8382_s2 + $0x8] sm:$0xff] }
 0xa9a   :  { %v1486_v35 = vpop.f32.mrb[56].mxu0  ;;  %v1527_v14 = vpack.c.bf16 %v1514_v25, %v1513_v63 }
 0xa9b   :  { %v1487_v39 = vadd.f32 %v4599_v6, %v1486_v35  ;;  %v5027_v45 = vpop.f32.mrb[57].mxu0 }
 0xa9c   :  { %v1489_v37 = vpop.f32.mrb[58].mxu0  ;;  %v5801_v45 = vld [vmem:[%s8382_s2 + $0x38] sm:$0xff] }
 0xa9d   :  { %v1490_v41 = vadd.f32 %v4599_v6, %v1489_v37  ;;  %v5028_v38 = vpop.f32.mrb[59].mxu0  ;;  %v1497_v44 = vmul.f32 %v6905_v13, %v1487_v39  ;;  %v1503_v32 = vmul.f32 %v6911_v20, %v1487_v39  ;;  %v1509_v42 = vmul.f32 %v6600_v26, %v1487_v39  ;;  %v6920_v6 = vld [vmem:[%s8381_s3 + $0x28] sm:$0xff] }
 0xa9e   :  { %v1515_v26 = vmul.f32 %v6621_v54, %v1487_v39 }
 0xa9f   :  { %v6915_v47 = vpack.c.bf16 %v1490_v41, %v1487_v39  ;;  %v1498_v57 = vmul.f32 %v6920_v6, %v1490_v41  ;;  %v1504_v7 = vmul.f32 %v6926_v27, %v1490_v41  ;;  %v1510_v29 = vmul.f32 %v6612_v59, %v1490_v41 }
 0xaa0   :  { %v1516_v3 = vmul.f32 %v6633_v33, %v1490_v41 }
 0xaa1   :  { %1539 = vrot.lane.b32.xlu1 %v6915_v47, %s5889_s28  ;;  %v1519_v10 = vpack.c.bf16 %v1498_v57, %v1497_v44  ;;  %v1522_v31 = vpack.c.bf16 %v1504_v7, %v1503_v32  ;;  %v1525_v53 = vpack.c.bf16 %v1510_v29, %v1509_v42  ;;  %v5802_v32 = vld [vmem:[%s8382_s2 + $0x28] sm:$0xff] }
 0xaa2   :  { %v1528_v23 = vpack.c.bf16 %v1516_v3, %v1515_v26  ;;  %v5803_v26 = vld [vmem:[%s8382_s2 + $0x50] sm:$0xff] }
 0xaee   :  { %v1536_v11 = vpop.permute.xlu0 %1535 }
 0xaef   :  { %5300 = vmatprep.subr.msk.bf16.mxu1 %vm133_vm2, %v1536_v11  ;;  %v1578_v16 = vsel %vm133_vm2, %v1536_v11, 0  ;;  %v5805_v11 = vld [vmem:[%s8382_s2 + $0x58] sm:$0xff] }
 0xaf0   :  { %5030 = vmatpush3.bf16.xpose.msra.mxu1 %v1578_v16 }
 0xb0b   :  { %v1538_v61 = vpop.permute.xlu1 %1537 }
 0xb0c   :  { %5301 = vmatprep.subr.msk.bf16.mxu1 %vm133_vm2, %v1538_v61  ;;  %v1581_v59 = vsel %vm133_vm2, %v1538_v61, 0 }
 0xb0d   :  { %5032 = vmatpush3.bf16.xpose.msra.mxu1 %v1581_v59 }
 0xb13   :  { %v1540_v54 = vpop.permute.xlu1 %1539 }
 0xb14   :  { %5302 = vmatprep.subr.msk.bf16.mxu1 %vm133_vm2, %v1540_v54  ;;  %v1584_v33 = vsel %vm133_vm2, %v1540_v54, 0 }
 0xb15   :  { %5034 = vmatpush3.bf16.xpose.msra.mxu1 %v1584_v33  ;;  %v5806_v33 = vld [vmem:[%s8382_s2 + $0x48] sm:$0xff] }
 0xb16   :  { %5089 = vmatprep.subr.bf16.mxu1 %v5887_v0 }
 0xb1c   :  { %5036 = vmatmul.mubr.msk.bf16.vlgmr.msra.gmra.mrb[48].mxu1 %vm133_vm2, %v1518_v22  ;;  %v5799_v22 = vld [vmem:[%s8382_s2 + $0x30] sm:$0xff] }
 0xb1d   :  { %5039 = vmatprep.mubr.msk.bf16.mxu1 %vm133_vm2, %v1519_v10 }
 0xb24   :  { %5040 = vmatmul.mubr.msk.bf16.gmra.mrb[52].mxu1 %vm133_vm2, %v1520_v4 }
 0xb25   :  { %5043 = vmatprep.mubr.msk.bf16.mxu1 %vm133_vm2, %v1521_v24 }
 0xb2c   :  { %5044 = vmatmul.mubr.msk.bf16.gmra.mrb[56].mxu1 %vm133_vm2, %v1522_v31 }
 0xb2d   :  { %5047 = vmatprep.mubr.msk.bf16.mxu1 %vm133_vm2, %v1523_v60  ;;  %v5797_v60 = vld [vmem:[%s8382_s2 + $0x18] sm:$0xff] }
 0xb34   :  { %5048 = vmatmul.mubr.msk.bf16.gmra.mrb[60].mxu1 %vm133_vm2, %v1524_v18 }
 0xb35   :  { %5051 = vmatprep.mubr.msk.bf16.mxu1 %vm133_vm2, %v1525_v53  ;;  %v5804_v53 = vld [vmem:[%s8382_s2 + $0x40] sm:$0xff] }
 0xb3c   :  { %5052 = vmatmul.mubr.msk.bf16.gmra.mrb[64].mxu1 %vm133_vm2, %v1526_v1 }
 0xb3d   :  { %5055 = vmatprep.mubr.msk.bf16.mxu1 %vm133_vm2, %v1527_v14  ;;  %v5800_v14 = vld [vmem:[%s8382_s2 + $0x20] sm:$0xff] }
 0xb44   :  { %5056 = vmatmul.mubr.msk.bf16.gmra.mrb[68].mxu1 %vm133_vm2, %v1528_v23 }
 0xb45   :  { %5093 = vmatprep.mubr.msk.bf16.mxu1 %vm5888_vm1, %v5887_v0 }
 0xbef   :  { %v5037_v30 = vpop.f32.mrb[48].mxu1 }
 0xbf0   :  { %v6966_v19 = vadd.f32 %v5795_v55, %v5037_v30  ;;  %v1620_v58 = vpop.f32.mrb[49].mxu1 }
 0xbf1   :  { %v6971_v36 = vadd.f32 %v5796_v52, %v1620_v58  ;;  %v5038_v4 = vpop.f32.mrb[50].mxu1 }
 0xbf2   :  { %v6976_v1 = vadd.f32 %v5797_v60, %v5038_v4  ;;  %v1623_v21 = vpop.f32.mrb[51].mxu1  ;;  %v1721_v17 = vsel %vm426_vm3, %v6966_v19, -inf  ;;  %v5807_v4 = vld [vmem:[%s8382_s2 + $0x70] sm:$0xff] }
 0xbf3   :  { %1722 = vmax.xlane.f32.xlu0 %v1721_v17  ;;  %v1715_v2 = vsel %vm426_vm3, %v6971_v36, -inf  ;;  %v6985_v62 = vadd.f32 %v5798_v5, %v1623_v21 }
 0xbf4   :  { %1716 = vmax.xlane.f32.xlu1 %v1715_v2  ;;  %v1724_v63 = vsel %vm426_vm3, %v6976_v1, -inf  ;;  %v5808_v2 = vld [vmem:[%s8382_s2 + $0x60] sm:$0xff] }
 0xbf5   :  { %v1718_v38 = vsel %vm426_vm3, %v6985_v62, -inf }
 0xbf7   :  { %1725 = vmax.xlane.f32.xlu0 %v1724_v63  ;;  %v5041_v25 = vpop.f32.mrb[52].mxu1  ;;  %v5809_v63 = vld [vmem:[%s8382_s2 + $0x78] sm:$0xff] }
 0xbf8   :  { %v6992_v24 = vadd.f32 %v5799_v22, %v5041_v25  ;;  %v1636_v18 = vpop.f32.mrb[53].mxu1 }
 0xbf9   :  { %v5042_v35 = vpop.f32.mrb[54].mxu1  ;;  %v6997_v39 = vadd.f32 %v5800_v14, %v1636_v18  ;;  %v5810_v14 = vld [vmem:[%s8382_s2 + $0x68] sm:$0xff] }
 0xbfa   :  { %v7002_v37 = vadd.f32 %v5801_v45, %v5042_v35  ;;  %v1639_v41 = vpop.f32.mrb[55].mxu1  ;;  %v1733_v44 = vsel %vm426_vm3, %v6992_v24, -inf }
 0xbfb   :  { %1719 = vmax.xlane.f32.xlu0 %v1718_v38  ;;  %1734 = vmax.xlane.f32.xlu1 %v1733_v44  ;;  %v7011_v42 = vadd.f32 %v5802_v32, %v1639_v41  ;;  %v1727_v7 = vsel %vm426_vm3, %v6997_v39, -inf  ;;  %v5811_v32 = vld [vmem:[%s8382_s2 + $0x90] sm:$0xff] }
 0xbfc   :  { %v1736_v57 = vsel %vm426_vm3, %v7002_v37, -inf }
 0xbfd   :  { %v1730_v59 = vsel %vm426_vm3, %v7011_v42, -inf }
 0xbff   :  { %v5045_v29 = vpop.f32.mrb[56].mxu1  ;;  %1737 = vmax.xlane.f32.xlu0 %v1736_v57  ;;  %1728 = vmax.xlane.f32.xlu1 %v1727_v7 }
 0xc00   :  { %v7020_v3 = vadd.f32 %v5803_v26, %v5045_v29  ;;  %v1652_v10 = vpop.f32.mrb[57].mxu1  ;;  %v5812_v26 = vld [vmem:[%s8382_s2 + $0x80] sm:$0xff] }
 0xc01   :  { %v5046_v31 = vpop.f32.mrb[58].mxu1  ;;  %v7025_v23 = vadd.f32 %v5804_v53, %v1652_v10 }
 0xc02   :  { %v7030_v16 = vadd.f32 %v5805_v11, %v5046_v31  ;;  %v1655_v61 = vpop.f32.mrb[59].mxu1  ;;  %v1745_v54 = vsel %vm426_vm3, %v7020_v3, -inf  ;;  %v5813_v31 = vld [vmem:[%s8382_s2 + $0x98] sm:$0xff] }
 0xc03   :  { %1731 = vmax.xlane.f32.xlu0 %v1730_v59  ;;  %1746 = vmax.xlane.f32.xlu1 %v1745_v54  ;;  %v7039_v30 = vadd.f32 %v5806_v33, %v1655_v61  ;;  %v1739_v58 = vsel %vm426_vm3, %v7025_v23, -inf  ;;  %v5814_v54 = vld [vmem:[%s8382_s2 + $0x88] sm:$0xff] }
 0xc04   :  { %v1748_v55 = vsel %vm426_vm3, %v7030_v16, -inf }
 0xc05   :  { %v1742_v18 = vsel %vm426_vm3, %v7039_v30, -inf }
 0xc07   :  { %v5049_v52 = vpop.f32.mrb[60].mxu1  ;;  %1749 = vmax.xlane.f32.xlu0 %v1748_v55  ;;  %1740 = vmax.xlane.f32.xlu1 %v1739_v58 }
 0xc08   :  { %v7048_v60 = vadd.f32 %v5807_v4, %v5049_v52  ;;  %v1668_v21 = vpop.f32.mrb[61].mxu1  ;;  %v5815_v4 = vld [vmem:[%s8382_s2 + $0xb0] sm:$0xff] }
 0xc09   :  { %v5050_v17 = vpop.f32.mrb[62].mxu1  ;;  %v7053_v5 = vadd.f32 %v5808_v2, %v1668_v21 }
 0xc0a   :  { %v7058_v25 = vadd.f32 %v5809_v63, %v5050_v17  ;;  %v1671_v22 = vpop.f32.mrb[63].mxu1  ;;  %v1757_v35 = vsel %vm426_vm3, %v7048_v60, -inf  ;;  %v5816_v63 = vld [vmem:[%s8382_s2 + $0xa0] sm:$0xff] }
 0xc0b   :  { %1743 = vmax.xlane.f32.xlu0 %v1742_v18  ;;  %1758 = vmax.xlane.f32.xlu1 %v1757_v35  ;;  %v7067_v45 = vadd.f32 %v5810_v14, %v1671_v22  ;;  %v1751_v38 = vsel %vm426_vm3, %v7053_v5, -inf  ;;  %v5817_v18 = vld [vmem:[%s8382_s2 + $0xb8] sm:$0xff] }
 0xc0c   :  { %v1760_v41 = vsel %vm426_vm3, %v7058_v25, -inf }
 0xc0d   :  { %v1754_v61 = vsel %vm426_vm3, %v7067_v45, -inf }
 0xc0f   :  { %v5053_v44 = vpop.f32.mrb[64].mxu1  ;;  %1761 = vmax.xlane.f32.xlu0 %v1760_v41  ;;  %1752 = vmax.xlane.f32.xlu1 %v1751_v38 }
 0xc10   :  { %v7076_v57 = vadd.f32 %v5811_v32, %v5053_v44  ;;  %v1684_v7 = vpop.f32.mrb[65].mxu1  ;;  %v5818_v44 = vld [vmem:[%s8382_s2 + $0xa8] sm:$0xff] }
 0xc11   :  { %v5054_v29 = vpop.f32.mrb[66].mxu1  ;;  %v7081_v10 = vadd.f32 %v5812_v26, %v1684_v7 }
 0xc12   :  { %v7086_v53 = vadd.f32 %v5813_v31, %v5054_v29  ;;  %v1687_v11 = vpop.f32.mrb[67].mxu1  ;;  %v1769_v59 = vsel %vm426_vm3, %v7076_v57, -inf }
 0xc13   :  { %1755 = vmax.xlane.f32.xlu0 %v1754_v61  ;;  %1770 = vmax.xlane.f32.xlu1 %v1769_v59  ;;  %v7095_v33 = vadd.f32 %v5814_v54, %v1687_v11  ;;  %v1763_v58 = vsel %vm426_vm3, %v7081_v10, -inf }
 0xc14   :  { %v1772_v55 = vsel %vm426_vm3, %v7086_v53, -inf }
 0xc15   :  { %v1766_v41 = vsel %vm426_vm3, %v7095_v33, -inf }
 0xc17   :  { %v5057_v52 = vpop.f32.mrb[68].mxu1  ;;  %1773 = vmax.xlane.f32.xlu0 %v1772_v55  ;;  %1764 = vmax.xlane.f32.xlu1 %v1763_v58 }
 0xc18   :  { %v7104_v21 = vadd.f32 %v5815_v4, %v5057_v52  ;;  %v1700_v17 = vpop.f32.mrb[69].mxu1 }
 0xc19   :  { %v5058_v2 = vpop.f32.mrb[70].mxu1  ;;  %v7109_v22 = vadd.f32 %v5816_v63, %v1700_v17 }
 0xc1a   :  { %v7114_v35 = vadd.f32 %v5817_v18, %v5058_v2  ;;  %v1703_v14 = vpop.f32.mrb[71].mxu1  ;;  %v1781_v38 = vsel %vm426_vm3, %v7104_v21, -inf }
 0xc1b   :  { %1767 = vmax.xlane.f32.xlu0 %v1766_v41  ;;  %1782 = vmax.xlane.f32.xlu1 %v1781_v38  ;;  %v7123_v32 = vadd.f32 %v5818_v44, %v1703_v14  ;;  %v1775_v29 = vsel %vm426_vm3, %v7109_v22, -inf }
 0xc1c   :  { %v1784_v7 = vsel %vm426_vm3, %v7114_v35, -inf }
 0xc1d   :  { %v1778_v26 = vsel %vm426_vm3, %v7123_v32, -inf }
 0xc1f   :  { %1785 = vmax.xlane.f32.xlu0 %v1784_v7  ;;  %1776 = vmax.xlane.f32.xlu1 %v1775_v29 }
 0xc23   :  { %1779 = vmax.xlane.f32.xlu0 %v1778_v26 }
 0xc30   :  { %1991 = vrot.lane.b32.xlu1 %v6866_v43, %s5890_s4 }
 0xc39   :  { %1993 = vrot.lane.b32.xlu0 %v6894_v8, %s5890_s4 }
 0xc80   :  { %v1723_v31 = vpop.xlane.xlu0 %1722 }
 0xc81   :  { %v1789_v11 = vsub.f32 %v6966_v19, %v1723_v31  ;;  %v1717_v61 = vpop.xlane.xlu1 %1716 }
 0xc82   :  { %v1787_v59 = vsub.f32 %v6971_v36, %v1717_v61 }
 0xc83   :  { %v1815_v54 = vmul.f32 1.442695, %v1789_v11 }
 0xc84   :  { %v1811_v55 = vmul.f32 1.442695, %v1787_v59  ;;  %v1726_v58 = vpop.xlane.xlu0 %1725 }
 0xc85   :  { %5461 = vpow2.f32 %v1815_v54  ;;  %v1790_v52 = vsub.f32 %v6976_v1, %v1726_v58 }
 0xc86   :  { %5463 = vpow2.f32 %v1811_v55 }
 0xc87   :  { %v1817_v4 = vmul.f32 1.442695, %v1790_v52 }
 0xc88   :  { %v1720_v17 = vpop.xlane.xlu0 %1719  ;;  %v1735_v2 = vpop.xlane.xlu1 %1734 }
 0xc89   :  { %5465 = vpow2.f32 %v1817_v4  ;;  %v1788_v43 = vsub.f32 %v6985_v62, %v1720_v17  ;;  %v1793_v8 = vsub.f32 %v6992_v24, %v1735_v2 }
 0xc8b   :  { %v1813_v63 = vmul.f32 1.442695, %v1788_v43  ;;  %v1823_v19 = vmul.f32 1.442695, %v1793_v8 }
 0xc8c   :  { %v1738_v18 = vpop.xlane.xlu0 %1737  ;;  %v1729_v14 = vpop.xlane.xlu1 %1728 }
 0xc8d   :  { %5467 = vpow2.f32 %v1813_v63  ;;  %v1794_v36 = vsub.f32 %v7002_v37, %v1738_v18  ;;  %v1791_v41 = vsub.f32 %v6997_v39, %v1729_v14 }
 0xc8e   :  { %5469 = vpow2.f32 %v1823_v19 }
 0xc8f   :  { %v7142_v1 = vpop.eup %5461  ;;  %v1825_v38 = vmul.f32 1.442695, %v1794_v36  ;;  %v1819_v44 = vmul.f32 1.442695, %v1791_v41 }
 0xc90   :  { %v1732_v7 = vpop.xlane.xlu0 %1731  ;;  %v1747_v29 = vpop.xlane.xlu1 %1746  ;;  %v1865_v62 = vsel %vm426_vm3, %v7142_v1, 0.0 }
 0xc91   :  { %v7146_v24 = vpop.eup %5463  ;;  %5471 = vpow2.f32 %v1825_v38  ;;  %v1792_v26 = vsub.f32 %v7011_v42, %v1732_v7  ;;  %v1797_v31 = vsub.f32 %v7020_v3, %v1747_v29  ;;  %1866 = vadd.xlane.f32.xlu1 %v1865_v62 }
 0xc92   :  { %5473 = vpow2.f32 %v1819_v44  ;;  %v1859_v55 = vsel %vm426_vm3, %v7146_v24, 0.0 }
 0xc93   :  { %v7150_v39 = vpop.eup %5465  ;;  %v1821_v37 = vmul.f32 1.442695, %v1792_v26  ;;  %v1831_v11 = vmul.f32 1.442695, %v1797_v31 }
 0xc94   :  { %v1750_v61 = vpop.xlane.xlu0 %1749  ;;  %v1741_v59 = vpop.xlane.xlu1 %1740  ;;  %v1868_v54 = vsel %vm426_vm3, %v7150_v39, 0.0 }
 0xc95   :  { %5475 = vpow2.f32 %v1821_v37  ;;  %v1798_v58 = vsub.f32 %v7030_v16, %v1750_v61  ;;  %v1795_v42 = vsub.f32 %v7025_v23, %v1741_v59  ;;  %1869 = vadd.xlane.f32.xlu0 %v1868_v54  ;;  %1860 = vadd.xlane.f32.xlu1 %v1859_v55 }
 0xc96   :  { %5477 = vpow2.f32 %v1831_v11 }
 0xc97   :  { %v7158_v3 = vpop.eup %5467  ;;  %v1833_v52 = vmul.f32 1.442695, %v1798_v58  ;;  %v1827_v4 = vmul.f32 1.442695, %v1795_v42 }
 0xc98   :  { %v7160_v17 = vpop.eup %5469  ;;  %v1744_v2 = vpop.xlane.xlu0 %1743  ;;  %v1862_v8 = vsel %vm426_vm3, %v7158_v3, 0.0 }
 0xc99   :  { %v1759_v43 = vpop.xlane.xlu1 %1758  ;;  %5479 = vpow2.f32 %v1833_v52  ;;  %v1796_v63 = vsub.f32 %v7039_v30, %v1744_v2  ;;  %1863 = vadd.xlane.f32.xlu0 %v1862_v8  ;;  %v1877_v23 = vsel %vm426_vm3, %v7160_v17, 0.0 }
 0xc9a   :  { %v1801_v16 = vsub.f32 %v7048_v60, %v1759_v43  ;;  %5481 = vpow2.f32 %v1827_v4  ;;  %1878 = vadd.xlane.f32.xlu1 %v1877_v23 }
 0xc9b   :  { %v7168_v19 = vpop.eup %5471  ;;  %v1829_v18 = vmul.f32 1.442695, %v1796_v63 }
 0xc9c   :  { %v1839_v14 = vmul.f32 1.442695, %v1801_v16  ;;  %v7170_v36 = vpop.eup %5473  ;;  %v1762_v41 = vpop.xlane.xlu0 %1761  ;;  %v1880_v44 = vsel %vm426_vm3, %v7168_v19, 0.0 }
 0xc9d   :  { %v1753_v38 = vpop.xlane.xlu1 %1752  ;;  %5483 = vpow2.f32 %v1829_v18  ;;  %v1802_v30 = vsub.f32 %v7058_v25, %v1762_v41  ;;  %1881 = vadd.xlane.f32.xlu0 %v1880_v44  ;;  %v1871_v7 = vsel %vm426_vm3, %v7170_v36, 0.0 }
 0xc9e   :  { %v1799_v60 = vsub.f32 %v7053_v5, %v1753_v38  ;;  %5485 = vpow2.f32 %v1839_v14  ;;  %1872 = vadd.xlane.f32.xlu1 %v1871_v7 }
 0xc9f   :  { %v7178_v29 = vpop.eup %5475  ;;  %v1841_v62 = vmul.f32 1.442695, %v1802_v30 }
 0xca0   :  { %v1835_v26 = vmul.f32 1.442695, %v1799_v60  ;;  %v7180_v31 = vpop.eup %5477  ;;  %v1756_v37 = vpop.xlane.xlu0 %1755  ;;  %v1874_v61 = vsel %vm426_vm3, %v7178_v29, 0.0 }
 0xca1   :  { %v1771_v11 = vpop.xlane.xlu1 %1770  ;;  %5487 = vpow2.f32 %v1841_v62  ;;  %v1800_v5 = vsub.f32 %v7067_v45, %v1756_v37  ;;  %1875 = vadd.xlane.f32.xlu0 %v1874_v61  ;;  %v1889_v59 = vsel %vm426_vm3, %v7180_v31, 0.0 }
 0xca2   :  { %v1805_v25 = vsub.f32 %v7076_v57, %v1771_v11  ;;  %5489 = vpow2.f32 %v1835_v26  ;;  %1890 = vadd.xlane.f32.xlu1 %v1889_v59 }
 0xca3   :  { %v7188_v54 = vpop.eup %5479  ;;  %v1837_v55 = vmul.f32 1.442695, %v1800_v5 }
 0xca4   :  { %v1847_v58 = vmul.f32 1.442695, %v1805_v25  ;;  %v7190_v42 = vpop.eup %5481  ;;  %v1774_v52 = vpop.xlane.xlu0 %1773  ;;  %v1892_v2 = vsel %vm426_vm3, %v7188_v54, 0.0 }
 0xca5   :  { %v1765_v4 = vpop.xlane.xlu1 %1764  ;;  %5491 = vpow2.f32 %v1837_v55  ;;  %1893 = vadd.xlane.f32.xlu0 %v1892_v2  ;;  %v1883_v57 = vsel %vm426_vm3, %v7190_v42, 0.0  ;;  %v1806_v8 = vsub.f32 %v7086_v53, %v1774_v52 }
 0xca6   :  { %v1803_v45 = vsub.f32 %v7081_v10, %v1765_v4  ;;  %1884 = vadd.xlane.f32.xlu1 %v1883_v57  ;;  %5493 = vpow2.f32 %v1847_v58 }
 0xca7   :  { %v7197_v43 = vpop.eup %5483  ;;  %v1849_v38 = vmul.f32 1.442695, %v1806_v8 }
 0xca8   :  { %v1843_v63 = vmul.f32 1.442695, %v1803_v45  ;;  %v7200_v16 = vpop.eup %5485  ;;  %v1768_v23 = vpop.xlane.xlu0 %1767  ;;  %v1886_v14 = vsel %vm426_vm3, %v7197_v43, 0.0 }
 0xca9   :  { %v1783_v18 = vpop.xlane.xlu1 %1782  ;;  %1887 = vadd.xlane.f32.xlu0 %v1886_v14  ;;  %v1901_v10 = vsel %vm426_vm3, %v7200_v16, 0.0  ;;  %v1804_v44 = vsub.f32 %v7095_v33, %v1768_v23 }
 0xcaa   :  { %1902 = vadd.xlane.f32.xlu1 %v1901_v10  ;;  %5495 = vpow2.f32 %v1843_v63  ;;  %v1809_v11 = vsub.f32 %v7104_v21, %v1783_v18 }
 0xcab   :  { %v7206_v41 = vpop.eup %5487  ;;  %5497 = vpow2.f32 %v1849_v38  ;;  %v1845_v37 = vmul.f32 1.442695, %v1804_v44 }
 0xcac   :  { %v7209_v53 = vpop.eup %5489  ;;  %v1786_v30 = vpop.xlane.xlu0 %1785  ;;  %v1904_v7 = vsel %vm426_vm3, %v7206_v41, 0.0  ;;  %v1855_v59 = vmul.f32 1.442695, %v1809_v11 }
 0xcad   :  { %v1777_v60 = vpop.xlane.xlu1 %1776  ;;  %1905 = vadd.xlane.f32.xlu0 %v1904_v7  ;;  %v1895_v62 = vsel %vm426_vm3, %v7209_v53, 0.0  ;;  %5499 = vpow2.f32 %v1845_v37  ;;  %v1810_v21 = vsub.f32 %v7114_v35, %v1786_v30 }
 0xcae   :  { %1896 = vadd.xlane.f32.xlu1 %v1895_v62  ;;  %5501 = vpow2.f32 %v1855_v59  ;;  %v1807_v44 = vsub.f32 %v7109_v22, %v1777_v60 }
 0xcaf   :  { %v7215_v26 = vpop.eup %5491 }
 0xcb0   :  { %v1780_v61 = vpop.xlane.xlu0 %1779  ;;  %v1898_v5 = vsel %vm426_vm3, %v7215_v26, 0.0  ;;  %v7220_v25 = vpop.eup %5493  ;;  %v1851_v30 = vmul.f32 1.442695, %v1807_v44 }
 0xcb1   :  { %v1992_v33 = vpop.permute.xlu1 %1991  ;;  %1899 = vadd.xlane.f32.xlu0 %v1898_v5  ;;  %v1808_v55 = vsub.f32 %v7123_v32, %v1780_v61  ;;  %v1913_v52 = vsel %vm426_vm3, %v7220_v25, 0.0  ;;  %v1857_v32 = vmul.f32 1.442695, %v1810_v21 }
 0xcb2   :  { %5059 = vmatprep.subr.bf16.mxu0 %v1992_v33 }
 0xcb3   :  { %5060 = vmatpush3.bf16.msra.mxu0 %v1992_v33  ;;  %v1853_v2 = vmul.f32 1.442695, %v1808_v55 }
 0xcb4   :  { %v1994_v58 = vpop.permute.xlu0 %1993  ;;  %v7225_v4 = vpop.eup %5495 }
 0xcb5   :  { %1914 = vadd.xlane.f32.xlu0 %v1913_v52  ;;  %5061 = vmatprep.subr.bf16.mxu0 %v1994_v58  ;;  %v1907_v45 = vsel %vm426_vm3, %v7225_v4, 0.0  ;;  %v7230_v57 = vpop.eup %5497  ;;  %5503 = vpow2.f32 %v1853_v2 }
 0xcb6   :  { %v1916_v8 = vsel %vm426_vm3, %v7230_v57, 0.0  ;;  %5505 = vpow2.f32 %v1857_v32 }
 0xcb7   :  { %5062 = vmatpush3.bf16.msra.mxu0 %v1994_v58  ;;  %v7234_v63 = vpop.eup %5499  ;;  %5507 = vpow2.f32 %v1851_v30 }
 0xcb8   :  { %v1910_v35 = vsel %vm426_vm3, %v7234_v63, 0.0  ;;  %v7240_v23 = vpop.eup %5501 }
 0xcb9   :  { %1908 = vadd.xlane.f32.xlu0 %v1907_v45  ;;  %v1925_v18 = vsel %vm426_vm3, %v7240_v23, 0.0 }
 0xcbd   :  { %1917 = vadd.xlane.f32.xlu0 %v1916_v8 }
 0xcbf   :  { %1995 = vrot.lane.b32.xlu1 %v6915_v47, %s5890_s4  ;;  %v7244_v14 = vpop.eup %5503 }
 0xcc0   :  { %v1922_v10 = vsel %vm426_vm3, %v7244_v14, 0.0  ;;  %v7248_v38 = vpop.eup %5505 }
 0xcc1   :  { %1911 = vadd.xlane.f32.xlu0 %v1910_v35  ;;  %v1928_v47 = vsel %vm426_vm3, %v7248_v38, 0.0  ;;  %v7253_v7 = vpop.eup %5507 }
 0xcc2   :  { %v1919_v62 = vsel %vm426_vm3, %v7253_v7, 0.0 }
 0xcc5   :  { %1926 = vadd.xlane.f32.xlu0 %v1925_v18 }
 0xcc9   :  { %1923 = vadd.xlane.f32.xlu0 %v1922_v10 }
 0xccd   :  { %1929 = vadd.xlane.f32.xlu0 %v1928_v47 }
 0xce3   :  { %1920 = vadd.xlane.f32.xlu1 %v1919_v62 }
 0xd1e   :  { %v1867_v37 = vpop.xlane.xlu1 %1866 }
 0xd22   :  { %v1870_v11 = vpop.xlane.xlu0 %1869  ;;  %v1861_v61 = vpop.xlane.xlu1 %1860 }
 0xd23   :  { %5509 = vrcp.f32 %v1861_v61 }
 0xd26   :  { %v1864_v33 = vpop.xlane.xlu0 %1863 }
 0xd27   :  { %5511 = vrcp.f32 %v1864_v33  ;;  %v1879_v5 = vpop.xlane.xlu1 %1878 }
 0xd28   :  { %5513 = vrcp.f32 %v1870_v11 }
 0xd2a   :  { %v1882_v59 = vpop.xlane.xlu0 %1881 }
 0xd2b   :  { %v1873_v55 = vpop.xlane.xlu1 %1872 }
 0xd2d   :  { %v5510_v22 = vpop.eup %5509 }
 0xd2e   :  { %v1876_v58 = vpop.xlane.xlu0 %1875  ;;  %v1955_v2 = vmul.f32 %v5510_v22, %v7146_v24 }
 0xd2f   :  { %v1891_v60 = vpop.xlane.xlu1 %1890  ;;  %5515 = vrcp.f32 %v1876_v58 }
 0xd30   :  { %5517 = vrcp.f32 %v1867_v37 }
 0xd31   :  { %v5512_v52 = vpop.eup %5511  ;;  %5519 = vrcp.f32 %v1873_v55 }
 0xd32   :  { %v1894_v21 = vpop.xlane.xlu0 %1893  ;;  %v1956_v45 = vmul.f32 %v5512_v52, %v7158_v3  ;;  %5521 = vrcp.f32 %v1882_v59  ;;  %v5514_v47 = vpop.eup %5513 }
 0xd33   :  { %v1885_v32 = vpop.xlane.xlu1 %1884  ;;  %v1958_v3 = vmul.f32 %v5514_v47, %v7150_v39 }
 0xd34   :  { %v1979_v8 = vpack.c.bf16 %v1956_v45, %v1955_v2 }
 0xd36   :  { %v1888_v35 = vpop.xlane.xlu0 %1887  ;;  %5065 = vmatprep.mubr.msk.bf16.mxu0 %vm426_vm3, %v1979_v8 }
 0xd37   :  { %v1903_v18 = vpop.xlane.xlu1 %1902  ;;  %5523 = vrcp.f32 %v1888_v35 }
 0xd38   :  { %5525 = vrcp.f32 %v1879_v5 }
 0xd39   :  { %v5516_v30 = vpop.eup %5515  ;;  %5527 = vrcp.f32 %v1885_v32 }
 0xd3a   :  { %v1906_v10 = vpop.xlane.xlu0 %1905  ;;  %v5518_v62 = vpop.eup %5517  ;;  %v1960_v61 = vmul.f32 %v5516_v30, %v7178_v29  ;;  %5529 = vrcp.f32 %v1894_v21 }
 0xd3b   :  { %v1897_v44 = vpop.xlane.xlu1 %1896  ;;  %v5520_v24 = vpop.eup %5519  ;;  %v1957_v33 = vmul.f32 %v5518_v62, %v7142_v1 }
 0xd3c   :  { %v1959_v59 = vmul.f32 %v5520_v24, %v7170_v36  ;;  %v5522_v58 = vpop.eup %5521 }
 0xd3d   :  { %v1980_v55 = vpack.c.bf16 %v1958_v3, %v1957_v33  ;;  %v1962_v21 = vmul.f32 %v5522_v58, %v7168_v19 }
 0xd3e   :  { %v1900_v37 = vpop.xlane.xlu0 %1899  ;;  %v1981_v22 = vpack.c.bf16 %v1960_v61, %v1959_v59 }
 0xd3f   :  { %v1996_v11 = vpop.permute.xlu1 %1995  ;;  %5531 = vrcp.f32 %v1900_v37 }
 0xd40   :  { %5063 = vmatprep.subr.bf16.mxu0 %v1996_v11  ;;  %5533 = vrcp.f32 %v1891_v60 }
 0xd41   :  { %5064 = vmatpush3.bf16.msra.mxu0 %v1996_v11  ;;  %v5524_v39 = vpop.eup %5523  ;;  %5535 = vrcp.f32 %v1897_v44 }
 0xd42   :  { %v1915_v5 = vpop.xlane.xlu0 %1914  ;;  %5105 = vmatprep.subr.bf16.mxu0 %v5887_v0  ;;  %v5526_v29 = vpop.eup %5525  ;;  %v1964_v36 = vmul.f32 %v5524_v39, %v7197_v43  ;;  %5537 = vrcp.f32 %v1906_v10 }
 0xd43   :  { %v5528_v1 = vpop.eup %5527  ;;  %v1961_v2 = vmul.f32 %v5526_v29, %v7160_v17  ;;  %5539 = vrcp.f32 %v1903_v18 }
 0xd44   :  { %5066 = vmatmul.mubr.msk.bf16.vlgmr.msra.gmra.mrb[60].mxu0 %vm426_vm3, %v1980_v55  ;;  %v1963_v45 = vmul.f32 %v5528_v1, %v7190_v42  ;;  %v5530_v8 = vpop.eup %5529 }
 0xd45   :  { %5069 = vmatprep.mubr.msk.bf16.mxu0 %vm426_vm3, %v1981_v22  ;;  %v1982_v32 = vpack.c.bf16 %v1962_v21, %v1961_v2  ;;  %v1966_v43 = vmul.f32 %v5530_v8, %v7188_v54 }
 0xd46   :  { %v1909_v52 = vpop.xlane.xlu0 %1908  ;;  %v1983_v35 = vpack.c.bf16 %v1964_v36, %v1963_v45 }
 0xd47   :  { %5541 = vrcp.f32 %v1909_v52 }
 0xd49   :  { %v5532_v47 = vpop.eup %5531 }
 0xd4a   :  { %v1918_v60 = vpop.xlane.xlu0 %1917  ;;  %v5534_v44 = vpop.eup %5533  ;;  %v1968_v17 = vmul.f32 %v5532_v47, %v7215_v26  ;;  %v7308_v47 = vld [vmem:[%s8381_s3] sm:$0xff] }
 0xd4b   :  { %v5536_v19 = vpop.eup %5535  ;;  %v1965_v42 = vmul.f32 %v5534_v44, %v7180_v31 }
 0xd4c   :  { %5070 = vmatmul.mubr.msk.bf16.gmra.mrb[64].mxu0 %vm426_vm3, %v1982_v32  ;;  %v1967_v18 = vmul.f32 %v5536_v19, %v7209_v53  ;;  %v5538_v62 = vpop.eup %5537  ;;  %v7314_v19 = vld [vmem:[%s8381_s3 + $0x30] sm:$0xff] }
 0xd4d   :  { %5073 = vmatprep.mubr.msk.bf16.mxu0 %vm426_vm3, %v1983_v35  ;;  %v1984_v10 = vpack.c.bf16 %v1966_v43, %v1965_v42  ;;  %v5540_v3 = vpop.eup %5539  ;;  %v1970_v37 = vmul.f32 %v5538_v62, %v7206_v41  ;;  %v7320_v42 = vld [vmem:[%s8381_s3 + $0x8] sm:$0xff]  ;;  %v7326_v62 = vld [vmem:[%s8381_s3 + $0x38] sm:$0xff] }
 0xd4e   :  { %v1912_v30 = vpop.xlane.xlu0 %1911  ;;  %v1985_v24 = vpack.c.bf16 %v1968_v17, %v1967_v18  ;;  %v1969_v11 = vmul.f32 %v5540_v3, %v7200_v16 }
 0xd4f   :  { %5543 = vrcp.f32 %v1912_v30 }
 0xd50   :  { %5545 = vrcp.f32 %v1918_v60  ;;  %v1986_v61 = vpack.c.bf16 %v1970_v37, %v1969_v11  ;;  %v5327_v60 = vld [vmem:[%s8383_s6 + $0xc] sm:$0xff]  }
 0xd51   :  { %5547 = vrcp.f32 %v1915_v5  ;;  %v5542_v54 = vpop.eup %5541  ;;  %5090 = vmatpush3.bf16.msra.mxu1 %v5327_v60 }
 0xd52   :  { %v1971_v31 = vmul.f32 %v5542_v54, %v7225_v4  ;;  %v1927_v58 = vpop.xlane.xlu0 %1926  ;;  %5091 = vmatprep.subr.bf16.mxu1 %v5887_v0 }
 0xd54   :  { %5074 = vmatmul.mubr.msk.bf16.gmra.mrb[68].mxu0 %vm426_vm3, %v1984_v10 }
 0xd55   :  { %5077 = vmatprep.mubr.msk.bf16.mxu0 %vm426_vm3, %v1985_v24 }
 0xd56   :  { %v1924_v16 = vpop.xlane.xlu0 %1923 }
 0xd59   :  { %v5544_v26 = vpop.eup %5543 }
 0xd5a   :  { %v1972_v53 = vmul.f32 %v5544_v26, %v7234_v63  ;;  %v5546_v33 = vpop.eup %5545  ;;  %v1930_v39 = vpop.xlane.xlu0 %1929 }
 0xd5b   :  { %v5548_v55 = vpop.eup %5547  ;;  %v1974_v5 = vmul.f32 %v5546_v33, %v7230_v57  ;;  %5549 = vrcp.f32 %v1930_v39  ;;  %v7340_v33 = vld [vmem:[%s8381_s3 + $0x40] sm:$0xff]  ;;  %v7354_v39 = vld [vmem:[%s8381_s3 + $0x48] sm:$0xff] }
 0xd5c   :  { %5078 = vmatmul.mubr.msk.bf16.gmra.mrb[72].mxu0 %vm426_vm3, %v1986_v61  ;;  %v1987_v59 = vpack.c.bf16 %v1972_v53, %v1971_v31  ;;  %v1973_v41 = vmul.f32 %v5548_v55, %v7220_v25  ;;  %5551 = vrcp.f32 %v1924_v16  ;;  %v7334_v31 = vld [vmem:[%s8381_s3 + $0x10] sm:$0xff] }
 0xd5d   :  { %5553 = vrcp.f32 %v1927_v58 }
 0xd5e   :  { %5081 = vmatprep.mubr.msk.bf16.mxu0 %vm426_vm3, %v1987_v59  ;;  %v1988_v22 = vpack.c.bf16 %v1974_v5, %v1973_v41  ;;  %v7348_v41 = vld [vmem:[%s8381_s3 + $0x18] sm:$0xff] }
 0xd64   :  { %5082 = vmatmul.mubr.msk.bf16.gmra.mrb[76].mxu0 %vm426_vm3, %v1988_v22 }
 0xd65   :  { %v5550_v63 = vpop.eup %5549 }
 0xd66   :  { %v5552_v29 = vpop.eup %5551  ;;  %v1978_v21 = vmul.f32 %v5550_v63, %v7248_v38 }
 0xd67   :  { %v5554_v1 = vpop.eup %5553  ;;  %v1976_v25 = vmul.f32 %v5552_v29, %v7244_v14 }
 0xd68   :  { %v1977_v36 = vmul.f32 %v5554_v1, %v7240_v23  ;;  %v5328_v23 = vld [vmem:[%s8383_s6 + $0x14] ss:$0 sps:$4 sm:$0x33]  }
 0xd69   :  { %v2237_v14 = vsel %vm143_vm0, %v5328_v23, 0 }
 0xd6a   :  { %v1990_v45 = vpack.c.bf16 %v1978_v21, %v1977_v36  ;;  %5092 = vmatpush3.bf16.msra.mxu1 %v2237_v14  ;;  %v7366_v21 = vld [vmem:[%s8381_s3 + $0x60] sm:$0xff]  ;;  %v7378_v14 = vld [vmem:[%s8381_s3 + $0x68] sm:$0xff] }
 0xd6b   :  { %5121 = vmatprep.subr.bf16.mxu1 %v5887_v0 }
 0xd70   :  { %v1921_v4 = vpop.xlane.xlu1 %1920 }
 0xd71   :  { %5555 = vrcp.f32 %v1921_v4 }
 0xd7b   :  { %v5556_v52 = vpop.eup %5555 }
 0xd7c   :  { %v1975_v57 = vmul.f32 %v5556_v52, %v7253_v7 }
 0xd7e   :  { %v1989_v2 = vpack.c.bf16 %v1976_v25, %v1975_v57 }
 0xd80   :  { %5085 = vmatprep.mubr.msk.bf16.mxu0 %vm426_vm3, %v1989_v2  ;;  %v7372_v2 = vld [vmem:[%s8381_s3 + $0x78] sm:$0xff] }
 0xd81   :  { %5086 = vmatmul.mubr.msk.bf16.gmra.mrb[80].mxu0 %vm426_vm3, %v1990_v45 }
 0xd82   :  { %5109 = vmatprep.mubr.msk.bf16.mxu0 %vm5888_vm1, %v5887_v0 }
 0xe17   :  { %v5067_v38 = vpop.f32.mrb[60].mxu0 }
 0xe18   :  { %v2070_v7 = vpop.f32.mrb[61].mxu0  ;;  %v2167_v53 = vmul.f32 %v7334_v31, %v5067_v38 }
 0xe19   :  { %v5068_v32 = vpop.f32.mrb[62].mxu0  ;;  %v2165_v44 = vmul.f32 %v7308_v47, %v2070_v7 }
 0xe1a   :  { %v2073_v8 = vpop.f32.mrb[63].mxu0  ;;  %v2168_v22 = vmul.f32 %v7348_v41, %v5068_v32 }
 0xe1b   :  { %v2166_v18 = vmul.f32 %v7320_v42, %v2073_v8 }
 0xe1f   :  { %v5071_v35 = vpop.f32.mrb[64].mxu0 }
 0xe20   :  { %v2171_v30 = vmul.f32 %v7314_v19, %v5071_v35  ;;  %v2086_v43 = vpop.f32.mrb[65].mxu0  ;;  %v7384_v35 = vld [vmem:[%s8381_s3 + $0x90] sm:$0xff] }
 0xe21   :  { %v5072_v17 = vpop.f32.mrb[66].mxu0  ;;  %v2169_v11 = vmul.f32 %v6905_v13, %v2086_v43  ;;  %v7390_v43 = vld [vmem:[%s8381_s3 + $0x80] sm:$0xff] }
 0xe22   :  { %v2189_v10 = vadd.f32 %v2171_v30, %v2165_v44  ;;  %v2172_v24 = vmul.f32 %v7326_v62, %v5072_v17  ;;  %v2089_v3 = vpop.f32.mrb[67].mxu0 }
 0xe23   :  { %v2170_v13 = vmul.f32 %v6920_v6, %v2089_v3 }
 0xe24   :  { %v2190_v37 = vadd.f32 %v2172_v24, %v2166_v18  ;;  %v7396_v24 = vld [vmem:[%s8381_s3 + $0x98] sm:$0xff] }
 0xe27   :  { %v5075_v54 = vpop.f32.mrb[68].mxu0 }
 0xe28   :  { %v2175_v26 = vmul.f32 %v6911_v20, %v5075_v54  ;;  %v2102_v61 = vpop.f32.mrb[69].mxu0 }
 0xe29   :  { %v2173_v59 = vmul.f32 %v7340_v33, %v2102_v61  ;;  %v5076_v55 = vpop.f32.mrb[70].mxu0 }
 0xe2a   :  { %v2193_v5 = vadd.f32 %v2175_v26, %v2169_v11  ;;  %v2176_v20 = vmul.f32 %v6926_v27, %v5076_v55  ;;  %v2105_v58 = vpop.f32.mrb[71].mxu0  ;;  %v7360_v27 = vld [vmem:[%s8381_s3 + $0x70] sm:$0xff]  ;;  %v7402_v11 = vld [vmem:[%s8381_s3 + $0x88] sm:$0xff] }
 0xe2b   :  { %v2191_v16 = vadd.f32 %v2173_v59, %v2167_v53  ;;  %v2174_v4 = vmul.f32 %v7354_v39, %v2105_v58  ;;  %v7417_v58 = vld [vmem:[%s8381_s3 + $0xa0] sm:$0xff] }
 0xe2c   :  { %v2194_v6 = vadd.f32 %v2176_v20, %v2170_v13  ;;  %v7411_v13 = vld [vmem:[%s8381_s3 + $0xb0] sm:$0xff] }
 0xe2d   :  { %v2192_v63 = vadd.f32 %v2174_v4, %v2168_v22 }
 0xe2f   :  { %v5079_v29 = vpop.f32.mrb[72].mxu0 }
 0xe30   :  { %v2179_v1 = vmul.f32 %v7360_v27, %v5079_v29  ;;  %v2118_v52 = vpop.f32.mrb[73].mxu0 }
 0xe31   :  { %v2177_v57 = vmul.f32 %v7366_v21, %v2118_v52  ;;  %v5080_v25 = vpop.f32.mrb[74].mxu0  ;;  %v7429_v52 = vld [vmem:[%s8381_s3 + $0xa8] sm:$0xff] }
 0xe32   :  { %v2197_v36 = vadd.f32 %v2191_v16, %v2179_v1  ;;  %v2180_v45 = vmul.f32 %v7372_v2, %v5080_v25  ;;  %v2121_v60 = vpop.f32.mrb[75].mxu0 }
 0xe33   :  { %v2195_v23 = vadd.f32 %v2189_v10, %v2177_v57  ;;  %v2178_v38 = vmul.f32 %v7378_v14, %v2121_v60 }
 0xe34   :  { %v2198_v7 = vadd.f32 %v2192_v63, %v2180_v45 }
 0xe35   :  { %v2196_v32 = vadd.f32 %v2190_v37, %v2178_v38 }
 0xe37   :  { %v5083_v8 = vpop.f32.mrb[76].mxu0 }
 0xe38   :  { %v2183_v44 = vmul.f32 %v7384_v35, %v5083_v8  ;;  %v2134_v30 = vpop.f32.mrb[77].mxu0 }
 0xe39   :  { %v2181_v17 = vmul.f32 %v7390_v43, %v2134_v30  ;;  %v5084_v18 = vpop.f32.mrb[78].mxu0 }
 0xe3a   :  { %v2201_v10 = vadd.f32 %v2195_v23, %v2183_v44  ;;  %v2184_v3 = vmul.f32 %v7396_v24, %v5084_v18  ;;  %v2137_v37 = vpop.f32.mrb[79].mxu0 }
 0xe3b   :  { %v2199_v54 = vadd.f32 %v2193_v5, %v2181_v17  ;;  %v2182_v26 = vmul.f32 %v7402_v11, %v2137_v37 }
 0xe3c   :  { %v2202_v61 = vadd.f32 %v2196_v32, %v2184_v3 }
 0xe3d   :  { %v2200_v53 = vadd.f32 %v2194_v6, %v2182_v26  ;;  %v7423_v6 = vld [vmem:[%s8381_s3 + $0xb8] sm:$0xff] }
 0xe3e   :  { %v2211_v59 = vpack.c.bf16 %v2202_v61, %v2201_v10 }
 0xe40   :  { %5094 = vmatmul.mubr.msk.bf16.vlgmr.msra.gmra.mrb[72].mxu1 %vm133_vm2, %v2211_v59 }
 0xe41   :  { %5097 = vmatprep.mubr.msk.bf16.mxu1 %vm5888_vm1, %v5887_v0 }
 0xe54   :  { %v5087_v55 = vpop.f32.mrb[80].mxu0 }
 0xe55   :  { %v2187_v5 = vmul.f32 %v7411_v13, %v5087_v55  ;;  %v2150_v20 = vpop.f32.mrb[81].mxu0 }
 0xe56   :  { %v2185_v22 = vmul.f32 %v7417_v58, %v2150_v20  ;;  %v5088_v16 = vpop.f32.mrb[82].mxu0 }
 0xe57   :  { %v2205_v4 = vadd.f32 %v2199_v54, %v2187_v5  ;;  %v2188_v63 = vmul.f32 %v7423_v6, %v5088_v16  ;;  %v2153_v29 = vpop.f32.mrb[83].mxu0 }
 0xe58   :  { %v2203_v1 = vadd.f32 %v2197_v36, %v2185_v22  ;;  %v2186_v57 = vmul.f32 %v7429_v52, %v2153_v29  ;;  %v7441_v36 = vld [vmem:[%s8384_s10 + $0x8] sm:$0x3f] }
 0xe59   :  { %v2206_v25 = vadd.f32 %v2200_v53, %v2188_v63  ;;  %v2217_v38 = vrot.slane %v7441_v36, %v6651_v12 }
 0xe5a   :  { %v2204_v45 = vadd.f32 %v2198_v7, %v2186_v57 }
 0xe5b   :  { %v2213_v60 = vpack.c.bf16 %v2206_v25, %v2205_v4 }
 0xe5c   :  { %v2212_v23 = vpack.c.bf16 %v2204_v45, %v2203_v1 }
 0xe5e   :  { %5098 = vmatmul.mubr.msk.bf16.gmra.mrb[76].mxu1 %vm133_vm2, %v2212_v23 }
 0xe5f   :  { %5101 = vmatprep.mubr.msk.bf16.mxu1 %vm5888_vm1, %v5887_v0 }
 0xe66   :  { %5102 = vmatmul.mubr.msk.bf16.gmra.mrb[80].mxu1 %vm133_vm2, %v2213_v60 }
 0xe67   :  { %5123 = vmatprep.mubr.msk.bf16.mxu1 %vm5888_vm1, %v5887_v0 }
 0xf13   :  { %v2273_v7 = vpop.f32.mrb[72].mxu1 }
 0xf14   :  { %v2274_v32 = vadd.f32 %v2273_v7, %v2217_v38  ;;  %v5095_v8 = vpop.f32.mrb[73].mxu1 }
 0xf15   :  { %v2276_v44 = vpop.f32.mrb[74].mxu1 }
 0xf16   :  { %v2296_v30 = vadd.f32 %v2274_v32, %v6827_v51  ;;  %v2277_v17 = vadd.f32 %v2276_v44, %v2217_v38  ;;  %v5096_v18 = vpop.f32.mrb[75].mxu1 }
 0xf18   :  { %v2297_v10 = vadd.f32 %v2277_v17, %v6829_v28  ;;  %v2302_v3 = vsel %vm133_vm2, %v2296_v30, 0.0 }
 0xf19   :  { %2303 = vadd.xlane.f32.xlu0 %v2302_v3 }
 0xf1a   :  { %v2305_v37 = vsel %vm133_vm2, %v2297_v10, 0.0 }
 0xf1d   :  { %2306 = vadd.xlane.f32.xlu0 %v2305_v37 }
 0xf31   :  { %v2281_v54 = vpop.f32.mrb[76].mxu1 }
 0xf32   :  { %v2282_v26 = vadd.f32 %v2281_v54, %v2217_v38  ;;  %v5099_v61 = vpop.f32.mrb[77].mxu1 }
 0xf33   :  { %v2284_v53 = vpop.f32.mrb[78].mxu1 }
 0xf34   :  { %v2298_v59 = vadd.f32 %v2282_v26, %v6838_v50  ;;  %v2285_v55 = vadd.f32 %v2284_v53, %v2217_v38  ;;  %v5100_v5 = vpop.f32.mrb[79].mxu1 }
 0xf36   :  { %v2299_v51 = vadd.f32 %v2285_v55, %v6840_v40  ;;  %v2308_v20 = vsel %vm133_vm2, %v2298_v59, 0.0 }
 0xf37   :  { %2309 = vadd.xlane.f32.xlu0 %v2308_v20 }
 0xf38   :  { %v2311_v4 = vsel %vm133_vm2, %v2299_v51, 0.0 }
 0xf39   :  { %v2289_v28 = vpop.f32.mrb[80].mxu1 }
 0xf3a   :  { %v2290_v22 = vadd.f32 %v2289_v28, %v2217_v38  ;;  %v5103_v16 = vpop.f32.mrb[81].mxu1 }
 0xf3b   :  { %2312 = vadd.xlane.f32.xlu0 %v2311_v4  ;;  %v2292_v63 = vpop.f32.mrb[82].mxu1  ;;  %v5330_v16 = vld [vmem:[%s8385_s7 + $0x14] ss:$0 sps:$4 sm:$0x33]  }
 0xf3c   :  { %v2300_v29 = vadd.f32 %v2290_v22, %v6849_v49  ;;  %v2293_v1 = vadd.f32 %v2292_v63, %v2217_v38  ;;  %v5104_v57 = vpop.f32.mrb[83].mxu1 }
 0xf3e   :  { %v2301_v50 = vadd.f32 %v2293_v1, %v6851_v15  ;;  %v2314_v25 = vsel %vm133_vm2, %v2300_v29, 0.0 }
 0xf3f   :  { %2315 = vadd.xlane.f32.xlu0 %v2314_v25 }
 0xf40   :  { %v2317_v40 = vsel %vm133_vm2, %v2301_v50, 0.0 }
 0xf43   :  { %2318 = vadd.xlane.f32.xlu0 %v2317_v40 }
 0xfa6   :  { %v2304_v45 = vpop.xlane.xlu0 %2303 }
 0xfa7   :  { %v2320_v60 = vmul.f32 0.05, %v2304_v45 }
 0xfa9   :  { %v2326_v23 = vsub.f32 %v2296_v30, %v2320_v60 }
 0xfaa   :  { %v2307_v7 = vpop.xlane.xlu0 %2306 }
 0xfab   :  { %v2321_v32 = vmul.f32 0.05, %v2307_v7  ;;  %v2332_v8 = vmul.f32 %v2326_v23, %v2326_v23 }
 0xfad   :  { %v2327_v44 = vsub.f32 %v2297_v10, %v2321_v32  ;;  %v2338_v17 = vsel %vm133_vm2, %v2332_v8, 0.0  ;;  %v2383_v8 = vrot.slane %v7441_v36, %v6716_v9 }
 0xfae   :  { %2339 = vadd.xlane.f32.xlu1 %v2338_v17 }
 0xfaf   :  { %v2333_v49 = vmul.f32 %v2327_v44, %v2327_v44 }
 0xfb1   :  { %v2341_v38 = vsel %vm133_vm2, %v2333_v49, 0.0 }
 0xfb2   :  { %2342 = vadd.xlane.f32.xlu0 %v2341_v38  ;;  %v2393_v38 = vrot.slane %v7441_v36, %v6721_v46 }
 0xfc4   :  { %v2310_v15 = vpop.xlane.xlu0 %2309 }
 0xfc5   :  { %v2322_v18 = vmul.f32 0.05, %v2310_v15 }
 0xfc7   :  { %v7459_v3 = vsub.f32 %v2298_v59, %v2322_v18  ;;  %v5329_v59 = vld [vmem:[%s8385_s7 + $0xc] sm:$0xff]  }
 0xfc8   :  { %v2313_v37 = vpop.xlane.xlu0 %2312  ;;  %5106 = vmatpush3.bf16.msra.mxu0 %v5329_v59 }
 0xfc9   :  { %v2323_v54 = vmul.f32 0.05, %v2313_v37  ;;  %v2334_v30 = vmul.f32 %v7459_v3, %v7459_v3  ;;  %5107 = vmatprep.subr.bf16.mxu0 %v5887_v0 }
 0xfcb   :  { %v7463_v26 = vsub.f32 %v2299_v51, %v2323_v54  ;;  %v2344_v10 = vsel %vm133_vm2, %v2334_v30, 0.0 }
 0xfcc   :  { %2345 = vadd.xlane.f32.xlu1 %v2344_v10  ;;  %v2316_v61 = vpop.xlane.xlu0 %2315 }
 0xfcd   :  { %v2324_v53 = vmul.f32 0.05, %v2316_v61  ;;  %v2335_v55 = vmul.f32 %v7463_v26, %v7463_v26 }
 0xfcf   :  { %v7471_v5 = vsub.f32 %v2300_v29, %v2324_v53  ;;  %v2347_v20 = vsel %vm133_vm2, %v2335_v55, 0.0  ;;  %v2434_v29 = vsel %vm143_vm0, %v5330_v16, 0 }
 0xfd0   :  { %2348 = vadd.xlane.f32.xlu0 %v2347_v20  ;;  %v2319_v28 = vpop.xlane.xlu0 %2318  ;;  %5108 = vmatpush3.bf16.msra.mxu0 %v2434_v29 }
 0xfd1   :  { %v2325_v51 = vmul.f32 0.05, %v2319_v28  ;;  %v2336_v22 = vmul.f32 %v7471_v5, %v7471_v5  ;;  %5135 = vmatprep.subr.bf16.mxu0 %v5887_v0 }
 0xfd3   :  { %v2331_v4 = vsub.f32 %v2301_v50, %v2325_v51  ;;  %v2350_v63 = vsel %vm133_vm2, %v2336_v22, 0.0 }
 0xfd4   :  { %2351 = vadd.xlane.f32.xlu1 %v2350_v63 }
 0xfd5   :  { %v2337_v1 = vmul.f32 %v2331_v4, %v2331_v4 }
 0xfd7   :  { %v2353_v57 = vsel %vm133_vm2, %v2337_v1, 0.0 }
 0xfd8   :  { %2354 = vadd.xlane.f32.xlu0 %v2353_v57 }
0x103b   :  { %v2340_v25 = vpop.xlane.xlu1 %2339 }
0x103c   :  { %v2356_v40 = vmul.f32 0.05, %v2340_v25 }
0x103e   :  { %v2362_v45 = vadd.f32 1e-05, %v2356_v40 }
0x103f   :  { %v2343_v60 = vpop.xlane.xlu0 %2342 }
0x1040   :  { %5557 = vrsqrt.f32 %v2362_v45  ;;  %v2357_v7 = vmul.f32 0.05, %v2343_v60 }
0x1042   :  { %v2363_v32 = vadd.f32 1e-05, %v2357_v7 }
0x1044   :  { %5559 = vrsqrt.f32 %v2363_v32 }
0x104a   :  { %v5558_v50 = vpop.eup %5557 }
0x104b   :  { %v2374_v17 = vmul.f32 %v5558_v50, %v2326_v23 }
0x104d   :  { %v2384_v15 = vmul.f32 %v2383_v8, %v2374_v17 }
0x104e   :  { %v5560_v49 = vpop.eup %5559 }
0x104f   :  { %v2375_v18 = vmul.f32 %v5560_v49, %v2327_v44  ;;  %v7488_v54 = vadd.f32 %v2393_v38, %v2384_v15 }
0x1051   :  { %v2385_v37 = vmul.f32 %v2383_v8, %v2375_v18 }
0x1053   :  { %v7490_v30 = vadd.f32 %v2393_v38, %v2385_v37 }
0x1055   :  { %v2404_v10 = vpack.c.bf16 %v7490_v30, %v7488_v54 }
0x1057   :  { %5110 = vmatmul.mubr.msk.bf16.vlgmr.msra.gmra.mrb[84].mxu0 %vm133_vm2, %v2404_v10 }
0x1058   :  { %5113 = vmatprep.mubr.msk.bf16.mxu0 %vm5888_vm1, %v5887_v0 }
0x1059   :  { %v2346_v23 = vpop.xlane.xlu1 %2345 }
0x105a   :  { %v2358_v61 = vmul.f32 0.05, %v2346_v23 }
0x105c   :  { %v2364_v53 = vadd.f32 1e-05, %v2358_v61 }
0x105d   :  { %v2349_v55 = vpop.xlane.xlu0 %2348 }
0x105e   :  { %5561 = vrsqrt.f32 %v2364_v53  ;;  %v2359_v59 = vmul.f32 0.05, %v2349_v55 }
0x1060   :  { %v2365_v44 = vadd.f32 1e-05, %v2359_v59 }
0x1061   :  { %v2352_v20 = vpop.xlane.xlu1 %2351 }
0x1062   :  { %5563 = vrsqrt.f32 %v2365_v44  ;;  %v2360_v28 = vmul.f32 0.05, %v2352_v20 }
0x1064   :  { %v2366_v51 = vadd.f32 1e-05, %v2360_v28 }
0x1065   :  { %v2355_v22 = vpop.xlane.xlu0 %2354 }
0x1066   :  { %5565 = vrsqrt.f32 %v2366_v51  ;;  %v2361_v16 = vmul.f32 0.05, %v2355_v22 }
0x1068   :  { %v5562_v63 = vpop.eup %5561  ;;  %v2367_v29 = vadd.f32 1e-05, %v2361_v16 }
0x1069   :  { %v2376_v1 = vmul.f32 %v5562_v63, %v7459_v3 }
0x106a   :  { %5567 = vrsqrt.f32 %v2367_v29 }
0x106b   :  { %v2386_v40 = vmul.f32 %v2383_v8, %v2376_v1 }
0x106c   :  { %v5564_v57 = vpop.eup %5563 }
0x106d   :  { %v2377_v25 = vmul.f32 %v5564_v57, %v7463_v26  ;;  %v7499_v7 = vadd.f32 %v2393_v38, %v2386_v40 }
0x106f   :  { %v2387_v45 = vmul.f32 %v2383_v8, %v2377_v25 }
0x1070   :  { %v5566_v60 = vpop.eup %5565 }
0x1071   :  { %v7501_v32 = vadd.f32 %v2393_v38, %v2387_v45  ;;  %v2378_v50 = vmul.f32 %v5566_v60, %v7471_v5  ;;  %v5331_v5 = vld [vmem:[%s8386_s9 + $0x8] sm:$0x3f]  }
0x1073   :  { %v2405_v17 = vpack.c.bf16 %v7501_v32, %v7499_v7  ;;  %v2388_v15 = vmul.f32 %v2383_v8, %v2378_v50 }
0x1074   :  { %v5568_v49 = vpop.eup %5567 }
0x1075   :  { %5114 = vmatmul.mubr.msk.bf16.gmra.mrb[88].mxu0 %vm133_vm2, %v2405_v17  ;;  %v2379_v3 = vmul.f32 %v5568_v49, %v2331_v4  ;;  %v7509_v18 = vadd.f32 %v2393_v38, %v2388_v15  ;;  %v2524_v4 = vsel %vm1233_vm4, %v5331_v5, 0  ;;  %v2508_v5 = vrot.slane %v7441_v36, %v6771_v34 }
0x1076   :  { %5117 = vmatprep.mubr.msk.bf16.mxu0 %vm5888_vm1, %v5887_v0  ;;  %5122 = vmatpush3.bf16.msra.mxu1 %v2524_v4 }
0x1077   :  { %v2389_v26 = vmul.f32 %v2383_v8, %v2379_v3  ;;  %v4641_v8 = vld [vmem:[%s8387_s8 + $0x1] ss:$0 sm:$0xff] }
0x1079   :  { %v7511_v37 = vadd.f32 %v2393_v38, %v2389_v26 }
0x107b   :  { %v2406_v10 = vpack.c.bf16 %v7511_v37, %v7509_v18 }
0x107d   :  { %5118 = vmatmul.mubr.msk.bf16.gmra.mrb[92].mxu0 %vm133_vm2, %v2406_v10 }
0x107e   :  { %5139 = vmatprep.mubr.msk.bf16.mxu0 %vm5888_vm1, %v5887_v0 }
0x112a   :  { %v2470_v38 = vpop.f32.mrb[84].mxu0 }
0x112b   :  { %v2471_v23 = vadd.f32 %v4641_v8, %v2470_v38  ;;  %v5111_v61 = vpop.f32.mrb[85].mxu0 }
0x112c   :  { %v2473_v53 = vpop.f32.mrb[86].mxu0 }
0x112d   :  { %v2474_v55 = vadd.f32 %v4641_v8, %v2473_v53  ;;  %v5112_v59 = vpop.f32.mrb[87].mxu0  ;;  %v2493_v44 = vmax.f32 %v2471_v23, 0.0 }
0x112f   :  { %v2494_v20 = vmax.f32 %v2474_v55, 0.0 }
0x1131   :  { %v2502_v28 = vpack.c.bf16 %v2494_v20, %v2493_v44 }
0x1133   :  { %5124 = vmatmul.mubr.msk.bf16.vlgmr.msra.gmra.mrb[84].mxu1 %vm1223_vm5, %v2502_v28 }
0x1134   :  { %5127 = vmatprep.mubr.msk.bf16.mxu1 %vm5888_vm1, %v5887_v0 }
0x1148   :  { %v2478_v51 = vpop.f32.mrb[88].mxu0 }
0x1149   :  { %v2479_v22 = vadd.f32 %v4641_v8, %v2478_v51  ;;  %v5115_v16 = vpop.f32.mrb[89].mxu0 }
0x114a   :  { %v2481_v63 = vpop.f32.mrb[90].mxu0 }
0x114b   :  { %v2482_v29 = vadd.f32 %v4641_v8, %v2481_v63  ;;  %v5116_v1 = vpop.f32.mrb[91].mxu0  ;;  %v2495_v57 = vmax.f32 %v2479_v22, 0.0 }
0x114d   :  { %v2496_v25 = vmax.f32 %v2482_v29, 0.0 }
0x114f   :  { %v2503_v40 = vpack.c.bf16 %v2496_v25, %v2495_v57 }
0x1150   :  { %v2486_v45 = vpop.f32.mrb[92].mxu0 }
0x1151   :  { %v2487_v60 = vadd.f32 %v4641_v8, %v2486_v45  ;;  %v5119_v50 = vpop.f32.mrb[93].mxu0  ;;  %5128 = vmatmul.mubr.msk.bf16.gmra.mrb[88].mxu1 %vm1223_vm5, %v2503_v40 }
0x1152   :  { %v2489_v17 = vpop.f32.mrb[94].mxu0  ;;  %5131 = vmatprep.mubr.msk.bf16.mxu1 %vm5888_vm1, %v5887_v0 }
0x1153   :  { %v2490_v49 = vadd.f32 %v4641_v8, %v2489_v17  ;;  %v5120_v3 = vpop.f32.mrb[95].mxu0  ;;  %v2497_v15 = vmax.f32 %v2487_v60, 0.0 }
0x1155   :  { %v2498_v26 = vmax.f32 %v2490_v49, 0.0 }
0x1157   :  { %v2504_v10 = vpack.c.bf16 %v2498_v26, %v2497_v15 }
0x1159   :  { %5132 = vmatmul.mubr.msk.bf16.gmra.mrb[92].mxu1 %vm1223_vm5, %v2504_v10 }
0x1206   :  { %v2560_v4 = vpop.f32.mrb[84].mxu1 }
0x1207   :  { %v2561_v38 = vadd.f32 %v2560_v4, %v2508_v5  ;;  %v5125_v23 = vpop.f32.mrb[85].mxu1 }
0x1208   :  { %v2563_v61 = vpop.f32.mrb[86].mxu1 }
0x1209   :  { %v2583_v53 = vadd.f32 %v2561_v38, %v7488_v54  ;;  %v2564_v55 = vadd.f32 %v2563_v61, %v2508_v5  ;;  %v5126_v59 = vpop.f32.mrb[87].mxu1 }
0x120b   :  { %v2584_v44 = vadd.f32 %v2564_v55, %v7490_v30  ;;  %v2589_v8 = vsel %vm133_vm2, %v2583_v53, 0.0 }
0x120c   :  { %2590 = vadd.xlane.f32.xlu1 %v2589_v8 }
0x120d   :  { %v2592_v20 = vsel %vm133_vm2, %v2584_v44, 0.0 }
0x120e   :  { %2593 = vadd.xlane.f32.xlu0 %v2592_v20 }
0x1224   :  { %v2568_v28 = vpop.f32.mrb[88].mxu1 }
0x1225   :  { %v2569_v51 = vadd.f32 %v2568_v28, %v2508_v5  ;;  %v5129_v22 = vpop.f32.mrb[89].mxu1 }
0x1226   :  { %v2571_v16 = vpop.f32.mrb[90].mxu1 }
0x1227   :  { %v2585_v63 = vadd.f32 %v2569_v51, %v7499_v7  ;;  %v2572_v29 = vadd.f32 %v2571_v16, %v2508_v5  ;;  %v5130_v1 = vpop.f32.mrb[91].mxu1 }
0x1229   :  { %v2586_v54 = vadd.f32 %v2572_v29, %v7501_v32  ;;  %v2595_v57 = vsel %vm133_vm2, %v2585_v63, 0.0  ;;  %v5332_v29 = vld [vmem:[%s8397_s23 + $0x18] sm:$0xff]  }
0x122a   :  { %2596 = vadd.xlane.f32.xlu1 %v2595_v57  ;;  %5136 = vmatpush3.bf16.msra.mxu0 %v5332_v29 }
0x122b   :  { %v2598_v30 = vsel %vm133_vm2, %v2586_v54, 0.0  ;;  %5137 = vmatprep.subr.bf16.mxu0 %v5887_v0 }
0x122c   :  { %2599 = vadd.xlane.f32.xlu0 %v2598_v30  ;;  %v2576_v25 = vpop.f32.mrb[92].mxu1 }
0x122d   :  { %v2577_v40 = vadd.f32 %v2576_v25, %v2508_v5  ;;  %v5133_v45 = vpop.f32.mrb[93].mxu1  ;;  %v5333_v25 = vld [vmem:[%s8397_s23 + $0x20] ss:$0 sps:$4 sm:$0x33]  }
0x122e   :  { %v2579_v60 = vpop.f32.mrb[94].mxu1 }
0x122f   :  { %v2587_v50 = vadd.f32 %v2577_v40, %v7509_v18  ;;  %v2580_v17 = vadd.f32 %v2579_v60, %v2508_v5  ;;  %v5134_v49 = vpop.f32.mrb[95].mxu1  ;;  %v2723_v60 = vsel %vm143_vm0, %v5333_v25, 0 }
0x1230   :  { %5138 = vmatpush3.bf16.msra.mxu0 %v2723_v60 }
0x1231   :  { %v2588_v7 = vadd.f32 %v2580_v17, %v7511_v37  ;;  %v2601_v3 = vsel %vm133_vm2, %v2587_v50, 0.0 }
0x1232   :  { %2602 = vadd.xlane.f32.xlu1 %v2601_v3 }
0x1233   :  { %v2604_v32 = vsel %vm133_vm2, %v2588_v7, 0.0 }
0x1234   :  { %2605 = vadd.xlane.f32.xlu0 %v2604_v32 }
0x1299   :  { %v2591_v15 = vpop.xlane.xlu1 %2590 }
0x129a   :  { %v2607_v26 = vmul.f32 0.05, %v2591_v15 }
0x129b   :  { %v2594_v10 = vpop.xlane.xlu0 %2593 }
0x129c   :  { %v2613_v4 = vsub.f32 %v2583_v53, %v2607_v26  ;;  %v2608_v38 = vmul.f32 0.05, %v2594_v10 }
0x129e   :  { %v2614_v23 = vsub.f32 %v2584_v44, %v2608_v38  ;;  %v2619_v61 = vmul.f32 %v2613_v4, %v2613_v4 }
0x12a0   :  { %v2625_v55 = vsel %vm133_vm2, %v2619_v61, 0.0  ;;  %v2620_v18 = vmul.f32 %v2614_v23, %v2614_v23 }
0x12a1   :  { %2626 = vadd.xlane.f32.xlu1 %v2625_v55 }
0x12a2   :  { %v2628_v5 = vsel %vm133_vm2, %v2620_v18, 0.0 }
0x12a3   :  { %2629 = vadd.xlane.f32.xlu0 %v2628_v5  ;;  %v2680_v5 = vrot.slane %v7441_v36, %v6823_v48 }
0x12b7   :  { %v2597_v37 = vpop.xlane.xlu1 %2596 }
0x12b8   :  { %v2609_v59 = vmul.f32 0.05, %v2597_v37 }
0x12b9   :  { %v2600_v8 = vpop.xlane.xlu0 %2599 }
0x12ba   :  { %v7548_v20 = vsub.f32 %v2585_v63, %v2609_v59  ;;  %v2610_v28 = vmul.f32 0.05, %v2600_v8 }
0x12bc   :  { %v7550_v51 = vsub.f32 %v2586_v54, %v2610_v28  ;;  %v2621_v53 = vmul.f32 %v7548_v20, %v7548_v20 }
0x12be   :  { %v2631_v44 = vsel %vm133_vm2, %v2621_v53, 0.0  ;;  %v2622_v22 = vmul.f32 %v7550_v51, %v7550_v51 }
0x12bf   :  { %2632 = vadd.xlane.f32.xlu1 %v2631_v44  ;;  %v2603_v16 = vpop.xlane.xlu1 %2602 }
0x12c0   :  { %v2611_v1 = vmul.f32 0.05, %v2603_v16  ;;  %v2634_v63 = vsel %vm133_vm2, %v2622_v22, 0.0 }
0x12c1   :  { %2635 = vadd.xlane.f32.xlu0 %v2634_v63  ;;  %v2606_v54 = vpop.xlane.xlu0 %2605 }
0x12c2   :  { %v2617_v57 = vsub.f32 %v2587_v50, %v2611_v1  ;;  %v2612_v30 = vmul.f32 0.05, %v2606_v54 }
0x12c4   :  { %v2618_v40 = vsub.f32 %v2588_v7, %v2612_v30  ;;  %v2623_v45 = vmul.f32 %v2617_v57, %v2617_v57  ;;  %v2670_v7 = vrot.slane %v7441_v36, %v6818_v56 }
0x12c6   :  { %v2637_v17 = vsel %vm133_vm2, %v2623_v45, 0.0  ;;  %v2624_v49 = vmul.f32 %v2618_v40, %v2618_v40 }
0x12c7   :  { %2638 = vadd.xlane.f32.xlu1 %v2637_v17 }
0x12c8   :  { %v2640_v3 = vsel %vm133_vm2, %v2624_v49, 0.0 }
0x12c9   :  { %2641 = vadd.xlane.f32.xlu0 %v2640_v3 }
0x132e   :  { %v2627_v50 = vpop.xlane.xlu1 %2626 }
0x132f   :  { %v2643_v32 = vmul.f32 0.05, %v2627_v50 }
0x1330   :  { %v2630_v15 = vpop.xlane.xlu0 %2629 }
0x1331   :  { %v2649_v26 = vadd.f32 1e-05, %v2643_v32  ;;  %v2644_v10 = vmul.f32 0.05, %v2630_v15 }
0x1333   :  { %5569 = vrsqrt.f32 %v2649_v26  ;;  %v2650_v38 = vadd.f32 1e-05, %v2644_v10 }
0x1335   :  { %5571 = vrsqrt.f32 %v2650_v38 }
0x133d   :  { %v5570_v61 = vpop.eup %5569 }
0x133e   :  { %v2661_v55 = vmul.f32 %v5570_v61, %v2613_v4 }
0x133f   :  { %v5572_v18 = vpop.eup %5571 }
0x1340   :  { %v2671_v37 = vmul.f32 %v2670_v7, %v2661_v55  ;;  %v2662_v59 = vmul.f32 %v5572_v18, %v2614_v23 }
0x1342   :  { %v2672_v8 = vmul.f32 %v2670_v7, %v2662_v59  ;;  %v7572_v28 = vadd.f32 %v2680_v5, %v2671_v37 }
0x1344   :  { %v7574_v53 = vadd.f32 %v2680_v5, %v2672_v8 }
0x1346   :  { %v2693_v44 = vpack.c.bf16 %v7574_v53, %v7572_v28 }
0x1348   :  { %5140 = vmatmul.mubr.msk.bf16.vlgmr.msra.gmra.mrb[96].mxu0 %vm133_vm2, %v2693_v44 }
0x1349   :  { %5143 = vmatprep.mubr.msk.bf16.mxu0 %vm5888_vm1, %v5887_v0 }
0x134c   :  { %v2633_v4 = vpop.xlane.xlu1 %2632 }
0x134d   :  { %v2645_v22 = vmul.f32 0.05, %v2633_v4 }
0x134e   :  { %v2636_v16 = vpop.xlane.xlu0 %2635 }
0x134f   :  { %v2651_v29 = vadd.f32 1e-05, %v2645_v22  ;;  %v2646_v36 = vmul.f32 0.05, %v2636_v16 }
0x1351   :  { %5573 = vrsqrt.f32 %v2651_v29  ;;  %v2652_v23 = vadd.f32 1e-05, %v2646_v36 }
0x1353   :  { %5575 = vrsqrt.f32 %v2652_v23 }
0x1354   :  { %v2639_v1 = vpop.xlane.xlu1 %2638 }
0x1355   :  { %v2647_v63 = vmul.f32 0.05, %v2639_v1 }
0x1356   :  { %v2642_v54 = vpop.xlane.xlu0 %2641 }
0x1357   :  { %v2653_v30 = vadd.f32 1e-05, %v2647_v63  ;;  %v2648_v25 = vmul.f32 0.05, %v2642_v54 }
0x1359   :  { %5577 = vrsqrt.f32 %v2653_v30  ;;  %v2654_v45 = vadd.f32 1e-05, %v2648_v25 }
0x135b   :  { %v5574_v60 = vpop.eup %5573  ;;  %5579 = vrsqrt.f32 %v2654_v45 }
0x135c   :  { %v2663_v17 = vmul.f32 %v5574_v60, %v7548_v20 }
0x135d   :  { %v5576_v49 = vpop.eup %5575 }
0x135e   :  { %v2664_v3 = vmul.f32 %v5576_v49, %v7550_v51  ;;  %v2673_v50 = vmul.f32 %v2670_v7, %v2663_v17 }
0x1360   :  { %v2674_v32 = vmul.f32 %v2670_v7, %v2664_v3  ;;  %v7583_v15 = vadd.f32 %v2680_v5, %v2673_v50 }
0x1362   :  { %v7585_v26 = vadd.f32 %v2680_v5, %v2674_v32 }
0x1363   :  { %v5578_v10 = vpop.eup %5577 }
0x1364   :  { %v2694_v38 = vpack.c.bf16 %v7585_v26, %v7583_v15  ;;  %v2665_v61 = vmul.f32 %v5578_v10, %v2617_v57  ;;  %v4658_v57 = vld [vmem:[%s8380_s5 + $0x2] ss:$0 sm:$0xff] }
0x1365   :  { %v5580_v55 = vpop.eup %5579 }
0x1366   :  { %5144 = vmatmul.mubr.msk.bf16.gmra.mrb[100].mxu0 %vm133_vm2, %v2694_v38  ;;  %v2666_v18 = vmul.f32 %v5580_v55, %v2618_v40  ;;  %v2675_v37 = vmul.f32 %v2670_v7, %v2665_v61 }
0x1367   :  { %5147 = vmatprep.mubr.msk.bf16.mxu0 %vm5888_vm1, %v5887_v0 }
0x1368   :  { %v2676_v20 = vmul.f32 %v2670_v7, %v2666_v18  ;;  %v7592_v51 = vadd.f32 %v2680_v5, %v2675_v37 }
0x136a   :  { %v7594_v59 = vadd.f32 %v2680_v5, %v2676_v20 }
0x136c   :  { %v2695_v8 = vpack.c.bf16 %v7594_v59, %v7592_v51 }
0x136e   :  { %5148 = vmatmul.mubr.msk.bf16.gmra.mrb[104].mxu0 %vm133_vm2, %v2695_v8 }
0x141b   :  { %v2759_v44 = vpop.f32.mrb[96].mxu0 }
0x141c   :  { %v2760_v40 = vadd.f32 %v4658_v57, %v2759_v44  ;;  %v5141_v4 = vpop.f32.mrb[97].mxu0 }
0x141d   :  { %v2762_v22 = vpop.f32.mrb[98].mxu0 }
0x141e   :  { %v2763_v16 = vadd.f32 %v4658_v57, %v2762_v22  ;;  %v5142_v29 = vpop.f32.mrb[99].mxu0  ;;  %v2782_v7 = vmul.f32 %v7308_v47, %v2760_v40  ;;  %v7604_v5 = vmul.f32 %v7314_v19, %v2760_v40  ;;  %v7607_v36 = vmul.f32 %v7366_v21, %v2760_v40 }
0x141f   :  { %v7619_v30 = vmul.f32 %v7384_v35, %v2760_v40  ;;  %v7669_v29 = vld [vmem:[%s8381_s3 + $0x58] sm:$0xff] }
0x1420   :  { %v7609_v23 = vpack.c.bf16 %v2763_v16, %v2760_v40  ;;  %v2783_v1 = vmul.f32 %v7320_v42, %v2763_v16  ;;  %v7613_v63 = vmul.f32 %v7326_v62, %v2763_v16  ;;  %v7616_v54 = vmul.f32 %v7378_v14, %v2763_v16 }
0x1421   :  { %v7622_v47 = vmul.f32 %v7396_v24, %v2763_v16 }
0x1422   :  { %2824 = vrot.lane.b32.xlu1 %v7609_v23, %s5889_s28  ;;  %v2806_v19 = vpack.c.bf16 %v2783_v1, %v2782_v7  ;;  %v2809_v21 = vpack.c.bf16 %v7613_v63, %v7604_v5  ;;  %v2812_v42 = vpack.c.bf16 %v7616_v54, %v7607_v36  ;;  %v5843_v36 = vld [vmem:[%s8382_s2 + $0x10] sm:$0xff] }
0x1423   :  { %v2815_v62 = vpack.c.bf16 %v7622_v47, %v7619_v30  ;;  %v5844_v30 = vld [vmem:[%s8382_s2] sm:$0xff] }
0x1424   :  { %5157 = vmatprep.mubr.msk.bf16.mxu1 %vm133_vm2, %v2806_v19 }
0x1439   :  { %v2767_v14 = vpop.f32.mrb[100].mxu0 }
0x143a   :  { %v2768_v35 = vadd.f32 %v4658_v57, %v2767_v14  ;;  %v5145_v25 = vpop.f32.mrb[101].mxu0 }
0x143b   :  { %v2770_v24 = vpop.f32.mrb[102].mxu0 }
0x143c   :  { %v2771_v45 = vadd.f32 %v4658_v57, %v2770_v24  ;;  %v5146_v60 = vpop.f32.mrb[103].mxu0  ;;  %v2784_v17 = vmul.f32 %v7334_v31, %v2768_v35  ;;  %v2790_v49 = vmul.f32 %v7340_v33, %v2768_v35  ;;  %v2796_v3 = vmul.f32 %v7360_v27, %v2768_v35 }
0x143d   :  { %v2802_v61 = vmul.f32 %v7417_v58, %v2768_v35  ;;  %v7654_v58 = vld [vmem:[%s8381_s3 + $0x50] sm:$0xff] }
0x143e   :  { %v2785_v50 = vmul.f32 %v7348_v41, %v2771_v45  ;;  %v7637_v32 = vpack.c.bf16 %v2771_v45, %v2768_v35  ;;  %v2791_v10 = vmul.f32 %v7354_v39, %v2771_v45  ;;  %v2797_v38 = vmul.f32 %v7372_v2, %v2771_v45  ;;  %v7648_v39 = vld [vmem:[%s8381_s3 + $0x20] sm:$0xff] }
0x143f   :  { %v2803_v55 = vmul.f32 %v7429_v52, %v2771_v45 }
0x1440   :  { %v2807_v18 = vpack.c.bf16 %v2785_v50, %v2784_v17  ;;  %2826 = vrot.lane.b32.xlu0 %v7637_v32, %s5889_s28  ;;  %v2810_v31 = vpack.c.bf16 %v2791_v10, %v2790_v49  ;;  %v2813_v33 = vpack.c.bf16 %v2797_v38, %v2796_v3  ;;  %v5845_v49 = vld [vmem:[%s8382_s2 + $0x18] sm:$0xff]  ;;  %v5846_v50 = vld [vmem:[%s8382_s2 + $0x8] sm:$0xff] }
0x1441   :  { %v2775_v37 = vpop.f32.mrb[104].mxu0  ;;  %v2816_v27 = vpack.c.bf16 %v2803_v55, %v2802_v61 }
0x1442   :  { %v2776_v20 = vadd.f32 %v4658_v57, %v2775_v37  ;;  %v5149_v41 = vpop.f32.mrb[105].mxu0 }
0x1443   :  { %v2778_v8 = vpop.f32.mrb[106].mxu0 }
0x1444   :  { %v2779_v44 = vadd.f32 %v4658_v57, %v2778_v8  ;;  %v5150_v40 = vpop.f32.mrb[107].mxu0  ;;  %v2786_v2 = vmul.f32 %v7648_v39, %v2776_v20  ;;  %v2792_v52 = vmul.f32 %v7654_v58, %v2776_v20  ;;  %v2798_v4 = vmul.f32 %v7390_v43, %v2776_v20  ;;  %v7663_v57 = vld [vmem:[%s8381_s3 + $0x28] sm:$0xff]  ;;  %v5849_v8 = vld [vmem:[%s8382_s2 + $0x38] sm:$0xff] }
0x1445   :  { %v2804_v43 = vmul.f32 %v7411_v13, %v2776_v20 }
0x1446   :  { %v7658_v22 = vpack.c.bf16 %v2779_v44, %v2776_v20  ;;  %v2787_v16 = vmul.f32 %v7663_v57, %v2779_v44  ;;  %v2793_v7 = vmul.f32 %v7669_v29, %v2779_v44  ;;  %v2799_v1 = vmul.f32 %v7402_v11, %v2779_v44  ;;  %v5848_v20 = vld [vmem:[%s8382_s2 + $0x20] sm:$0xff] }
0x1447   :  { %v2805_v19 = vmul.f32 %v7423_v6, %v2779_v44 }
0x1448   :  { %2828 = vrot.lane.b32.xlu1 %v7658_v22, %s5889_s28  ;;  %v2808_v14 = vpack.c.bf16 %v2787_v16, %v2786_v2  ;;  %v2811_v35 = vpack.c.bf16 %v2793_v7, %v2792_v52  ;;  %v2814_v25 = vpack.c.bf16 %v2799_v1, %v2798_v4  ;;  %v5850_v52 = vld [vmem:[%s8382_s2 + $0x28] sm:$0xff] }
0x1449   :  { %v2817_v24 = vpack.c.bf16 %v2805_v19, %v2804_v43  ;;  %v5851_v43 = vld [vmem:[%s8382_s2 + $0x50] sm:$0xff] }
0x1494   :  { %v2825_v45 = vpop.permute.xlu1 %2824 }
0x1495   :  { %5303 = vmatprep.subr.msk.bf16.mxu1 %vm133_vm2, %v2825_v45  ;;  %v2867_v60 = vsel %vm133_vm2, %v2825_v45, 0 }
0x1496   :  { %5152 = vmatpush3.bf16.xpose.msra.mxu1 %v2867_v60  ;;  %v5853_v60 = vld [vmem:[%s8382_s2 + $0x58] sm:$0xff] }
0x14b2   :  { %v2827_v17 = vpop.permute.xlu0 %2826 }
0x14b3   :  { %v2870_v11 = vsel %vm133_vm2, %v2827_v17, 0  ;;  %5304 = vmatprep.subr.msk.bf16.mxu1 %vm133_vm2, %v2827_v17 }
0x14b4   :  { %5154 = vmatpush3.bf16.xpose.msra.mxu1 %v2870_v11 }
0x14ba   :  { %v2829_v13 = vpop.permute.xlu1 %2828 }
0x14bb   :  { %5305 = vmatprep.subr.msk.bf16.mxu1 %vm133_vm2, %v2829_v13  ;;  %v2873_v6 = vsel %vm133_vm2, %v2829_v13, 0 }
0x14bc   :  { %5156 = vmatpush3.bf16.xpose.msra.mxu1 %v2873_v6  ;;  %v5854_v6 = vld [vmem:[%s8382_s2 + $0x48] sm:$0xff] }
0x14bd   :  { %5211 = vmatprep.subr.bf16.mxu1 %v5887_v0 }
0x14c3   :  { %5158 = vmatmul.mubr.msk.bf16.vlgmr.msra.gmra.mrb[96].mxu1 %vm133_vm2, %v2807_v18 }
0x14c4   :  { %5161 = vmatprep.mubr.msk.bf16.mxu1 %vm133_vm2, %v2808_v14 }
0x14cb   :  { %5162 = vmatmul.mubr.msk.bf16.gmra.mrb[100].mxu1 %vm133_vm2, %v2809_v21 }
0x14cc   :  { %5165 = vmatprep.mubr.msk.bf16.mxu1 %vm133_vm2, %v2810_v31  ;;  %v5847_v31 = vld [vmem:[%s8382_s2 + $0x30] sm:$0xff] }
0x14d3   :  { %5166 = vmatmul.mubr.msk.bf16.gmra.mrb[104].mxu1 %vm133_vm2, %v2811_v35 }
0x14d4   :  { %5169 = vmatprep.mubr.msk.bf16.mxu1 %vm133_vm2, %v2812_v42 }
0x14db   :  { %5170 = vmatmul.mubr.msk.bf16.gmra.mrb[108].mxu1 %vm133_vm2, %v2813_v33 }
0x14dc   :  { %5173 = vmatprep.mubr.msk.bf16.mxu1 %vm133_vm2, %v2814_v25 }
0x14e3   :  { %5174 = vmatmul.mubr.msk.bf16.gmra.mrb[112].mxu1 %vm133_vm2, %v2815_v62 }
0x14e4   :  { %5177 = vmatprep.mubr.msk.bf16.mxu1 %vm133_vm2, %v2816_v27 }
0x14eb   :  { %5178 = vmatmul.mubr.msk.bf16.gmra.mrb[116].mxu1 %vm133_vm2, %v2817_v24  ;;  %v5852_v24 = vld [vmem:[%s8382_s2 + $0x40] sm:$0xff] }
0x14ec   :  { %5215 = vmatprep.mubr.msk.bf16.mxu1 %vm5888_vm1, %v5887_v0 }
0x1596   :  { %v5159_v5 = vpop.f32.mrb[96].mxu1 }
0x1597   :  { %v7709_v63 = vadd.f32 %v5843_v36, %v5159_v5  ;;  %v2909_v54 = vpop.f32.mrb[97].mxu1 }
0x1598   :  { %v7714_v47 = vadd.f32 %v5844_v30, %v2909_v54  ;;  %v5160_v21 = vpop.f32.mrb[98].mxu1 }
0x1599   :  { %v2912_v42 = vpop.f32.mrb[99].mxu1  ;;  %v3010_v62 = vsel %vm426_vm3, %v7709_v63, -inf  ;;  %v7721_v3 = vadd.f32 %v5845_v49, %v5160_v21  ;;  %v5855_v21 = vld [vmem:[%s8382_s2 + $0x70] sm:$0xff] }
0x159a   :  { %v7726_v10 = vadd.f32 %v5846_v50, %v2912_v42  ;;  %3011 = vmax.xlane.f32.xlu0 %v3010_v62  ;;  %v3004_v38 = vsel %vm426_vm3, %v7714_v47, -inf }
0x159b   :  { %3005 = vmax.xlane.f32.xlu1 %v3004_v38  ;;  %v3013_v18 = vsel %vm426_vm3, %v7721_v3, -inf  ;;  %v5856_v38 = vld [vmem:[%s8382_s2 + $0x60] sm:$0xff] }
0x159c   :  { %v3007_v61 = vsel %vm426_vm3, %v7726_v10, -inf }
0x159e   :  { %v5163_v55 = vpop.f32.mrb[100].mxu1  ;;  %3008 = vmax.xlane.f32.xlu0 %v3007_v61 }
0x159f   :  { %v7737_v33 = vadd.f32 %v5847_v31, %v5163_v55  ;;  %v2925_v37 = vpop.f32.mrb[101].mxu1  ;;  %3014 = vmax.xlane.f32.xlu1 %v3013_v18  ;;  %v5857_v55 = vld [vmem:[%s8382_s2 + $0x78] sm:$0xff] }
0x15a0   :  { %v5164_v27 = vpop.f32.mrb[102].mxu1  ;;  %v7742_v41 = vadd.f32 %v5848_v20, %v2925_v37 }
0x15a1   :  { %v7747_v44 = vadd.f32 %v5849_v8, %v5164_v27  ;;  %v2928_v40 = vpop.f32.mrb[103].mxu1  ;;  %v3022_v2 = vsel %vm426_vm3, %v7737_v33, -inf  ;;  %v5858_v27 = vld [vmem:[%s8382_s2 + $0x68] sm:$0xff] }
0x15a2   :  { %3023 = vmax.xlane.f32.xlu0 %v3022_v2  ;;  %v7754_v4 = vadd.f32 %v5850_v52, %v2928_v40  ;;  %v3016_v7 = vsel %vm426_vm3, %v7742_v41, -inf  ;;  %v5859_v52 = vld [vmem:[%s8382_s2 + $0x90] sm:$0xff] }
0x15a3   :  { %v3025_v16 = vsel %vm426_vm3, %v7747_v44, -inf }
0x15a4   :  { %3026 = vmax.xlane.f32.xlu1 %v3025_v16  ;;  %v3019_v35 = vsel %vm426_vm3, %v7754_v4, -inf }
0x15a6   :  { %v5167_v1 = vpop.f32.mrb[104].mxu1  ;;  %3017 = vmax.xlane.f32.xlu0 %v3016_v7 }
0x15a7   :  { %v7763_v19 = vadd.f32 %v5851_v43, %v5167_v1  ;;  %v2941_v14 = vpop.f32.mrb[105].mxu1 }
0x15a8   :  { %v5168_v25 = vpop.f32.mrb[106].mxu1  ;;  %3020 = vmax.xlane.f32.xlu1 %v3019_v35  ;;  %v7770_v45 = vadd.f32 %v5852_v24, %v2941_v14  ;;  %v5860_v14 = vld [vmem:[%s8382_s2 + $0x80] sm:$0xff] }
0x15a9   :  { %v7775_v17 = vadd.f32 %v5853_v60, %v5168_v25  ;;  %v2944_v11 = vpop.f32.mrb[107].mxu1  ;;  %v3034_v13 = vsel %vm426_vm3, %v7763_v19, -inf  ;;  %v5861_v25 = vld [vmem:[%s8382_s2 + $0x98] sm:$0xff] }
0x15aa   :  { %3035 = vmax.xlane.f32.xlu0 %v3034_v13  ;;  %v7782_v5 = vadd.f32 %v5854_v6, %v2944_v11  ;;  %v3028_v54 = vsel %vm426_vm3, %v7770_v45, -inf  ;;  %v5862_v13 = vld [vmem:[%s8382_s2 + $0x88] sm:$0xff] }
0x15ab   :  { %v3037_v36 = vsel %vm426_vm3, %v7775_v17, -inf }
0x15ac   :  { %3038 = vmax.xlane.f32.xlu1 %v3037_v36  ;;  %v3031_v49 = vsel %vm426_vm3, %v7782_v5, -inf }
0x15ae   :  { %v5171_v30 = vpop.f32.mrb[108].mxu1  ;;  %3029 = vmax.xlane.f32.xlu0 %v3028_v54 }
0x15af   :  { %v7791_v42 = vadd.f32 %v5855_v21, %v5171_v30  ;;  %v2957_v62 = vpop.f32.mrb[109].mxu1 }
0x15b0   :  { %v5172_v50 = vpop.f32.mrb[110].mxu1  ;;  %3032 = vmax.xlane.f32.xlu1 %v3031_v49  ;;  %v7798_v61 = vadd.f32 %v5856_v38, %v2957_v62 }
0x15b1   :  { %v7803_v18 = vadd.f32 %v5857_v55, %v5172_v50  ;;  %v2960_v31 = vpop.f32.mrb[111].mxu1  ;;  %v3046_v37 = vsel %vm426_vm3, %v7791_v42, -inf }
0x15b2   :  { %3047 = vmax.xlane.f32.xlu0 %v3046_v37  ;;  %v7810_v20 = vadd.f32 %v5858_v27, %v2960_v31  ;;  %v3040_v40 = vsel %vm426_vm3, %v7798_v61, -inf }
0x15b3   :  { %v3049_v8 = vsel %vm426_vm3, %v7803_v18, -inf }
0x15b4   :  { %3050 = vmax.xlane.f32.xlu1 %v3049_v8  ;;  %v3043_v1 = vsel %vm426_vm3, %v7810_v20, -inf }
0x15b6   :  { %v5175_v2 = vpop.f32.mrb[112].mxu1  ;;  %3041 = vmax.xlane.f32.xlu0 %v3040_v40 }
0x15b7   :  { %v7819_v16 = vadd.f32 %v5859_v52, %v5175_v2  ;;  %v2973_v7 = vpop.f32.mrb[113].mxu1 }
0x15b8   :  { %v5176_v43 = vpop.f32.mrb[114].mxu1  ;;  %3044 = vmax.xlane.f32.xlu1 %v3043_v1  ;;  %v7826_v35 = vadd.f32 %v5860_v14, %v2973_v7 }
0x15b9   :  { %v7831_v24 = vadd.f32 %v5861_v25, %v5176_v43  ;;  %v2976_v60 = vpop.f32.mrb[115].mxu1  ;;  %v3058_v11 = vsel %vm426_vm3, %v7819_v16, -inf }
0x15ba   :  { %3059 = vmax.xlane.f32.xlu0 %v3058_v11  ;;  %v7838_v6 = vadd.f32 %v5862_v13, %v2976_v60  ;;  %v3052_v54 = vsel %vm426_vm3, %v7826_v35, -inf }
0x15bb   :  { %v3061_v36 = vsel %vm426_vm3, %v7831_v24, -inf }
0x15bc   :  { %3062 = vmax.xlane.f32.xlu1 %v3061_v36  ;;  %v3055_v62 = vsel %vm426_vm3, %v7838_v6, -inf }
0x15be   :  { %v7844_v30 = vpop.f32.mrb[116].mxu1  ;;  %3053 = vmax.xlane.f32.xlu0 %v3052_v54 }
0x15bf   :  { %v7846_v21 = vpop.f32.mrb[117].mxu1 }
0x15c0   :  { %v7850_v49 = vpop.f32.mrb[118].mxu1  ;;  %3056 = vmax.xlane.f32.xlu1 %v3055_v62 }
0x15c1   :  { %v7852_v50 = vpop.f32.mrb[119].mxu1 }
0x15d1   :  { %3282 = vrot.lane.b32.xlu1 %v7637_v32, %s5890_s4 }
0x15d4   :  { %3280 = vrot.lane.b32.xlu0 %v7609_v23, %s5890_s4 }
0x1627   :  { %v3012_v38 = vpop.xlane.xlu0 %3011 }
0x1628   :  { %v3078_v55 = vsub.f32 %v7709_v63, %v3012_v38  ;;  %v3006_v31 = vpop.xlane.xlu1 %3005 }
0x1629   :  { %v3076_v37 = vsub.f32 %v7714_v47, %v3006_v31 }
0x162a   :  { %v3104_v27 = vmul.f32 1.442695, %v3078_v55 }
0x162b   :  { %v3100_v8 = vmul.f32 1.442695, %v3076_v37  ;;  %v3009_v40 = vpop.xlane.xlu0 %3008 }
0x162c   :  { %5581 = vpow2.f32 %v3104_v27  ;;  %v3077_v2 = vsub.f32 %v7726_v10, %v3009_v40  ;;  %v3015_v52 = vpop.xlane.xlu1 %3014 }
0x162d   :  { %v3079_v7 = vsub.f32 %v7721_v3, %v3015_v52  ;;  %5583 = vpow2.f32 %v3100_v8 }
0x162e   :  { %v3102_v32 = vmul.f32 1.442695, %v3077_v2 }
0x162f   :  { %v3106_v1 = vmul.f32 1.442695, %v3079_v7  ;;  %v3024_v43 = vpop.xlane.xlu0 %3023 }
0x1630   :  { %v3082_v23 = vsub.f32 %v7737_v33, %v3024_v43 }
0x1631   :  { %5585 = vpow2.f32 %v3106_v1  ;;  %v3027_v63 = vpop.xlane.xlu1 %3026 }
0x1632   :  { %v3112_v14 = vmul.f32 1.442695, %v3082_v23  ;;  %v3083_v47 = vsub.f32 %v7747_v44, %v3027_v63  ;;  %5587 = vpow2.f32 %v3102_v32 }
0x1633   :  { %v3018_v25 = vpop.xlane.xlu0 %3017 }
0x1634   :  { %5589 = vpow2.f32 %v3112_v14  ;;  %v3114_v60 = vmul.f32 1.442695, %v3083_v47  ;;  %v3080_v10 = vsub.f32 %v7742_v41, %v3018_v25 }
0x1635   :  { %v3021_v11 = vpop.xlane.xlu1 %3020 }
0x1636   :  { %v7865_v13 = vpop.eup %5581  ;;  %v3108_v3 = vmul.f32 1.442695, %v3080_v10  ;;  %v3081_v36 = vsub.f32 %v7754_v4, %v3021_v11  ;;  %5591 = vpow2.f32 %v3114_v60 }
0x1637   :  { %v3036_v54 = vpop.xlane.xlu0 %3035  ;;  %v3154_v33 = vsel %vm426_vm3, %v7865_v13, 0.0  ;;  %v7870_v62 = vpop.eup %5583 }
0x1638   :  { %5593 = vpow2.f32 %v3108_v3  ;;  %v3110_v44 = vmul.f32 1.442695, %v3081_v36  ;;  %v3086_v38 = vsub.f32 %v7763_v19, %v3036_v54  ;;  %3155 = vadd.xlane.f32.xlu0 %v3154_v33  ;;  %v3148_v27 = vsel %vm426_vm3, %v7870_v62, 0.0 }
0x1639   :  { %v3039_v55 = vpop.xlane.xlu1 %3038 }
0x163a   :  { %v3120_v41 = vmul.f32 1.442695, %v3086_v38  ;;  %v3087_v31 = vsub.f32 %v7775_v17, %v3039_v55  ;;  %5595 = vpow2.f32 %v3110_v44 }
0x163b   :  { %v7874_v37 = vpop.eup %5585  ;;  %v3030_v4 = vpop.xlane.xlu0 %3029 }
0x163c   :  { %5597 = vpow2.f32 %v3120_v41  ;;  %v3122_v8 = vmul.f32 1.442695, %v3087_v31  ;;  %v3084_v40 = vsub.f32 %v7770_v45, %v3030_v4  ;;  %3149 = vadd.xlane.f32.xlu0 %v3148_v27  ;;  %v3157_v19 = vsel %vm426_vm3, %v7874_v37, 0.0  ;;  %v7881_v2 = vpop.eup %5587 }
0x163d   :  { %3158 = vadd.xlane.f32.xlu1 %v3157_v19  ;;  %v3033_v52 = vpop.xlane.xlu1 %3032  ;;  %v3151_v63 = vsel %vm426_vm3, %v7881_v2, 0.0 }
0x163e   :  { %v7883_v17 = vpop.eup %5589  ;;  %v3116_v7 = vmul.f32 1.442695, %v3084_v40  ;;  %v3085_v32 = vsub.f32 %v7782_v5, %v3033_v52  ;;  %5599 = vpow2.f32 %v3122_v8 }
0x163f   :  { %v3048_v1 = vpop.xlane.xlu0 %3047  ;;  %v3166_v43 = vsel %vm426_vm3, %v7883_v17, 0.0 }
0x1640   :  { %5601 = vpow2.f32 %v3116_v7  ;;  %v3118_v45 = vmul.f32 1.442695, %v3085_v32  ;;  %v3090_v23 = vsub.f32 %v7791_v42, %v3048_v1  ;;  %3167 = vadd.xlane.f32.xlu0 %v3166_v43  ;;  %v7891_v14 = vpop.eup %5591 }
0x1641   :  { %3152 = vadd.xlane.f32.xlu1 %v3151_v63  ;;  %v3051_v47 = vpop.xlane.xlu1 %3050  ;;  %v3169_v3 = vsel %vm426_vm3, %v7891_v14, 0.0 }
0x1642   :  { %v7893_v25 = vpop.eup %5593  ;;  %v3128_v5 = vmul.f32 1.442695, %v3090_v23  ;;  %5603 = vpow2.f32 %v3118_v45  ;;  %v3091_v60 = vsub.f32 %v7803_v18, %v3051_v47 }
0x1643   :  { %v3042_v10 = vpop.xlane.xlu0 %3041  ;;  %v3160_v11 = vsel %vm426_vm3, %v7893_v25, 0.0 }
0x1644   :  { %5605 = vpow2.f32 %v3128_v5  ;;  %v3088_v42 = vsub.f32 %v7798_v61, %v3042_v10  ;;  %3161 = vadd.xlane.f32.xlu0 %v3160_v11  ;;  %v7901_v36 = vpop.eup %5595  ;;  %v3130_v38 = vmul.f32 1.442695, %v3091_v60 }
0x1645   :  { %3170 = vadd.xlane.f32.xlu1 %v3169_v3  ;;  %v3045_v54 = vpop.xlane.xlu1 %3044  ;;  %v3163_v4 = vsel %vm426_vm3, %v7901_v36, 0.0 }
0x1646   :  { %v7903_v33 = vpop.eup %5597  ;;  %v3124_v44 = vmul.f32 1.442695, %v3088_v42  ;;  %v3089_v18 = vsub.f32 %v7810_v20, %v3045_v54 }
0x1647   :  { %v3060_v55 = vpop.xlane.xlu0 %3059  ;;  %v3178_v41 = vsel %vm426_vm3, %v7903_v33, 0.0 }
0x1648   :  { %5607 = vpow2.f32 %v3124_v44  ;;  %v3126_v61 = vmul.f32 1.442695, %v3089_v18  ;;  %v3094_v31 = vsub.f32 %v7819_v16, %v3060_v55  ;;  %3179 = vadd.xlane.f32.xlu0 %v3178_v41  ;;  %v7911_v27 = vpop.eup %5599 }
0x1649   :  { %3164 = vadd.xlane.f32.xlu1 %v3163_v4  ;;  %v3063_v8 = vpop.xlane.xlu1 %3062  ;;  %v3181_v16 = vsel %vm426_vm3, %v7911_v27, 0.0 }
0x164a   :  { %v7913_v40 = vpop.eup %5601  ;;  %5609 = vpow2.f32 %v3126_v61  ;;  %v3136_v20 = vmul.f32 1.442695, %v3094_v31  ;;  %v3095_v10 = vsub.f32 %v7831_v24, %v3063_v8  ;;  %v5863_v8 = vld [vmem:[%s8382_s2 + $0xa0] sm:$0xff] }
0x164b   :  { %5611 = vpow2.f32 %v3130_v38  ;;  %v3054_v19 = vpop.xlane.xlu0 %3053  ;;  %v3172_v52 = vsel %vm426_vm3, %v7913_v40, 0.0 }
0x164c   :  { %v3092_v7 = vsub.f32 %v7826_v35, %v3054_v19  ;;  %3173 = vadd.xlane.f32.xlu0 %v3172_v52  ;;  %v7920_v32 = vpop.eup %5603  ;;  %5613 = vpow2.f32 %v3136_v20  ;;  %v3138_v44 = vmul.f32 1.442695, %v3095_v10  ;;  %v7960_v20 = vadd.f32 %v5863_v8, %v7846_v21  ;;  %v5864_v52 = vld [vmem:[%s8382_s2 + $0xa8] sm:$0xff]  ;;  %v5865_v21 = vld [vmem:[%s8382_s2 + $0xb8] sm:$0xff] }
0x164d   :  { %3182 = vadd.xlane.f32.xlu1 %v3181_v16  ;;  %v3057_v1 = vpop.xlane.xlu1 %3056  ;;  %v3175_v35 = vsel %vm426_vm3, %v7920_v32, 0.0 }
0x164e   :  { %v7922_v43 = vpop.eup %5605  ;;  %v3132_v45 = vmul.f32 1.442695, %v3092_v7  ;;  %v3093_v23 = vsub.f32 %v7838_v6, %v3057_v1  ;;  %v7968_v7 = vadd.f32 %v5864_v52, %v7852_v50  ;;  %v3064_v16 = vsel %vm426_vm3, %v7960_v20, -inf }
0x164f   :  { %v3281_v63 = vpop.permute.xlu0 %3280  ;;  %v3190_v47 = vsel %vm426_vm3, %v7922_v43, 0.0  ;;  %v7978_v1 = vadd.f32 %v5865_v21, %v7850_v49 }
0x1650   :  { %5181 = vmatprep.subr.bf16.mxu0 %v3281_v63  ;;  %3191 = vadd.xlane.f32.xlu0 %v3190_v47  ;;  %5615 = vpow2.f32 %v3132_v45  ;;  %v3134_v11 = vmul.f32 1.442695, %v3093_v23  ;;  %v3067_v45 = vsel %vm426_vm3, %v7968_v7, -inf }
0x1651   :  { %5182 = vmatpush3.bf16.msra.mxu0 %v3281_v63  ;;  %3176 = vadd.xlane.f32.xlu1 %v3175_v35  ;;  %v3283_v5 = vpop.permute.xlu1 %3282  ;;  %v3073_v50 = vsel %vm426_vm3, %v7978_v1, -inf }
0x1652   :  { %v7929_v60 = vpop.eup %5607  ;;  %5183 = vmatprep.subr.bf16.mxu0 %v3283_v5  ;;  %5617 = vpow2.f32 %v3134_v11 }
0x1653   :  { %v3184_v6 = vsel %vm426_vm3, %v7929_v60, 0.0  ;;  %5619 = vpow2.f32 %v3138_v44 }
0x1654   :  { %v7934_v42 = vpop.eup %5609 }
0x1655   :  { %v7936_v3 = vpop.eup %5611  ;;  %3185 = vadd.xlane.f32.xlu1 %v3184_v6  ;;  %5184 = vmatpush3.bf16.msra.mxu0 %v3283_v5  ;;  %v3187_v54 = vsel %vm426_vm3, %v7934_v42, 0.0 }
0x1656   :  { %3188 = vadd.xlane.f32.xlu0 %v3187_v54  ;;  %v3193_v24 = vsel %vm426_vm3, %v7936_v3, 0.0  ;;  %v7942_v18 = vpop.eup %5613 }
0x1657   :  { %v3202_v38 = vsel %vm426_vm3, %v7942_v18, 0.0 }
0x1659   :  { %3194 = vadd.xlane.f32.xlu1 %v3193_v24 }
0x165a   :  { %v7946_v55 = vpop.eup %5615 }
0x165b   :  { %v3196_v41 = vsel %vm426_vm3, %v7946_v55, 0.0 }
0x165c   :  { %v7950_v61 = vpop.eup %5617 }
0x165d   :  { %3203 = vadd.xlane.f32.xlu1 %v3202_v38  ;;  %v3199_v31 = vsel %vm426_vm3, %v7950_v61, 0.0  ;;  %v7954_v4 = vpop.eup %5619 }
0x165e   :  { %v3205_v19 = vsel %vm426_vm3, %v7954_v4, 0.0 }
0x1661   :  { %3197 = vadd.xlane.f32.xlu1 %v3196_v41 }
0x1665   :  { %3200 = vadd.xlane.f32.xlu1 %v3199_v31 }
0x1669   :  { %3206 = vadd.xlane.f32.xlu1 %v3205_v19 }
0x166c   :  { %3284 = vrot.lane.b32.xlu0 %v7658_v22, %s5890_s4  ;;  %v5866_v22 = vld [vmem:[%s8382_s2 + $0xb0] sm:$0xff]  ;;  %s5893_s4 = smov 8   ;;  %s5895_s2 = smov 104  }
0x166d   :  { %3065 = vmax.xlane.f32.xlu1 %v3064_v16  ;;  %v7988_v23 = vadd.f32 %v5866_v22, %v7844_v30 }
0x166f   :  { %v3070_v63 = vsel %vm426_vm3, %v7988_v23, -inf }
0x1671   :  { %3068 = vmax.xlane.f32.xlu1 %v3067_v45 }
0x1675   :  { %3074 = vmax.xlane.f32.xlu1 %v3073_v50 }
0x168b   :  { %3071 = vmax.xlane.f32.xlu0 %v3070_v63 }
0x16c5   :  { %v3156_v49 = vpop.xlane.xlu0 %3155 }
0x16c9   :  { %v3150_v47 = vpop.xlane.xlu0 %3149 }
0x16ca   :  { %v3159_v35 = vpop.xlane.xlu1 %3158  ;;  %5621 = vrcp.f32 %v3150_v47 }
0x16cd   :  { %v3168_v5 = vpop.xlane.xlu0 %3167 }
0x16ce   :  { %v3153_v10 = vpop.xlane.xlu1 %3152 }
0x16cf   :  { %5623 = vrcp.f32 %v3153_v10 }
0x16d0   :  { %5625 = vrcp.f32 %v3159_v35 }
0x16d1   :  { %v3162_v11 = vpop.xlane.xlu0 %3161 }
0x16d2   :  { %v3171_v6 = vpop.xlane.xlu1 %3170 }
0x16d4   :  { %v5622_v24 = vpop.eup %5621 }
0x16d5   :  { %v3180_v54 = vpop.xlane.xlu0 %3179  ;;  %v3244_v31 = vmul.f32 %v5622_v24, %v7870_v62 }
0x16d6   :  { %v3165_v44 = vpop.xlane.xlu1 %3164 }
0x16d7   :  { %5627 = vrcp.f32 %v3165_v44 }
0x16d8   :  { %5629 = vrcp.f32 %v3156_v49 }
0x16d9   :  { %v5624_v38 = vpop.eup %5623  ;;  %v3174_v30 = vpop.xlane.xlu0 %3173  ;;  %5631 = vrcp.f32 %v3162_v11 }
0x16da   :  { %v3183_v41 = vpop.xlane.xlu1 %3182  ;;  %v3245_v8 = vmul.f32 %v5624_v38, %v7881_v2  ;;  %5633 = vrcp.f32 %v3171_v6  ;;  %v5626_v45 = vpop.eup %5625 }
0x16db   :  { %v3247_v62 = vmul.f32 %v5626_v45, %v7874_v37 }
0x16dc   :  { %v3268_v19 = vpack.c.bf16 %v3245_v8, %v3244_v31 }
0x16dd   :  { %v3192_v16 = vpop.xlane.xlu0 %3191 }
0x16de   :  { %5187 = vmatprep.mubr.msk.bf16.mxu0 %vm426_vm3, %v3268_v19  ;;  %v3177_v52 = vpop.xlane.xlu1 %3176 }
0x16df   :  { %5635 = vrcp.f32 %v3177_v52 }
0x16e0   :  { %5637 = vrcp.f32 %v3168_v5 }
0x16e1   :  { %v5628_v22 = vpop.eup %5627  ;;  %5639 = vrcp.f32 %v3174_v30 }
0x16e2   :  { %v3186_v21 = vpop.xlane.xlu1 %3185  ;;  %v5630_v63 = vpop.eup %5629  ;;  %v3249_v35 = vmul.f32 %v5628_v22, %v7901_v36  ;;  %5641 = vrcp.f32 %v3183_v41 }
0x16e3   :  { %v3189_v50 = vpop.xlane.xlu0 %3188  ;;  %v5632_v47 = vpop.eup %5631  ;;  %v3246_v10 = vmul.f32 %v5630_v63, %v7865_v13  ;;  %5643 = vrcp.f32 %v3186_v21 }
0x16e4   :  { %v3248_v11 = vmul.f32 %v5632_v47, %v7893_v25  ;;  %5645 = vrcp.f32 %v3189_v50  ;;  %v5634_v44 = vpop.eup %5633 }
0x16e5   :  { %v3269_v5 = vpack.c.bf16 %v3247_v62, %v3246_v10  ;;  %5647 = vrcp.f32 %v3180_v54  ;;  %v3251_v30 = vmul.f32 %v5634_v44, %v7891_v14 }
0x16e6   :  { %v3195_v2 = vpop.xlane.xlu1 %3194  ;;  %v3270_v37 = vpack.c.bf16 %v3249_v35, %v3248_v11 }
0x16e7   :  { %v3285_v49 = vpop.permute.xlu0 %3284  ;;  %5649 = vrcp.f32 %v3195_v2 }
0x16e8   :  { %5185 = vmatprep.subr.bf16.mxu0 %v3285_v49  ;;  %5651 = vrcp.f32 %v3192_v16 }
0x16e9   :  { %5186 = vmatpush3.bf16.msra.mxu0 %v3285_v49  ;;  %v5636_v24 = vpop.eup %5635 }
0x16ea   :  { %v3204_v6 = vpop.xlane.xlu1 %3203  ;;  %5227 = vmatprep.subr.bf16.mxu0 %v5887_v0  ;;  %v5638_v36 = vpop.eup %5637  ;;  %v3253_v25 = vmul.f32 %v5636_v24, %v7920_v32 }
0x16eb   :  { %v5640_v13 = vpop.eup %5639  ;;  %v3250_v41 = vmul.f32 %v5638_v36, %v7883_v17 }
0x16ec   :  { %5188 = vmatmul.mubr.msk.bf16.vlgmr.msra.gmra.mrb[108].mxu0 %vm426_vm3, %v3269_v5  ;;  %v3252_v31 = vmul.f32 %v5640_v13, %v7913_v40  ;;  %v5642_v8 = vpop.eup %5641 }
0x16ed   :  { %5191 = vmatprep.mubr.msk.bf16.mxu0 %vm426_vm3, %v3270_v37  ;;  %v3271_v19 = vpack.c.bf16 %v3251_v30, %v3250_v41  ;;  %v5644_v52 = vpop.eup %5643  ;;  %v3255_v17 = vmul.f32 %v5642_v8, %v7911_v27 }
0x16ee   :  { %v3198_v38 = vpop.xlane.xlu1 %3197  ;;  %v3272_v21 = vpack.c.bf16 %v3253_v25, %v3252_v31  ;;  %v5646_v45 = vpop.eup %5645  ;;  %v3256_v32 = vmul.f32 %v5644_v52, %v7929_v60  ;;  %v5335_v52 = vld [vmem:[%s8383_s6 + $0x20] ss:$0 sps:$4 sm:$0x33]  }
0x16ef   :  { %v5648_v50 = vpop.eup %5647  ;;  %v3257_v40 = vmul.f32 %v5646_v45, %v7934_v42 }
0x16f0   :  { %v3254_v16 = vmul.f32 %v5648_v50, %v7903_v33 }
0x16f1   :  { %v5650_v63 = vpop.eup %5649  ;;  %v3274_v47 = vpack.c.bf16 %v3257_v40, %v3256_v32 }
0x16f2   :  { %v3201_v54 = vpop.xlane.xlu1 %3200  ;;  %v3273_v22 = vpack.c.bf16 %v3255_v17, %v3254_v16  ;;  %v5652_v62 = vpop.eup %5651  ;;  %v3259_v27 = vmul.f32 %v5650_v63, %v7936_v3 }
0x16f3   :  { %5653 = vrcp.f32 %v3201_v54  ;;  %v3258_v42 = vmul.f32 %v5652_v62, %v7922_v43  ;;  %v5867_v62 = vld [vmem:[%s8381_s3] sm:$0xff] }
0x16f4   :  { %5655 = vrcp.f32 %v3198_v38  ;;  %5192 = vmatmul.mubr.msk.bf16.gmra.mrb[112].mxu0 %vm426_vm3, %v3271_v19 }
0x16f5   :  { %5195 = vmatprep.mubr.msk.bf16.mxu0 %vm426_vm3, %v3272_v21  ;;  %v3275_v35 = vpack.c.bf16 %v3259_v27, %v3258_v42  ;;  %v3526_v21 = vsel %vm143_vm0, %v5335_v52, 0 }
0x16f6   :  { %v3207_v14 = vpop.xlane.xlu1 %3206 }
0x16f7   :  { %5657 = vrcp.f32 %v3207_v14 }
0x16f8   :  { %5659 = vrcp.f32 %v3204_v6 }
0x16fa   :  { %v3066_v3 = vpop.xlane.xlu1 %3065 }
0x16fb   :  { %v3096_v43 = vsub.f32 %v7960_v20, %v3066_v3 }
0x16fc   :  { %5196 = vmatmul.mubr.msk.bf16.gmra.mrb[116].mxu0 %vm426_vm3, %v3273_v22 }
0x16fd   :  { %v5654_v2 = vpop.eup %5653  ;;  %5199 = vmatprep.mubr.msk.bf16.mxu0 %vm426_vm3, %v3274_v47  ;;  %v3140_v36 = vmul.f32 1.442695, %v3096_v43 }
0x16fe   :  { %v5656_v49 = vpop.eup %5655  ;;  %v3261_v60 = vmul.f32 %v5654_v2, %v7950_v61  ;;  %v3069_v61 = vpop.xlane.xlu1 %3068 }
0x16ff   :  { %v3260_v33 = vmul.f32 %v5656_v49, %v7946_v55  ;;  %v3097_v13 = vsub.f32 %v7968_v7, %v3069_v61  ;;  %v5868_v49 = vld [vmem:[%s8381_s3 + $0x30] sm:$0xff] }
0x1701   :  { %v5658_v10 = vpop.eup %5657  ;;  %v3276_v11 = vpack.c.bf16 %v3261_v60, %v3260_v33  ;;  %v5869_v33 = vld [vmem:[%s8381_s3 + $0x8] sm:$0xff] }
0x1702   :  { %v5660_v5 = vpop.eup %5659  ;;  %v3263_v6 = vmul.f32 %v5658_v10, %v7954_v4  ;;  %v3075_v30 = vpop.xlane.xlu1 %3074  ;;  %v3142_v4 = vmul.f32 1.442695, %v3097_v13 }
0x1703   :  { %v3262_v44 = vmul.f32 %v5660_v5, %v7942_v18  ;;  %v3099_v18 = vsub.f32 %v7978_v1, %v3075_v30  ;;  %v5334_v1 = vld [vmem:[%s8383_s6 + $0x18] sm:$0xff]  }
0x1704   :  { %5200 = vmatmul.mubr.msk.bf16.gmra.mrb[120].mxu0 %vm426_vm3, %v3275_v35  ;;  %5212 = vmatpush3.bf16.msra.mxu1 %v5334_v1  ;;  %v5870_v5 = vld [vmem:[%s8381_s3 + $0x38] sm:$0xff] }
0x1705   :  { %5203 = vmatprep.mubr.msk.bf16.mxu0 %vm426_vm3, %v3276_v11  ;;  %v3277_v37 = vpack.c.bf16 %v3263_v6, %v3262_v44  ;;  %v3146_v25 = vmul.f32 1.442695, %v3099_v18  ;;  %5213 = vmatprep.subr.bf16.mxu1 %v5887_v0 }
0x1708   :  { %5214 = vmatpush3.bf16.msra.mxu1 %v3526_v21  ;;  %v5874_v21 = vld [vmem:[%s8381_s3 + $0x48] sm:$0xff] }
0x1709   :  { %5243 = vmatprep.subr.bf16.mxu1 %v5887_v0 }
0x170c   :  { %5204 = vmatmul.mubr.msk.bf16.gmra.mrb[124].mxu0 %vm426_vm3, %v3277_v37 }
0x1718   :  { %v3072_v55 = vpop.xlane.xlu0 %3071 }
0x1719   :  { %v3098_v24 = vsub.f32 %v7988_v23, %v3072_v55 }
0x171b   :  { %v3144_v38 = vmul.f32 1.442695, %v3098_v24 }
0x171d   :  { %5661 = vpow2.f32 %v3144_v38 }
0x171e   :  { %5663 = vpow2.f32 %v3140_v36 }
0x171f   :  { %5665 = vpow2.f32 %v3142_v4 }
0x1720   :  { %5667 = vpow2.f32 %v3146_v25 }
0x1727   :  { %v5662_v41 = vpop.eup %5661 }
0x1728   :  { %v3214_v31 = vsel %vm426_vm3, %v5662_v41, 0.0  ;;  %v5664_v20 = vpop.eup %5663 }
0x1729   :  { %3215 = vadd.xlane.f32.xlu1 %v3214_v31  ;;  %v3208_v23 = vsel %vm426_vm3, %v5664_v20, 0.0  ;;  %v5666_v8 = vpop.eup %5665  ;;  %v5871_v31 = vld [vmem:[%s8381_s3 + $0x10] sm:$0xff] }
0x172a   :  { %v3211_v7 = vsel %vm426_vm3, %v5666_v8, 0.0  ;;  %v5668_v54 = vpop.eup %5667 }
0x172b   :  { %v3217_v19 = vsel %vm426_vm3, %v5668_v54, 0.0 }
0x172d   :  { %3209 = vadd.xlane.f32.xlu1 %v3208_v23  ;;  %v5872_v23 = vld [vmem:[%s8381_s3 + $0x40] sm:$0xff] }
0x1731   :  { %3212 = vadd.xlane.f32.xlu1 %v3211_v7 }
0x1735   :  { %3218 = vadd.xlane.f32.xlu1 %v3217_v19 }
0x17b6   :  { %v3216_v45 = vpop.xlane.xlu1 %3215 }
0x17ba   :  { %v3210_v50 = vpop.xlane.xlu1 %3209 }
0x17bb   :  { %5669 = vrcp.f32 %v3210_v50 }
0x17be   :  { %v3213_v14 = vpop.xlane.xlu1 %3212 }
0x17bf   :  { %5671 = vrcp.f32 %v3213_v14  ;;  %v5189_v17 = vpop.f32.mrb[108].mxu0  ;;  %v5875_v14 = vld [vmem:[%s8381_s3 + $0x70] sm:$0xff] }
0x17c0   :  { %v3359_v32 = vpop.f32.mrb[109].mxu0  ;;  %5673 = vrcp.f32 %v3216_v45 }
0x17c1   :  { %v5190_v40 = vpop.f32.mrb[110].mxu0  ;;  %v3454_v2 = vmul.f32 %v5867_v62, %v3359_v32 }
0x17c2   :  { %v3362_v16 = vpop.f32.mrb[111].mxu0  ;;  %v3219_v22 = vpop.xlane.xlu1 %3218 }
0x17c3   :  { %5675 = vrcp.f32 %v3219_v22  ;;  %v3455_v35 = vmul.f32 %v5869_v33, %v3362_v16 }
0x17c5   :  { %v5670_v63 = vpop.eup %5669 }
0x17c6   :  { %v3264_v37 = vmul.f32 %v5670_v63, %v5664_v20  ;;  %v3456_v20 = vmul.f32 %v5871_v31, %v5189_v17 }
0x17c7   :  { %v5193_v47 = vpop.f32.mrb[112].mxu0 }
0x17c8   :  { %v3460_v27 = vmul.f32 %v5868_v49, %v5193_v47  ;;  %v3375_v60 = vpop.f32.mrb[113].mxu0  ;;  %v5877_v47 = vld [vmem:[%s8381_s3 + $0x78] sm:$0xff] }
0x17c9   :  { %v5672_v42 = vpop.eup %5671  ;;  %v5194_v10 = vpop.f32.mrb[114].mxu0  ;;  %v3458_v30 = vmul.f32 %v7648_v39, %v3375_v60 }
0x17ca   :  { %v3478_v11 = vadd.f32 %v3460_v27, %v3454_v2  ;;  %v3461_v6 = vmul.f32 %v5870_v5, %v5194_v10  ;;  %v3378_v44 = vpop.f32.mrb[115].mxu0  ;;  %v3265_v3 = vmul.f32 %v5672_v42, %v5666_v8  ;;  %v5674_v61 = vpop.eup %5673  ;;  %v5878_v27 = vld [vmem:[%s8381_s3 + $0x68] sm:$0xff]  ;;  %v5879_v10 = vld [vmem:[%s8381_s3 + $0x90] sm:$0xff] }
0x17cb   :  { %v3266_v36 = vmul.f32 %v5674_v61, %v5662_v41  ;;  %v3459_v41 = vmul.f32 %v7663_v57, %v3378_v44  ;;  %v5880_v44 = vld [vmem:[%s8381_s3 + $0x80] sm:$0xff]  ;;  %v5881_v61 = vld [vmem:[%s8381_s3 + $0x98] sm:$0xff] }
0x17cc   :  { %v3479_v43 = vadd.f32 %v3461_v6, %v3455_v35  ;;  %v3278_v55 = vpack.c.bf16 %v3265_v3, %v3264_v37 }
0x17cd   :  { %v5676_v24 = vpop.eup %5675 }
0x17ce   :  { %5207 = vmatprep.mubr.msk.bf16.mxu0 %vm426_vm3, %v3278_v55  ;;  %v3267_v13 = vmul.f32 %v5676_v24, %v5668_v54 }
0x17cf   :  { %v5197_v38 = vpop.f32.mrb[116].mxu0 }
0x17d0   :  { %v3464_v4 = vmul.f32 %v7654_v58, %v5197_v38  ;;  %v3391_v18 = vpop.f32.mrb[117].mxu0  ;;  %v3279_v25 = vpack.c.bf16 %v3267_v13, %v3266_v36  ;;  %v5873_v58 = vld [vmem:[%s8381_s3 + $0x18] sm:$0xff]  ;;  %v5882_v36 = vld [vmem:[%s8381_s3 + $0x88] sm:$0xff] }
0x17d1   :  { %v3462_v8 = vmul.f32 %v5872_v23, %v3391_v18  ;;  %v5198_v7 = vpop.f32.mrb[118].mxu0  ;;  %v3457_v1 = vmul.f32 %v5873_v58, %v5190_v40  ;;  %v5876_v40 = vld [vmem:[%s8381_s3 + $0x60] sm:$0xff] }
0x17d2   :  { %v3482_v54 = vadd.f32 %v3464_v4, %v3458_v30  ;;  %v3465_v39 = vmul.f32 %v7669_v29, %v5198_v7  ;;  %v3394_v19 = vpop.f32.mrb[119].mxu0  ;;  %5208 = vmatmul.mubr.msk.bf16.gmra.mrb[128].mxu0 %vm426_vm3, %v3279_v25  ;;  %v5883_v25 = vld [vmem:[%s8381_s3 + $0xb0] sm:$0xff]  ;;  %v5884_v23 = vld [vmem:[%s8381_s3 + $0xa0] sm:$0xff] }
0x17d3   :  { %v3480_v52 = vadd.f32 %v3462_v8, %v3456_v20  ;;  %v3463_v45 = vmul.f32 %v5874_v21, %v3394_v19  ;;  %5231 = vmatprep.mubr.msk.bf16.mxu0 %vm5888_vm1, %v5887_v0 }
0x17d4   :  { %v3483_v57 = vadd.f32 %v3465_v39, %v3459_v41 }
0x17d5   :  { %v3481_v50 = vadd.f32 %v3463_v45, %v3457_v1  ;;  %v5886_v1 = vld [vmem:[%s8381_s3 + $0xa8] sm:$0xff] }
0x17d7   :  { %v5201_v29 = vpop.f32.mrb[120].mxu0 }
0x17d8   :  { %v3468_v17 = vmul.f32 %v5875_v14, %v5201_v29  ;;  %v3407_v32 = vpop.f32.mrb[121].mxu0  ;;  %v8117_v29 = vld [vmem:[%s8384_s10 + $0x10] sm:$0x3f] }
0x17d9   :  { %v3466_v16 = vmul.f32 %v5876_v40, %v3407_v32  ;;  %v5202_v22 = vpop.f32.mrb[122].mxu0  ;;  %v3506_v14 = vrot.slane %v8117_v29, %v6651_v12  ;;  %v5336_v12 = vld [vmem:[%s8385_s7 + $0x18] sm:$0xff]  }
0x17da   :  { %v3486_v63 = vadd.f32 %v3480_v52, %v3468_v17  ;;  %v3469_v62 = vmul.f32 %v5877_v47, %v5202_v22  ;;  %v3410_v2 = vpop.f32.mrb[123].mxu0  ;;  %5228 = vmatpush3.bf16.msra.mxu0 %v5336_v12 }
0x17db   :  { %v3484_v49 = vadd.f32 %v3478_v11, %v3466_v16  ;;  %v3467_v60 = vmul.f32 %v5878_v27, %v3410_v2  ;;  %5229 = vmatprep.subr.bf16.mxu0 %v5887_v0 }
0x17dc   :  { %v3487_v42 = vadd.f32 %v3481_v50, %v3469_v62 }
0x17dd   :  { %v3485_v33 = vadd.f32 %v3479_v43, %v3467_v60 }
0x17df   :  { %v5205_v35 = vpop.f32.mrb[124].mxu0 }
0x17e0   :  { %v3472_v5 = vmul.f32 %v5879_v10, %v5205_v35  ;;  %v3423_v6 = vpop.f32.mrb[125].mxu0 }
0x17e1   :  { %v3470_v37 = vmul.f32 %v5880_v44, %v3423_v6  ;;  %v5206_v11 = vpop.f32.mrb[126].mxu0  ;;  %v5337_v44 = vld [vmem:[%s8385_s7 + $0x20] ss:$0 sps:$4 sm:$0x33]  }
0x17e2   :  { %v3490_v3 = vadd.f32 %v3484_v49, %v3472_v5  ;;  %v3473_v55 = vmul.f32 %v5881_v61, %v5206_v11  ;;  %v3426_v43 = vpop.f32.mrb[127].mxu0 }
0x17e3   :  { %v3488_v24 = vadd.f32 %v3482_v54, %v3470_v37  ;;  %v3471_v13 = vmul.f32 %v5882_v36, %v3426_v43  ;;  %v5885_v54 = vld [vmem:[%s8381_s3 + $0xb8] sm:$0xff]  ;;  %v3723_v37 = vsel %vm143_vm0, %v5337_v44, 0  ;;  %v5338_v44 = vld [vmem:[%s8386_s9 + $0x10] sm:$0x3f]  }
0x17e4   :  { %v3491_v38 = vadd.f32 %v3485_v33, %v3473_v55  ;;  %5230 = vmatpush3.bf16.msra.mxu0 %v3723_v37  ;;  %v3813_v37 = vsel %vm1233_vm4, %v5338_v44, 0 }
0x17e5   :  { %v3489_v30 = vadd.f32 %v3483_v57, %v3471_v13  ;;  %5257 = vmatprep.subr.bf16.mxu0 %v5887_v0 }
0x17e6   :  { %v3500_v4 = vpack.c.bf16 %v3491_v38, %v3490_v3 }
0x17e8   :  { %5216 = vmatmul.mubr.msk.bf16.vlgmr.msra.gmra.mrb[120].mxu1 %vm133_vm2, %v3500_v4 }
0x17e9   :  { %5219 = vmatprep.mubr.msk.bf16.mxu1 %vm5888_vm1, %v5887_v0  ;;  %5244 = vmatpush3.bf16.msra.mxu1 %v3813_v37 }
0x17ea   :  { %5273 = vmatprep.subr.bf16.mxu1 %v5887_v0 }
0x18a5   :  { %v5209_v18 = vpop.f32.mrb[128].mxu0 }
0x18a6   :  { %v3476_v31 = vmul.f32 %v5883_v25, %v5209_v18  ;;  %v3439_v20 = vpop.f32.mrb[129].mxu0 }
0x18a7   :  { %v3474_v8 = vmul.f32 %v5884_v23, %v3439_v20  ;;  %v5210_v7 = vpop.f32.mrb[130].mxu0 }
0x18a8   :  { %v3494_v41 = vadd.f32 %v3488_v24, %v3476_v31  ;;  %v3477_v39 = vmul.f32 %v5885_v54, %v5210_v7  ;;  %v3442_v19 = vpop.f32.mrb[131].mxu0 }
0x18a9   :  { %v3492_v58 = vadd.f32 %v3486_v63, %v3474_v8  ;;  %v3475_v52 = vmul.f32 %v5886_v1, %v3442_v19 }
0x18aa   :  { %v3495_v21 = vadd.f32 %v3489_v30, %v3477_v39 }
0x18ab   :  { %v3493_v45 = vadd.f32 %v3487_v42, %v3475_v52 }
0x18ac   :  { %v3502_v57 = vpack.c.bf16 %v3495_v21, %v3494_v41 }
0x18ad   :  { %v3501_v50 = vpack.c.bf16 %v3493_v45, %v3492_v58  ;;  %v8153_v45 = vrot.slane %v8117_v29, %v6721_v46 }
0x18af   :  { %5220 = vmatmul.mubr.msk.bf16.gmra.mrb[124].mxu1 %vm133_vm2, %v3501_v50 }
0x18b0   :  { %5223 = vmatprep.mubr.msk.bf16.mxu1 %vm5888_vm1, %v5887_v0 }
0x18b7   :  { %5224 = vmatmul.mubr.msk.bf16.gmra.mrb[128].mxu1 %vm133_vm2, %v3502_v57 }
0x18b8   :  { %5245 = vmatprep.mubr.msk.bf16.mxu1 %vm5888_vm1, %v5887_v0 }
0x18bb   :  { %v3562_v17 = vpop.f32.mrb[120].mxu1 }
0x18bc   :  { %v3563_v32 = vadd.f32 %v3562_v17, %v3506_v14  ;;  %v5217_v40 = vpop.f32.mrb[121].mxu1 }
0x18bd   :  { %v3565_v16 = vpop.f32.mrb[122].mxu1 }
0x18be   :  { %v3585_v22 = vadd.f32 %v3563_v32, %v7572_v28  ;;  %v3566_v63 = vadd.f32 %v3565_v16, %v3506_v14  ;;  %v5218_v47 = vpop.f32.mrb[123].mxu1 }
0x18c0   :  { %v3586_v62 = vadd.f32 %v3566_v63, %v7574_v53  ;;  %v3591_v2 = vsel %vm133_vm2, %v3585_v22, 0.0 }
0x18c1   :  { %3592 = vadd.xlane.f32.xlu1 %v3591_v2 }
0x18c2   :  { %v3594_v49 = vsel %vm133_vm2, %v3586_v62, 0.0 }
0x18c5   :  { %3595 = vadd.xlane.f32.xlu1 %v3594_v49 }
0x194e   :  { %v3593_v27 = vpop.xlane.xlu1 %3592 }
0x194f   :  { %v3609_v60 = vmul.f32 0.05, %v3593_v27 }
0x1951   :  { %v3615_v28 = vsub.f32 %v3585_v22, %v3609_v60 }
0x1952   :  { %v3596_v42 = vpop.xlane.xlu1 %3595 }
0x1953   :  { %v3610_v33 = vmul.f32 0.05, %v3596_v42  ;;  %v3621_v35 = vmul.f32 %v3615_v28, %v3615_v28 }
0x1955   :  { %v3616_v53 = vsub.f32 %v3586_v62, %v3610_v33  ;;  %v3627_v10 = vsel %vm133_vm2, %v3621_v35, 0.0 }
0x1956   :  { %3628 = vadd.xlane.f32.xlu0 %v3627_v10 }
0x1957   :  { %v3622_v5 = vmul.f32 %v3616_v53, %v3616_v53 }
0x1959   :  { %v3630_v6 = vsel %vm133_vm2, %v3622_v5, 0.0 }
0x195a   :  { %3631 = vadd.xlane.f32.xlu1 %v3630_v6 }
0x1982   :  { %v3570_v11 = vpop.f32.mrb[124].mxu1 }
0x1983   :  { %v3571_v3 = vadd.f32 %v3570_v11, %v3506_v14  ;;  %v5221_v61 = vpop.f32.mrb[125].mxu1 }
0x1984   :  { %v3573_v55 = vpop.f32.mrb[126].mxu1 }
0x1985   :  { %v3587_v43 = vadd.f32 %v3571_v3, %v7583_v15  ;;  %v3574_v24 = vadd.f32 %v3573_v55, %v3506_v14  ;;  %v5222_v36 = vpop.f32.mrb[127].mxu1 }
0x1987   :  { %v3588_v13 = vadd.f32 %v3574_v24, %v7585_v26  ;;  %v3597_v38 = vsel %vm133_vm2, %v3587_v43, 0.0 }
0x1988   :  { %3598 = vadd.xlane.f32.xlu0 %v3597_v38 }
0x1989   :  { %v3600_v30 = vsel %vm133_vm2, %v3588_v13, 0.0 }
0x198a   :  { %v3578_v4 = vpop.f32.mrb[128].mxu1  ;;  %3601 = vadd.xlane.f32.xlu1 %v3600_v30 }
0x198b   :  { %v3579_v18 = vadd.f32 %v3578_v4, %v3506_v14  ;;  %v5225_v25 = vpop.f32.mrb[129].mxu1 }
0x198c   :  { %v3581_v31 = vpop.f32.mrb[130].mxu1 }
0x198d   :  { %v3589_v20 = vadd.f32 %v3579_v18, %v7592_v51  ;;  %v3582_v23 = vadd.f32 %v3581_v31, %v3506_v14  ;;  %v5226_v8 = vpop.f32.mrb[131].mxu1  ;;  %v8149_v51 = vrot.slane %v8117_v29, %v6716_v9 }
0x198f   :  { %v3590_v15 = vadd.f32 %v3582_v23, %v7594_v59  ;;  %v3603_v7 = vsel %vm133_vm2, %v3589_v20, 0.0 }
0x1990   :  { %3604 = vadd.xlane.f32.xlu0 %v3603_v7 }
0x1991   :  { %v3606_v26 = vsel %vm133_vm2, %v3590_v15, 0.0 }
0x1992   :  { %3607 = vadd.xlane.f32.xlu1 %v3606_v26 }
0x19e3   :  { %v3629_v41 = vpop.xlane.xlu0 %3628 }
0x19e4   :  { %v3645_v54 = vmul.f32 0.05, %v3629_v41 }
0x19e6   :  { %v3651_v39 = vadd.f32 1e-05, %v3645_v54 }
0x19e7   :  { %v3632_v19 = vpop.xlane.xlu1 %3631 }
0x19e8   :  { %5677 = vrsqrt.f32 %v3651_v39  ;;  %v3646_v58 = vmul.f32 0.05, %v3632_v19 }
0x19ea   :  { %v3652_v1 = vadd.f32 1e-05, %v3646_v58 }
0x19ec   :  { %5679 = vrsqrt.f32 %v3652_v1 }
0x19f2   :  { %v5678_v52 = vpop.eup %5677 }
0x19f3   :  { %v3663_v59 = vmul.f32 %v5678_v52, %v3615_v28 }
0x19f5   :  { %v3673_v57 = vmul.f32 %v8149_v51, %v3663_v59 }
0x19f6   :  { %v5680_v21 = vpop.eup %5679 }
0x19f7   :  { %v3664_v50 = vmul.f32 %v5680_v21, %v3616_v53  ;;  %v8158_v17 = vadd.f32 %v8153_v45, %v3673_v57 }
0x19f9   :  { %v3674_v14 = vmul.f32 %v8149_v51, %v3664_v50  ;;  %v4700_v50 = vld [vmem:[%s8387_s8 + $0x2] ss:$0 sm:$0xff] }
0x19fb   :  { %v8161_v32 = vadd.f32 %v8153_v45, %v3674_v14 }
0x19fd   :  { %v3693_v9 = vpack.c.bf16 %v8161_v32, %v8158_v17 }
0x19ff   :  { %5232 = vmatmul.mubr.msk.bf16.vlgmr.msra.gmra.mrb[132].mxu0 %vm133_vm2, %v3693_v9 }
0x1a00   :  { %5235 = vmatprep.mubr.msk.bf16.mxu0 %vm5888_vm1, %v5887_v0 }
0x1a15   :  { %v3599_v46 = vpop.xlane.xlu0 %3598 }
0x1a16   :  { %v3611_v40 = vmul.f32 0.05, %v3599_v46 }
0x1a17   :  { %v3602_v16 = vpop.xlane.xlu1 %3601 }
0x1a18   :  { %v3617_v22 = vsub.f32 %v3587_v43, %v3611_v40  ;;  %v3612_v63 = vmul.f32 0.05, %v3602_v16 }
0x1a1a   :  { %v3618_v47 = vsub.f32 %v3588_v13, %v3612_v63  ;;  %v3623_v62 = vmul.f32 %v3617_v22, %v3617_v22 }
0x1a1c   :  { %v3633_v2 = vsel %vm133_vm2, %v3623_v62, 0.0  ;;  %v3624_v49 = vmul.f32 %v3618_v47, %v3618_v47 }
0x1a1d   :  { %3634 = vadd.xlane.f32.xlu0 %v3633_v2  ;;  %v3605_v12 = vpop.xlane.xlu0 %3604 }
0x1a1e   :  { %v3613_v27 = vmul.f32 0.05, %v3605_v12  ;;  %v3636_v60 = vsel %vm133_vm2, %v3624_v49, 0.0 }
0x1a1f   :  { %3637 = vadd.xlane.f32.xlu1 %v3636_v60  ;;  %v3608_v28 = vpop.xlane.xlu1 %3607 }
0x1a20   :  { %v3619_v42 = vsub.f32 %v3589_v20, %v3613_v27  ;;  %v3614_v33 = vmul.f32 0.05, %v3608_v28 }
0x1a22   :  { %v3620_v35 = vsub.f32 %v3590_v15, %v3614_v33  ;;  %v3625_v53 = vmul.f32 %v3619_v42, %v3619_v42 }
0x1a24   :  { %v3639_v10 = vsel %vm133_vm2, %v3625_v53, 0.0  ;;  %v3626_v5 = vmul.f32 %v3620_v35, %v3620_v35 }
0x1a25   :  { %3640 = vadd.xlane.f32.xlu0 %v3639_v10 }
0x1a26   :  { %v3642_v6 = vsel %vm133_vm2, %v3626_v5, 0.0 }
0x1a27   :  { %3643 = vadd.xlane.f32.xlu1 %v3642_v6 }
0x1aaa   :  { %v3635_v11 = vpop.xlane.xlu0 %3634 }
0x1aab   :  { %v3647_v3 = vmul.f32 0.05, %v3635_v11 }
0x1aac   :  { %v3638_v61 = vpop.xlane.xlu1 %3637 }
0x1aad   :  { %v3653_v55 = vadd.f32 1e-05, %v3647_v3  ;;  %v3648_v43 = vmul.f32 0.05, %v3638_v61  ;;  %v8217_v3 = vrot.slane %v8117_v29, %v6771_v34 }
0x1aaf   :  { %5681 = vrsqrt.f32 %v3653_v55  ;;  %v3654_v24 = vadd.f32 1e-05, %v3648_v43 }
0x1ab1   :  { %5683 = vrsqrt.f32 %v3654_v24 }
0x1ab2   :  { %v3641_v36 = vpop.xlane.xlu0 %3640 }
0x1ab3   :  { %v3649_v13 = vmul.f32 0.05, %v3641_v36 }
0x1ab4   :  { %v3644_v38 = vpop.xlane.xlu1 %3643 }
0x1ab5   :  { %v3655_v30 = vadd.f32 1e-05, %v3649_v13  ;;  %v3650_v4 = vmul.f32 0.05, %v3644_v38 }
0x1ab7   :  { %5685 = vrsqrt.f32 %v3655_v30  ;;  %v3656_v18 = vadd.f32 1e-05, %v3650_v4 }
0x1ab9   :  { %v5682_v25 = vpop.eup %5681  ;;  %5687 = vrsqrt.f32 %v3656_v18 }
0x1aba   :  { %v3665_v31 = vmul.f32 %v5682_v25, %v3617_v22 }
0x1abb   :  { %v5684_v20 = vpop.eup %5683 }
0x1abc   :  { %v3666_v23 = vmul.f32 %v5684_v20, %v3618_v47  ;;  %v3675_v8 = vmul.f32 %v8149_v51, %v3665_v31 }
0x1abe   :  { %v3676_v15 = vmul.f32 %v8149_v51, %v3666_v23  ;;  %v8180_v7 = vadd.f32 %v8153_v45, %v3675_v8 }
0x1ac0   :  { %v8183_v26 = vadd.f32 %v8153_v45, %v3676_v15 }
0x1ac1   :  { %v5686_v41 = vpop.eup %5685 }
0x1ac2   :  { %v3667_v54 = vmul.f32 %v5686_v41, %v3619_v42  ;;  %v3694_v39 = vpack.c.bf16 %v8183_v26, %v8180_v7 }
0x1ac3   :  { %v5688_v19 = vpop.eup %5687 }
0x1ac4   :  { %v3668_v58 = vmul.f32 %v5688_v19, %v3620_v35  ;;  %5236 = vmatmul.mubr.msk.bf16.gmra.mrb[136].mxu0 %vm133_vm2, %v3694_v39  ;;  %v3677_v1 = vmul.f32 %v8149_v51, %v3667_v54  ;;  %v5340_v39 = vld [vmem:[%s8388_s11 + $0x8] ss:$0 sps:$4 sm:$0x33]   ;;  %v4083_v19 = vld [vmem:[%s8389_s12] sm:$0xf] }
0x1ac5   :  { %5239 = vmatprep.mubr.msk.bf16.mxu0 %vm5888_vm1, %v5887_v0 }
0x1ac6   :  { %v3678_v52 = vmul.f32 %v8149_v51, %v3668_v58  ;;  %v8193_v59 = vadd.f32 %v8153_v45, %v3677_v1  ;;  %v4008_v58 = vsel %vm143_vm0, %v5340_v39, 0  ;;  %v8238_v1 = vsel %vm4088_vm6, %v4083_v19, 0 }
0x1ac8   :  { %v8196_v21 = vadd.f32 %v8153_v45, %v3678_v52  ;;  %v5891_v52 = vmov 0  }
0x1ac9   :  { %5317 = vset.pattern.permute.xlu1 %v5891_v52  ;;  %5316 = vset.pattern.permute.xlu0 %v5891_v52 }
0x1aca   :  { %v3695_v57 = vpack.c.bf16 %v8196_v21, %v8193_v59 }
0x1acc   :  { %5240 = vmatmul.mubr.msk.bf16.gmra.mrb[140].mxu0 %vm133_vm2, %v3695_v57 }
0x1acd   :  { %5261 = vmatprep.mubr.msk.bf16.mxu0 %vm5888_vm1, %v5887_v0 }
0x1ad2   :  { %v3759_v14 = vpop.f32.mrb[132].mxu0 }
0x1ad3   :  { %v3760_v51 = vadd.f32 %v4700_v50, %v3759_v14  ;;  %v5233_v9 = vpop.f32.mrb[133].mxu0 }
0x1ad4   :  { %v3762_v46 = vpop.f32.mrb[134].mxu0 }
0x1ad5   :  { %v3763_v40 = vadd.f32 %v4700_v50, %v3762_v46  ;;  %v5234_v16 = vpop.f32.mrb[135].mxu0  ;;  %v3782_v45 = vmax.f32 %v3760_v51, 0.0 }
0x1ad7   :  { %v3783_v22 = vmax.f32 %v3763_v40, 0.0 }
0x1ad9   :  { %v3791_v63 = vpack.c.bf16 %v3783_v22, %v3782_v45 }
0x1adb   :  { %5246 = vmatmul.mubr.msk.bf16.vlgmr.msra.gmra.mrb[132].mxu1 %vm1223_vm5, %v3791_v63 }
0x1adc   :  { %5249 = vmatprep.mubr.msk.bf16.mxu1 %vm5888_vm1, %v5887_v0  ;;  %5274 = vmatpush3.bf16.msra.mxu1 %v8238_v1 }
0x1add   :  { %5285 = vmatprep.subr.bf16.mxu1 %v5887_v0 }
0x1b97   :  { %v3767_v47 = vpop.f32.mrb[136].mxu0 }
0x1b98   :  { %v3768_v62 = vadd.f32 %v4700_v50, %v3767_v47  ;;  %v5237_v2 = vpop.f32.mrb[137].mxu0 }
0x1b99   :  { %v3770_v49 = vpop.f32.mrb[138].mxu0 }
0x1b9a   :  { %v3771_v12 = vadd.f32 %v4700_v50, %v3770_v49  ;;  %v5238_v27 = vpop.f32.mrb[139].mxu0  ;;  %v3784_v60 = vmax.f32 %v3768_v62, 0.0  ;;  %v8250_v49 = vrot.slane %v8117_v29, %v6818_v56 }
0x1b9c   :  { %v3785_v28 = vmax.f32 %v3771_v12, 0.0 }
0x1b9e   :  { %v3792_v42 = vpack.c.bf16 %v3785_v28, %v3784_v60  ;;  %v8254_v28 = vrot.slane %v8117_v29, %v6823_v48 }
0x1b9f   :  { %v3775_v33 = vpop.f32.mrb[140].mxu0 }
0x1ba0   :  { %v3776_v35 = vadd.f32 %v4700_v50, %v3775_v33  ;;  %v5241_v53 = vpop.f32.mrb[141].mxu0  ;;  %5250 = vmatmul.mubr.msk.bf16.gmra.mrb[136].mxu1 %vm1223_vm5, %v3792_v42 }
0x1ba1   :  { %v3778_v10 = vpop.f32.mrb[142].mxu0  ;;  %5253 = vmatprep.mubr.msk.bf16.mxu1 %vm5888_vm1, %v5887_v0 }
0x1ba2   :  { %v3779_v5 = vadd.f32 %v4700_v50, %v3778_v10  ;;  %v5242_v6 = vpop.f32.mrb[143].mxu0  ;;  %v3786_v44 = vmax.f32 %v3776_v35, 0.0 }
0x1ba4   :  { %v3787_v37 = vmax.f32 %v3779_v5, 0.0 }
0x1ba6   :  { %v3793_v11 = vpack.c.bf16 %v3787_v37, %v3786_v44  ;;  %v8268_v44 = vld [vmem:[%s8390_s13] ss:$0 sm:$0xff]  ;;  %s5892_s13 = smov 112  }
0x1ba8   :  { %5254 = vmatmul.mubr.msk.bf16.gmra.mrb[140].mxu1 %vm1223_vm5, %v3793_v11 }
0x1ba9   :  { %5275 = vmatprep.mubr.msk.bf16.mxu1 %vm5888_vm1, %v5887_v0 }
0x1bae   :  { %v3849_v61 = vpop.f32.mrb[132].mxu1 }
0x1baf   :  { %v3850_v55 = vadd.f32 %v3849_v61, %v8217_v3  ;;  %v5247_v43 = vpop.f32.mrb[133].mxu1 }
0x1bb0   :  { %v3852_v24 = vpop.f32.mrb[134].mxu1  ;;  %5276 = vmatmul.mubr.bf16.vlgmr.msra.gmra.mrb[144].mxu1 %v5891_v52 }
0x1bb1   :  { %v3872_v36 = vadd.f32 %v3850_v55, %v8158_v17  ;;  %v3853_v13 = vadd.f32 %v3852_v24, %v8217_v3  ;;  %v5248_v38 = vpop.f32.mrb[135].mxu1  ;;  %5286 = vmatpush3.bf16.msra.mxu1 %v8238_v1  ;;  %5287 = vmatprep.mubr.msk.bf16.mxu1 %vm5888_vm1, %v5887_v0 }
0x1bb3   :  { %v3873_v30 = vadd.f32 %v3853_v13, %v8161_v32  ;;  %v3878_v4 = vsel %vm133_vm2, %v3872_v36, 0.0  ;;  %v5339_v32 = vld [vmem:[%s8388_s11] sm:$0xff]  }
0x1bb4   :  { %3879 = vadd.xlane.f32.xlu0 %v3878_v4  ;;  %5258 = vmatpush3.bf16.msra.mxu0 %v5339_v32 }
0x1bb5   :  { %v3881_v18 = vsel %vm133_vm2, %v3873_v30, 0.0  ;;  %5259 = vmatprep.subr.bf16.mxu0 %v5887_v0 }
0x1bb6   :  { %3882 = vadd.xlane.f32.xlu1 %v3881_v18 }
0x1bb8   :  { %5260 = vmatpush3.bf16.msra.mxu0 %v4008_v58 }
0x1bb9   :  { %5279 = vmatprep.subr.bf16.mxu0 %v5887_v0 }
0x1c41   :  { %v3880_v34 = vpop.xlane.xlu0 %3879 }
0x1c42   :  { %v3896_v25 = vmul.f32 0.05, %v3880_v34 }
0x1c43   :  { %v3883_v31 = vpop.xlane.xlu1 %3882 }
0x1c44   :  { %v3902_v20 = vsub.f32 %v3872_v36, %v3896_v25  ;;  %v3897_v23 = vmul.f32 0.05, %v3883_v31 }
0x1c46   :  { %v3903_v8 = vsub.f32 %v3873_v30, %v3897_v23  ;;  %v3908_v15 = vmul.f32 %v3902_v20, %v3902_v20 }
0x1c48   :  { %v3914_v17 = vsel %vm133_vm2, %v3908_v15, 0.0  ;;  %v3909_v41 = vmul.f32 %v3903_v8, %v3903_v8 }
0x1c49   :  { %3915 = vadd.xlane.f32.xlu0 %v3914_v17 }
0x1c4a   :  { %v3917_v54 = vsel %vm133_vm2, %v3909_v41, 0.0 }
0x1c4b   :  { %3918 = vadd.xlane.f32.xlu1 %v3917_v54 }
0x1c73   :  { %v3857_v57 = vpop.f32.mrb[136].mxu1 }
0x1c74   :  { %v5251_v50 = vpop.f32.mrb[137].mxu1  ;;  %v3858_v34 = vadd.f32 %v3857_v57, %v8217_v3 }
0x1c75   :  { %v8246_v14 = vpop.f32.mrb[138].mxu1 }
0x1c76   :  { %v5252_v51 = vpop.f32.mrb[139].mxu1  ;;  %v3874_v25 = vadd.f32 %v3858_v34, %v8180_v7 }
0x1c7b   :  { %v3865_v9 = vpop.f32.mrb[140].mxu1 }
0x1c7c   :  { %v5255_v46 = vpop.f32.mrb[141].mxu1  ;;  %v3866_v31 = vadd.f32 %v3865_v9, %v8217_v3  ;;  %v3861_v9 = vadd.f32 %v8246_v14, %v8217_v3 }
0x1c7d   :  { %v3868_v40 = vpop.f32.mrb[142].mxu1 }
0x1c7e   :  { %v5256_v16 = vpop.f32.mrb[143].mxu1  ;;  %v3869_v23 = vadd.f32 %v3868_v40, %v8217_v3  ;;  %v3875_v46 = vadd.f32 %v3861_v9, %v8183_v26 }
0x1c80   :  { %v3877_v15 = vadd.f32 %v3869_v23, %v8196_v21  ;;  %v3887_v40 = vsel %vm133_vm2, %v3875_v46, 0.0 }
0x1c82   :  { %v3893_v41 = vsel %vm133_vm2, %v3877_v15, 0.0 }
0x1c83   :  { %v4126_v56 = vpop.f32.mrb[144].mxu1 }
0x1c84   :  { %v5277_v48 = vpop.f32.mrb[145].mxu1 }
0x1c85   :  { %v4129_v29 = vpop.f32.mrb[146].mxu1 }
0x1c86   :  { %v5278_v6 = vpop.f32.mrb[147].mxu1 }
0x1cd6   :  { %v3916_v45 = vpop.xlane.xlu0 %3915 }
0x1cd7   :  { %v3932_v22 = vmul.f32 0.05, %v3916_v45 }
0x1cd8   :  { %v3919_v63 = vpop.xlane.xlu1 %3918 }
0x1cd9   :  { %v3938_v47 = vadd.f32 1e-05, %v3932_v22  ;;  %v3933_v62 = vmul.f32 0.05, %v3919_v63 }
0x1cdb   :  { %5689 = vrsqrt.f32 %v3938_v47  ;;  %v3939_v2 = vadd.f32 1e-05, %v3933_v62 }
0x1cdd   :  { %5691 = vrsqrt.f32 %v3939_v2 }
0x1ce5   :  { %v5690_v12 = vpop.eup %5689 }
0x1ce6   :  { %v3950_v27 = vmul.f32 %v5690_v12, %v3902_v20  ;;  %v8281_v20 = vadd.f32 %v3866_v31, %v8193_v59 }
0x1ce7   :  { %v5692_v60 = vpop.eup %5691 }
0x1ce8   :  { %v3960_v42 = vmul.f32 %v8250_v49, %v3950_v27  ;;  %v3951_v33 = vmul.f32 %v5692_v60, %v3903_v8  ;;  %v3884_v8 = vsel %vm133_vm2, %v3874_v25, 0.0  ;;  %v3890_v17 = vsel %vm133_vm2, %v8281_v20, 0.0 }
0x1cea   :  { %v3961_v35 = vmul.f32 %v8250_v49, %v3951_v33  ;;  %v3970_v53 = vadd.f32 %v8254_v28, %v3960_v42 }
0x1cec   :  { %v3971_v10 = vadd.f32 %v8254_v28, %v3961_v35 }
0x1cee   :  { %v3979_v5 = vpack.c.bf16 %v3971_v10, %v3970_v53 }
0x1cf0   :  { %5262 = vmatmul.mubr.msk.bf16.vlgmr.msra.gmra.mrb[144].mxu0 %vm133_vm2, %v3979_v5 }
0x1cf1   :  { %5265 = vmatprep.mubr.msk.bf16.mxu0 %vm5888_vm1, %v5887_v0  ;;  %5280 = vmatpush3.bf16.msra.mxu0 %v8238_v1 }
0x1cf2   :  { %5291 = vmatprep.subr.bf16.mxu0 %v5887_v0 }
0x1dc3   :  { %v4044_v37 = vpop.f32.mrb[144].mxu0 }
0x1dc4   :  { %v4045_v11 = vadd.f32 %v8268_v44, %v4044_v37  ;;  %v5263_v61 = vpop.f32.mrb[145].mxu0 }
0x1dc5   :  { %v4047_v55 = vpop.f32.mrb[146].mxu0 }
0x1dc6   :  { %4068 = vst.msk [vmem:[#allocation2] sm:$0xff] %vm4067_vm7, %v4045_v11  ;;  %v4048_v43 = vadd.f32 %v8268_v44, %v4047_v55  ;;  %v5264_v24 = vpop.f32.mrb[147].mxu0 }
0x1dc8   :  { %4070 = vst.msk [vmem:[#allocation2 + $0x8] sm:$0xf] %vm4069_vm8, %v4048_v43 }
0x1dc9   :  { %4073 = vst.msk [vmem:[#allocation2 + $0xc] sm:$0xf0] %vm4072_vm9, %v4048_v43 }
0x1dcd   :  { %v4081_v36 = vld [vmem:[#allocation2] sm:$0xff] }
0x1dce   :  { %v4133_v13 = vadd.f32 %v4126_v56, %v4081_v36 }
0x1dcf   :  { %v4082_v38 = vld [vmem:[#allocation2 + $0x8] sm:$0xf] }
0x1dd0   :  { %5693 = vtanh.f32 %v4133_v13  ;;  %v4134_v30 = vadd.f32 %v4129_v29, %v4082_v38  ;;  %v4718_v7 = vmul.f32 -1.442695, %v4133_v13 }
0x1dd2   :  { %5695 = vtanh.f32 %v4134_v30  ;;  %v4719_v54 = vmul.f32 -1.442695, %v4134_v30 }
0x1dd3   :  { %5697 = vpow2.f32 %v4718_v7 }
0x1dd4   :  { %5699 = vpow2.f32 %v4719_v54 }
0x1dda   :  { %v5694_v4 = vpop.eup %5693 }
0x1ddb   :  { %4153 = vrot.lane.b32.xlu0 %v5694_v4, %s5892_s13 }
0x1ddc   :  { %v5696_v18 = vpop.eup %5695 }
0x1ddd   :  { %4155 = vrot.lane.b32.xlu1 %v5696_v18, %s5892_s13  ;;  %v5698_v59 = vpop.eup %5697 }
0x1dde   :  { %v4141_v32 = vadd.f32 1.0, %v5698_v59  ;;  %v5700_v39 = vpop.eup %5699 }
0x1ddf   :  { %v4142_v19 = vadd.f32 1.0, %v5700_v39 }
0x1de0   :  { %5701 = vrcp.f32 %v4141_v32 }
0x1de1   :  { %5703 = vrcp.f32 %v4142_v19 }
0x1dea   :  { %v5702_v58 = vpop.eup %5701 }
0x1deb   :  { %v5704_v50 = vpop.eup %5703  ;;  %v4149_v29 = vmul.f32 0.0, %v5702_v58 }
0x1dec   :  { %v4150_v2 = vmul.f32 0.0, %v5704_v50 }
0x1dfa   :  { %3885 = vadd.xlane.f32.xlu0 %v3884_v8 }
0x1dfe   :  { %3891 = vadd.xlane.f32.xlu0 %v3890_v17 }
0x1e02   :  { %3894 = vadd.xlane.f32.xlu0 %v3893_v41 }
0x1e4d   :  { %v4154_v52 = vpop.permute.xlu0 %4153 }
0x1e4e   :  { %v4159_v21 = vmul.f32 %v5702_v58, %v4154_v52 }
0x1e4f   :  { %v4156_v57 = vpop.permute.xlu1 %4155 }
0x1e50   :  { %4163 = vrot.lane.b32.xlu1 %v4159_v21, %s5893_s4  ;;  %v4160_v51 = vmul.f32 %v5704_v50, %v4156_v57 }
0x1e54   :  { %4165 = vrot.lane.b32.xlu1 %v4160_v51, %s5893_s4 }
0x1e78   :  { %3888 = vadd.xlane.f32.xlu1 %v3887_v40 }
0x1e87   :  { %v3886_v16 = vpop.xlane.xlu0 %3885 }
0x1e88   :  { %v3898_v45 = vmul.f32 0.05, %v3886_v16 }
0x1e8a   :  { %v3904_v22 = vsub.f32 %v3874_v25, %v3898_v45 }
0x1e8b   :  { %v3892_v26 = vpop.xlane.xlu0 %3891 }
0x1e8c   :  { %v3910_v63 = vmul.f32 %v3904_v22, %v3904_v22  ;;  %v3900_v11 = vmul.f32 0.05, %v3892_v26 }
0x1e8e   :  { %v3920_v47 = vsel %vm133_vm2, %v3910_v63, 0.0  ;;  %v3906_v61 = vsub.f32 %v8281_v20, %v3900_v11 }
0x1e8f   :  { %3921 = vadd.xlane.f32.xlu1 %v3920_v47  ;;  %v3895_v14 = vpop.xlane.xlu0 %3894 }
0x1e90   :  { %v3901_v60 = vmul.f32 0.05, %v3895_v14  ;;  %v3912_v55 = vmul.f32 %v3906_v61, %v3906_v61 }
0x1e92   :  { %v3907_v42 = vsub.f32 %v3877_v15, %v3901_v60  ;;  %v3926_v43 = vsel %vm133_vm2, %v3912_v55, 0.0 }
0x1e94   :  { %v3913_v33 = vmul.f32 %v3907_v42, %v3907_v42 }
0x1e96   :  { %v3929_v35 = vsel %vm133_vm2, %v3913_v33, 0.0 }
0x1ec2   :  { %v4164_v62 = vpop.permute.xlu1 %4163 }
0x1ec3   :  { %v8302_v6 = vadd.f32 %v4164_v62, %v4149_v29 }
0x1ec6   :  { %v4166_v12 = vpop.permute.xlu1 %4165 }
0x1ec7   :  { %v8296_v27 = vadd.f32 %v4166_v12, %v4150_v2 }
0x1ec9   :  { %5705 = vtanh.f32 %v8296_v27 }
0x1eca   :  { %5707 = vtanh.f32 %v8302_v6 }
0x1ed3   :  { %v5706_v3 = vpop.eup %5705 }
0x1ed4   :  { %4177 = vrot.lane.b32.xlu1 %v5706_v3, %s5894_s18  ;;  %v5708_v37 = vpop.eup %5707 }
0x1ef8   :  { %3930 = vadd.xlane.f32.xlu1 %v3929_v35 }
0x1f05   :  { %v3889_v53 = vpop.xlane.xlu1 %3888 }
0x1f06   :  { %v3899_v10 = vmul.f32 0.05, %v3889_v53 }
0x1f08   :  { %v3905_v5 = vsub.f32 %v3875_v46, %v3899_v10 }
0x1f0a   :  { %v3911_v56 = vmul.f32 %v3905_v5, %v3905_v5 }
0x1f0c   :  { %v3923_v48 = vsel %vm133_vm2, %v3911_v56, 0.0 }
0x1f0d   :  { %3924 = vadd.xlane.f32.xlu0 %v3923_v48 }
0x1f1c   :  { %v3922_v24 = vpop.xlane.xlu1 %3921 }
0x1f1d   :  { %v3934_v36 = vmul.f32 0.05, %v3922_v24 }
0x1f1f   :  { %v3940_v13 = vadd.f32 1e-05, %v3934_v36 }
0x1f21   :  { %5709 = vrsqrt.f32 %v3940_v13 }
0x1f23   :  { %4175 = vrot.lane.b32.xlu0 %v5708_v37, %s5894_s18 }
0x1f2b   :  { %v5710_v8 = vpop.eup %5709 }
0x1f2c   :  { %v3952_v20 = vmul.f32 %v5710_v8, %v3904_v22 }
0x1f2e   :  { %v3962_v41 = vmul.f32 %v8250_v49, %v3952_v20 }
0x1f30   :  { %v3972_v54 = vadd.f32 %v8254_v28, %v3962_v41 }
0x1f42   :  { %3927 = vadd.xlane.f32.xlu0 %v3926_v43 }
0x1f46   :  { %v4178_v4 = vpop.permute.xlu1 %4177 }
0x1f47   :  { %v4182_v25 = vmul.f32 %v5704_v50, %v4178_v4 }
0x1f85   :  { %v3931_v39 = vpop.xlane.xlu1 %3930 }
0x1f86   :  { %v3937_v19 = vmul.f32 0.05, %v3931_v39 }
0x1f9a   :  { %v3925_v38 = vpop.xlane.xlu0 %3924 }
0x1f9b   :  { %v3935_v30 = vmul.f32 0.05, %v3925_v38 }
0x1f9d   :  { %v3941_v18 = vadd.f32 1e-05, %v3935_v30 }
0x1f9e   :  { %v4176_v34 = vpop.permute.xlu0 %4175 }
0x1f9f   :  { %5711 = vrsqrt.f32 %v3941_v18  ;;  %v4181_v31 = vmul.f32 %v5702_v58, %v4176_v34  ;;  %v3943_v58 = vadd.f32 1e-05, %v3937_v19 }
0x1fa1   :  { %v4185_v23 = vpack.c.bf16 %v4182_v25, %v4181_v31  ;;  %5713 = vrsqrt.f32 %v3943_v58 }
0x1fa3   :  { %4187 = vrot.lane.b32.xlu0 %v4185_v23, %s5895_s2 }
0x1fa9   :  { %v5712_v15 = vpop.eup %5711 }
0x1faa   :  { %v3953_v17 = vmul.f32 %v5712_v15, %v3905_v5 }
0x1fab   :  { %v5714_v50 = vpop.eup %5713 }
0x1fac   :  { %v3963_v7 = vmul.f32 %v8250_v49, %v3953_v17  ;;  %v3955_v51 = vmul.f32 %v5714_v50, %v3907_v42 }
0x1fae   :  { %v3973_v59 = vadd.f32 %v8254_v28, %v3963_v7  ;;  %v3965_v40 = vmul.f32 %v8250_v49, %v3955_v51 }
0x1fb0   :  { %v3980_v32 = vpack.c.bf16 %v3973_v59, %v3972_v54  ;;  %v3975_v22 = vadd.f32 %v8254_v28, %v3965_v40 }
0x1fb2   :  { %5266 = vmatmul.mubr.msk.bf16.gmra.mrb[148].mxu0 %vm133_vm2, %v3980_v32 }
0x1fb3   :  { %5269 = vmatprep.mubr.msk.bf16.mxu0 %vm5888_vm1, %v5887_v0 }
0x1fcf   :  { %v3928_v52 = vpop.xlane.xlu0 %3927 }
0x1fd0   :  { %v3936_v21 = vmul.f32 0.05, %v3928_v52 }
0x1fd2   :  { %v3942_v57 = vadd.f32 1e-05, %v3936_v21 }
0x1fd4   :  { %5715 = vrsqrt.f32 %v3942_v57 }
0x1fde   :  { %v5716_v9 = vpop.eup %5715 }
0x1fdf   :  { %v3954_v46 = vmul.f32 %v5716_v9, %v3906_v61 }
0x1fe1   :  { %v3964_v16 = vmul.f32 %v8250_v49, %v3954_v46 }
0x1fe3   :  { %v3974_v45 = vadd.f32 %v8254_v28, %v3964_v16 }
0x1fe5   :  { %v3981_v63 = vpack.c.bf16 %v3975_v22, %v3974_v45 }
0x1fe7   :  { %5270 = vmatmul.mubr.msk.bf16.gmra.mrb[152].mxu0 %vm133_vm2, %v3981_v63 }
0x1fe8   :  { %5281 = vmatprep.mubr.msk.bf16.mxu0 %vm5888_vm1, %v5887_v0 }
0x2015   :  { %v4188_v47 = vpop.permute.xlu0 %4187 }
0x2016   :  { %5282 = vmatmul.mubr.msk.bf16.vlgmr.msra.gmra.mrb[156].mxu0 %vm4084_vm10, %v4188_v47 }
0x2017   :  { %5292 = vmatpush3.bf16.msra.mxu0 %v8238_v1  ;;  %5293 = vmatprep.mubr.msk.bf16.mxu0 %vm5888_vm1, %v5887_v0 }
0x2085   :  { %v4052_v49 = vpop.f32.mrb[148].mxu0 }
0x2086   :  { %v4053_v62 = vadd.f32 %v8268_v44, %v4052_v49  ;;  %v5267_v2 = vpop.f32.mrb[149].mxu0 }
0x2087   :  { %v4055_v28 = vpop.f32.mrb[150].mxu0 }
0x2088   :  { %4074 = vst.msk [vmem:[#allocation2 + $0x14] sm:$0xff] %vm4067_vm7, %v4053_v62  ;;  %v4056_v12 = vadd.f32 %v8268_v44, %v4055_v28  ;;  %v5268_v3 = vpop.f32.mrb[151].mxu0 }
0x208a   :  { %4076 = vst.msk [vmem:[#allocation2 + $0x20] sm:$0xff] %vm4067_vm7, %v4056_v12 }
0x208f   :  { %v4183_v33 = vld [vmem:[#allocation2 + $0x10] sm:$0xff]  ;;  %v4184_v5 = vld [vmem:[#allocation2 + $0x18] sm:$0xf] }
0x20ba   :  { %v4060_v26 = vpop.f32.mrb[152].mxu0 }
0x20bb   :  { %v4061_v14 = vadd.f32 %v8268_v44, %v4060_v26  ;;  %v5271_v60 = vpop.f32.mrb[153].mxu0 }
0x20bc   :  { %v4063_v1 = vpop.f32.mrb[154].mxu0 }
0x20bd   :  { %4077 = vst.msk [vmem:[#allocation2 + $0x28] sm:$0xf] %vm4069_vm8, %v4061_v14  ;;  %v4064_v0 = vadd.f32 %v8268_v44, %v4063_v1  ;;  %v5272_v42 = vpop.f32.mrb[155].mxu0 }
0x20be   :  { %4079 = vst.msk [vmem:[#allocation2 + $0x2c] sm:$0xf0] %vm4072_vm9, %v4061_v14 }
0x20bf   :  { %4080 = vst.msk [vmem:[#allocation2 + $0x34] sm:$0xff] %vm4067_vm7, %v4064_v0 }
0x20c4   :  { %v4284_v21 = vld [vmem:[#allocation2 + $0x28] sm:$0xf] }
0x20e9   :  { %v4226_v35 = vpop.f32.mrb[156].mxu0 }
0x20ea   :  { %v4233_v53 = vadd.f32 %v4226_v35, %v4183_v33  ;;  %v5283_v10 = vpop.f32.mrb[157].mxu0 }
0x20eb   :  { %v4229_v56 = vpop.f32.mrb[158].mxu0 }
0x20ec   :  { %5717 = vtanh.f32 %v4233_v53  ;;  %v4234_v48 = vadd.f32 %v4229_v56, %v4184_v5  ;;  %v5284_v29 = vpop.f32.mrb[159].mxu0  ;;  %v4721_v44 = vmul.f32 -1.442695, %v4233_v53 }
0x20ee   :  { %5719 = vtanh.f32 %v4234_v48  ;;  %v4722_v61 = vmul.f32 -1.442695, %v4234_v48 }
0x20ef   :  { %5721 = vpow2.f32 %v4721_v44 }
0x20f0   :  { %5723 = vpow2.f32 %v4722_v61 }
0x20f6   :  { %v5718_v37 = vpop.eup %5717 }
0x20f7   :  { %4253 = vrot.lane.b32.xlu1 %v5718_v37, %s5892_s13  ;;  %v4383_v37 = vld [vmem:[#allocation2 + $0x30] sm:$0xff] }
0x20f8   :  { %v5720_v11 = vpop.eup %5719 }
0x20f9   :  { %v5722_v55 = vpop.eup %5721 }
0x20fa   :  { %v4241_v43 = vadd.f32 1.0, %v5722_v55  ;;  %v5724_v24 = vpop.eup %5723  ;;  %v4384_v55 = vld [vmem:[#allocation2 + $0x38] sm:$0xf] }
0x20fb   :  { %4255 = vrot.lane.b32.xlu1 %v5720_v11, %s5892_s13  ;;  %v4242_v36 = vadd.f32 1.0, %v5724_v24 }
0x20fc   :  { %5725 = vrcp.f32 %v4241_v43 }
0x20fd   :  { %5727 = vrcp.f32 %v4242_v36 }
0x2106   :  { %v5726_v13 = vpop.eup %5725 }
0x2107   :  { %v5728_v4 = vpop.eup %5727  ;;  %v4249_v25 = vmul.f32 %v5726_v13, %v8302_v6 }
0x2108   :  { %v4250_v8 = vmul.f32 %v5728_v4, %v8296_v27  ;;  %v4283_v27 = vld [vmem:[#allocation2 + $0x20] sm:$0xff] }
0x2169   :  { %v4254_v38 = vpop.permute.xlu1 %4253 }
0x216a   :  { %v4259_v30 = vmul.f32 %v5726_v13, %v4254_v38 }
0x216c   :  { %4263 = vrot.lane.b32.xlu1 %v4259_v30, %s5893_s4 }
0x216d   :  { %v4256_v18 = vpop.permute.xlu1 %4255 }
0x216e   :  { %v4260_v34 = vmul.f32 %v5728_v4, %v4256_v18 }
0x2170   :  { %4265 = vrot.lane.b32.xlu0 %v4260_v34, %s5893_s4 }
0x21de   :  { %v4264_v31 = vpop.permute.xlu1 %4263 }
0x21df   :  { %v4269_v23 = vadd.f32 %v4264_v31, %v4249_v25 }
0x21e1   :  { %5729 = vtanh.f32 %v4269_v23 }
0x21e2   :  { %v4266_v20 = vpop.permute.xlu0 %4265 }
0x21e3   :  { %v4270_v15 = vadd.f32 %v4266_v20, %v4250_v8 }
0x21e5   :  { %5731 = vtanh.f32 %v4270_v15 }
0x21eb   :  { %v5730_v17 = vpop.eup %5729 }
0x21ec   :  { %4275 = vrot.lane.b32.xlu1 %v5730_v17, %s5894_s18 }
0x21ef   :  { %v5732_v41 = vpop.eup %5731 }
0x21f0   :  { %4277 = vrot.lane.b32.xlu0 %v5732_v41, %s5894_s18 }
0x225e   :  { %v4276_v7 = vpop.permute.xlu1 %4275 }
0x225f   :  { %v4281_v59 = vmul.f32 %v5726_v13, %v4276_v7 }
0x2262   :  { %v4278_v54 = vpop.permute.xlu0 %4277 }
0x2263   :  { %v4282_v32 = vmul.f32 %v5728_v4, %v4278_v54 }
0x2265   :  { %v4285_v39 = vpack.c.bf16 %v4282_v32, %v4281_v59 }
0x2267   :  { %4287 = vrot.lane.b32.xlu1 %v4285_v39, %s5895_s2 }
0x22d9   :  { %v4288_v6 = vpop.permute.xlu1 %4287 }
0x22da   :  { %5288 = vmatmul.mubr.msk.bf16.vlgmr.msra.gmra.mrb[148].mxu1 %vm4084_vm10, %v4288_v6 }
0x23ad   :  { %v4326_v19 = vpop.f32.mrb[148].mxu1 }
0x23ae   :  { %v4333_v58 = vadd.f32 %v4326_v19, %v4283_v27  ;;  %v5289_v52 = vpop.f32.mrb[149].mxu1  ;;  %v4729_v19 = vld [vmem:[%s8391_s14] ss:$0 sm:$0xff] }
0x23af   :  { %v4329_v57 = vpop.f32.mrb[150].mxu1  ;;  %v21_v52 = vstv %s8392_s15 }
0x23b0   :  { %5733 = vtanh.f32 %v4333_v58  ;;  %v4334_v50 = vadd.f32 %v4329_v57, %v4284_v21  ;;  %v5290_v51 = vpop.f32.mrb[151].mxu1  ;;  %v4724_v40 = vmul.f32 -1.442695, %v4333_v58  ;;  %22 = vst [vmem:[#allocation3] sm:$0x1] %v21_v52 }
0x23b2   :  { %5735 = vtanh.f32 %v4334_v50  ;;  %v4725_v16 = vmul.f32 -1.442695, %v4334_v50 }
0x23b3   :  { %5737 = vpow2.f32 %v4724_v40 }
0x23b4   :  { %5739 = vpow2.f32 %v4725_v16 }
0x23ba   :  { %v5734_v9 = vpop.eup %5733 }
0x23bb   :  { %4353 = vrot.lane.b32.xlu0 %v5734_v9, %s5892_s13 }
0x23bc   :  { %v5736_v46 = vpop.eup %5735 }
0x23bd   :  { %4355 = vrot.lane.b32.xlu1 %v5736_v46, %s5892_s13  ;;  %v5738_v45 = vpop.eup %5737 }
0x23be   :  { %v5740_v22 = vpop.eup %5739  ;;  %v4341_v63 = vadd.f32 1.0, %v5738_v45 }
0x23bf   :  { %v4342_v47 = vadd.f32 1.0, %v5740_v22 }
0x23c0   :  { %5741 = vrcp.f32 %v4341_v63 }
0x23c1   :  { %5743 = vrcp.f32 %v4342_v47  ;;  %v4730_v47 = vld [vmem:[#allocation3] ss:$0 sm:$0xff] }
0x23ca   :  { %v5742_v49 = vpop.eup %5741 }
0x23cb   :  { %v5744_v28 = vpop.eup %5743  ;;  %v4349_v26 = vmul.f32 %v5742_v49, %v4269_v23 }
0x23cc   :  { %v4350_v1 = vmul.f32 %v5744_v28, %v4270_v15 }
0x242d   :  { %v4354_v62 = vpop.permute.xlu0 %4353 }
0x242e   :  { %v4359_v2 = vmul.f32 %v5742_v49, %v4354_v62 }
0x242f   :  { %v4356_v12 = vpop.permute.xlu1 %4355 }
0x2430   :  { %4363 = vrot.lane.b32.xlu0 %v4359_v2, %s5893_s4  ;;  %v4360_v3 = vmul.f32 %v5744_v28, %v4356_v12  ;;  %v4518_v12 = vld [vmem:[%s8393_s1] sm:$0xff] }
0x2432   :  { %4365 = vrot.lane.b32.xlu1 %v4360_v3, %s5893_s4  ;;  %v4519_v3 = vld [vmem:[%s8393_s1 + $0x8] sm:$0xf] }
0x24a2   :  { %v4364_v14 = vpop.permute.xlu0 %4363 }
0x24a3   :  { %v4369_v60 = vadd.f32 %v4364_v14, %v4349_v26 }
0x24a4   :  { %v4366_v0 = vpop.permute.xlu1 %4365 }
0x24a5   :  { %5745 = vtanh.f32 %v4369_v60  ;;  %v4370_v42 = vadd.f32 %v4366_v0, %v4350_v1 }
0x24a7   :  { %5747 = vtanh.f32 %v4370_v42 }
0x24af   :  { %v5746_v33 = vpop.eup %5745 }
0x24b0   :  { %4375 = vrot.lane.b32.xlu0 %v5746_v33, %s5894_s18 }
0x24b1   :  { %v5748_v35 = vpop.eup %5747 }
0x24b2   :  { %4377 = vrot.lane.b32.xlu1 %v5748_v35, %s5894_s18 }
0x2522   :  { %v4376_v53 = vpop.permute.xlu0 %4375 }
0x2523   :  { %v4381_v5 = vmul.f32 %v5742_v49, %v4376_v53 }
0x2524   :  { %v4378_v10 = vpop.permute.xlu1 %4377 }
0x2525   :  { %v4382_v56 = vmul.f32 %v5744_v28, %v4378_v10 }
0x2527   :  { %v4385_v48 = vpack.c.bf16 %v4382_v56, %v4381_v5 }
0x2529   :  { %4387 = vrot.lane.b32.xlu0 %v4385_v48, %s5895_s2 }
0x259b   :  { %v4388_v29 = vpop.permute.xlu0 %4387 }
0x259c   :  { %5294 = vmatmul.mubr.msk.bf16.vlgmr.msra.gmra.mrb[160].mxu0 %vm4084_vm10, %v4388_v29 }
0x266f   :  { %v4426_v11 = vpop.f32.mrb[160].mxu0 }
0x2670   :  { %v4433_v44 = vadd.f32 %v4426_v11, %v4383_v37  ;;  %v5295_v61 = vpop.f32.mrb[161].mxu0 }
0x2671   :  { %v4429_v43 = vpop.f32.mrb[162].mxu0 }
0x2672   :  { %5749 = vtanh.f32 %v4433_v44  ;;  %v4434_v24 = vadd.f32 %v4429_v43, %v4384_v55  ;;  %v5296_v36 = vpop.f32.mrb[163].mxu0  ;;  %v4727_v30 = vmul.f32 -1.442695, %v4433_v44 }
0x2674   :  { %5751 = vtanh.f32 %v4434_v24  ;;  %v4728_v4 = vmul.f32 -1.442695, %v4434_v24 }
0x2675   :  { %5753 = vpow2.f32 %v4727_v30 }
0x2676   :  { %5755 = vpow2.f32 %v4728_v4 }
0x267c   :  { %v5750_v13 = vpop.eup %5749 }
0x267d   :  { %4453 = vrot.lane.b32.xlu1 %v5750_v13, %s5892_s13 }
0x267e   :  { %v5752_v38 = vpop.eup %5751 }
0x267f   :  { %4455 = vrot.lane.b32.xlu0 %v5752_v38, %s5892_s13  ;;  %v5754_v18 = vpop.eup %5753 }
0x2680   :  { %v5756_v34 = vpop.eup %5755  ;;  %v4441_v25 = vadd.f32 1.0, %v5754_v18 }
0x2681   :  { %v4442_v31 = vadd.f32 1.0, %v5756_v34 }
0x2682   :  { %5757 = vrcp.f32 %v4441_v25 }
0x2683   :  { %5759 = vrcp.f32 %v4442_v31 }
0x268c   :  { %v5758_v23 = vpop.eup %5757 }
0x268d   :  { %v5760_v15 = vpop.eup %5759  ;;  %v4449_v7 = vmul.f32 %v5758_v23, %v4369_v60 }
0x268e   :  { %v4450_v32 = vmul.f32 %v5760_v15, %v4370_v42 }
0x26ef   :  { %v4454_v8 = vpop.permute.xlu1 %4453 }
0x26f0   :  { %v4459_v20 = vmul.f32 %v5758_v23, %v4454_v8 }
0x26f1   :  { %v4456_v17 = vpop.permute.xlu0 %4455 }
0x26f2   :  { %4463 = vrot.lane.b32.xlu1 %v4459_v20, %s5893_s4  ;;  %v4460_v41 = vmul.f32 %v5760_v15, %v4456_v17 }
0x26f4   :  { %4465 = vrot.lane.b32.xlu0 %v4460_v41, %s5893_s4 }
0x2764   :  { %v4464_v54 = vpop.permute.xlu1 %4463 }
0x2765   :  { %v4469_v59 = vadd.f32 %v4464_v54, %v4449_v7 }
0x2766   :  { %v4466_v39 = vpop.permute.xlu0 %4465 }
0x2767   :  { %5761 = vtanh.f32 %v4469_v59  ;;  %v4470_v6 = vadd.f32 %v4466_v39, %v4450_v32 }
0x2769   :  { %5763 = vtanh.f32 %v4470_v6 }
0x2771   :  { %v5762_v27 = vpop.eup %5761 }
0x2772   :  { %4475 = vrot.lane.b32.xlu1 %v5762_v27, %s5894_s18 }
0x2773   :  { %v5764_v58 = vpop.eup %5763 }
0x2774   :  { %4477 = vrot.lane.b32.xlu0 %v5764_v58, %s5894_s18 }
0x2776   :  { %4489 = vrot.lane.b32.xlu1 %v4729_v19, %s5896_s20 }
0x27e4   :  { %v4476_v21 = vpop.permute.xlu1 %4475 }
0x27e5   :  { %v4481_v57 = vmul.f32 %v5758_v23, %v4476_v21 }
0x27e6   :  { %v4478_v50 = vpop.permute.xlu0 %4477 }
0x27e7   :  { %v4482_v51 = vmul.f32 %v5760_v15, %v4478_v50 }
0x27e8   :  { %v4490_v9 = vpop.permute.xlu1 %4489 }
0x27e9   :  { %v4492_v46 = vmul.f32 %v4490_v9, %v4481_v57  ;;  %v4493_v40 = vmul.f32 %v4490_v9, %v4482_v51 }
0x27eb   :  { %4496 = vrot.lane.b32.xlu0 %v4492_v46, %s5895_s2  ;;  %4498 = vrot.lane.b32.xlu1 %v4493_v40, %s5895_s2 }
0x285d   :  { %v4497_v16 = vpop.permute.xlu0 %4496  ;;  %v4499_v45 = vpop.permute.xlu1 %4498 }
0x285e   :  { %v4502_v22 = vsel %vm4084_vm10, %v4497_v16, 0.0  ;;  %v4506_v63 = vsel %vm4505_vm11, %v4499_v45, 0.0 }
0x285f   :  { %4503 = vadd.xlane.f32.xlu0 %v4502_v22  ;;  %4507 = vadd.xlane.f32.xlu1 %v4506_v63 }
0x28ec   :  { %v4504_v49 = vpop.xlane.xlu0 %4503  ;;  %v4508_v62 = vpop.xlane.xlu1 %4507 }
0x28ed   :  { %v4516_v2 = vadd.f32 %v4730_v47, %v4504_v49  ;;  %v4517_v28 = vadd.f32 %v4730_v47, %v4508_v62 }
0x28ef   :  { %4522 = vperm.xlu0 %5316, %v4516_v2   ;;  %4527 = vperm.xlu1 %5317, %v4517_v28  }
0x296e   :  { %v4523_v26 = vpop.permute.xlu0 %4522  ;;  %v4528_v14 = vpop.permute.xlu1 %4527 }
0x296f   :  { %v4530_v60 = vmul.f32 %v4523_v26, %v4518_v12  ;;  %v4531_v1 = vmul.f32 %v4528_v14, %v4519_v3 }
0x2971   :  { %v4533_v0 = vsel %vm4532_vm12, %v4530_v60, 0.0  ;;  %v4535_v42 = vsel %vm4534_vm13, %v4531_v1, 0.0 }
0x2972   :  { %v4536_v33 = vadd.f32 %v4535_v42, %v4533_v0 }
0x2974   :  { %v4537_v35 = vrot.slane %v4536_v33, 4 }
0x2976   :  { %v4538_v53 = vadd.f32 %v4537_v35, %v4536_v33 }
0x2978   :  { %v4539_v10 = vrot.slane %v4538_v53, 2 }
0x297a   :  { %v4540_v5 = vadd.f32 %v4539_v10, %v4538_v53 }
0x297c   :  { %v4541_v56 = vrot.slane %v4540_v5, 1 }
0x297e   :  { %v4542_v48 = vadd.f32 %v4541_v56, %v4540_v5 }
0x2980   :  { %4544 = vst.msk [vmem:[%s8394_s16] sm:$0x1] %vm4543_vm14, %v4542_v48 }

</bundles_post_ra>
